<compile_context>
chip_gen: v5e
topology: v5e:2x2
jax: 0.10.0
libtpu: 0.0.40
codegen_flags: <defaults>
</compile_context>

<pallas_src>
import jax
import jax.numpy as jnp
from jax.experimental import pallas as pl
from jax.experimental.pallas import tpu as pltpu

N_CLASSES = 10
N_EXPERTS = 9                  # experts 0..8 (len(model_path_dict))
UNTARGETED_IDX = N_EXPERTS     # stacked-model index 9
NAIVE_IDX = N_EXPERTS + 1      # stacked-model index 10
N_MODELS = N_EXPERTS + 2       # 11 stacked models
C_PAD = 128                    # class dim padded to a full lane width
MC = N_MODELS * C_PAD          # 1408 logit rows (model-major, class within)


def _network_kernel(patches_ref, pool_ref, convw_ref, convb_ref,
                    fcwt_ref, fcbt_ref, out_ref):
    """All 11 models' conv -> ReLU -> GAP -> FC for one image tile.

    patches_ref : (KP, tile)        bf16   im2col patches, lane-dense
    pool_ref    : (tile, imgs)      f32    block-diagonal GAP matrix (0/1)
    convw_ref   : (11*Cmid, KP)     bf16   stacked conv weights
    convb_ref   : (11*Cmid, 1)      f32    stacked conv biases
    fcwt_ref    : (11*C_PAD, 11*Cmid) f32  block-diag FC weights^T, 1/HW folded
    fcbt_ref    : (11*C_PAD, 1)     f32    stacked FC biases
    out_ref     : (11*C_PAD, imgs)  f32    logits (transposed; wrapper fixes)
    """
    # 3x3 conv for all 11 models: ONE fused bf16 MXU matmul, f32 accumulate.
    acc = jnp.dot(convw_ref[...], patches_ref[...],
                  preferred_element_type=jnp.float32)            # (176, tile)
    acc = jnp.maximum(acc + convb_ref[...], 0.0)                 # bias + ReLU

    # Global average pool on the MXU (1/HW is folded into the FC weights).
    feat = jnp.dot(acc, pool_ref[...],
                   preferred_element_type=jnp.float32)           # (176, imgs)

    # FC for all 11 models: one block-diagonal matmul + bias; single block store.
    logits_t = jnp.dot(fcwt_ref[...], feat,
                       preferred_element_type=jnp.float32) + fcbt_ref[...]
    out_ref[...] = logits_t                                      # (1408, imgs)


def _init_model_params(key, c_in, c_mid):
    k1, k2, k3, k4 = jax.random.split(key, 4)
    conv_w = jax.random.normal(k1, (9, c_in, c_mid), jnp.float32) * 0.2
    conv_b = jax.random.normal(k2, (1, c_mid), jnp.float32) * 0.1
    fc_w = jax.random.normal(k3, (c_mid, N_CLASSES), jnp.float32) * 0.2
    fc_b = jax.random.normal(k4, (1, N_CLASSES), jnp.float32) * 0.1
    return conv_w, conv_b, fc_w, fc_b


def make_network_params(key, c_in, c_mid):
    """Stacked params for all 11 models: experts 0..8, untargeted (9), naive (10)."""
    keys = jax.random.split(key, N_MODELS)
    models = [_init_model_params(keys[i], c_in, c_mid) for i in range(N_MODELS)]
    return jax.tree_util.tree_map(lambda *a: jnp.stack(a, axis=0), *models)


def _pack_params(params, c_in, hw):
    """Stacked torch-like params -> kernel layout (all 11 models fused)."""
    conv_w, conv_b, fc_w, fc_b = params
    m, _, _, c_mid = conv_w.shape
    k = 9 * c_in
    kp = ((k + 31) // 32) * 32
    # Conv weights: (M, 9, Cin, Cmid) -> (M*Cmid, KP) bf16, rows model-major.
    cw = conv_w.transpose(0, 3, 1, 2).reshape(m, c_mid, k)
    cw = jnp.pad(cw, ((0, 0), (0, 0), (0, kp - k)))
    cw = cw.reshape(m * c_mid, kp).astype(jnp.bfloat16)
    # Conv biases: (M*Cmid, 1) f32.
    cb = conv_b.transpose(0, 2, 1).reshape(m * c_mid, 1).astype(jnp.float32)
    # FC weights: block-diagonal, transposed, with GAP's 1/HW pre-folded in.
    #   fcwt[m*C_PAD + c, n*Cmid + f] = (m == n) * fc_w[m, f, c] / HW
    fw = (fc_w / jnp.float32(hw))                                # (M, Cmid, 10)
    fw = jnp.pad(fw, ((0, 0), (0, 0), (0, C_PAD - N_CLASSES)))   # (M, Cmid, 128)
    eye = jnp.eye(m, dtype=jnp.float32)
    fcwt = jnp.einsum('mn,mfc->mcnf', eye, fw).reshape(m * C_PAD, m * c_mid)
    fcwt = fcwt.astype(jnp.float32)
    # FC biases: (M*C_PAD, 1) f32.
    fcbt = jnp.pad(fc_b, ((0, 0), (0, 0), (0, C_PAD - N_CLASSES)))
    fcbt = fcbt.reshape(m * C_PAD, 1).astype(jnp.float32)
    return cw, cb, fcwt, fcbt, kp


def _im2col_t(x_nhwc, kp):
    """3x3 same-padding patches, transposed + zero-padded to (KP, N*H*W), bf16."""
    n, h, w, c = x_nhwc.shape
    xp = jnp.pad(x_nhwc, ((0, 0), (1, 1), (1, 1), (0, 0)))
    taps = [xp[:, kh:kh + h, kw:kw + w, :].reshape(n * h * w, c)
            for kh in range(3) for kw in range(3)]
    pat = jnp.concatenate(taps, axis=1)                          # (NHW, 9*Cin)
    pat = jnp.pad(pat, ((0, 0), (0, kp - 9 * c)))
    return pat.T.astype(jnp.bfloat16)                            # (KP, NHW)


@jax.jit
def network_forward(x_nchw, params):
    """Mirrors Network.forward: naive model -> flat argmax -> expert/untargeted."""
    x = jnp.transpose(x_nchw, (0, 2, 3, 1)).astype(jnp.float32)  # NCHW -> NHWC
    n, h, w, c_in = x.shape
    hw = h * w
    assert hw % 128 == 0, "H*W must be a multiple of 128 (lane-dense tiles)"

    cw, cb, fcwt, fcbt, kp = _pack_params(params, c_in, hw)
    patches = _im2col_t(x, kp)                                   # (KP, N*H*W) bf16

    # Image-aligned NHW tiles. Budget is driven by the all-models f32 conv
    # accumulator (11*Cmid rows x tile lanes): at tile<=8192 cols that is
    # ~5.6 MiB, patches ~0.5 MiB x 2 buffers, pool ~1 MiB -> well under the
    # 48 MiB ceiling we allow (v7x has 64 MiB physical VMEM; v5e/v6e have 128).
    imgs_per_tile = max(1, min(n, 8192 // hw))
    while n % imgs_per_tile:
        imgs_per_tile -= 1
    n_tiles = n // imgs_per_tile
    tile = imgs_per_tile * hw

    # Block-diagonal GAP matrix (0/1; the 1/HW scale is folded into fcwt).
    col = jnp.arange(tile, dtype=jnp.int32) // hw                # image id per col
    pool = (col[:, None] == jnp.arange(imgs_per_tile, dtype=jnp.int32)[None, :]
            ).astype(jnp.float32)                                # (tile, imgs)

    out = pl.pallas_call(
        _network_kernel,
        out_shape=jax.ShapeDtypeStruct((n_tiles, MC, imgs_per_tile), jnp.float32),
        grid_spec=pltpu.PrefetchScalarGridSpec(
            num_scalar_prefetch=0,
            grid=(n_tiles,),
            in_specs=[
                pl.BlockSpec((kp, tile), lambda t: (0, t)),      # patches (tiled)
                pl.BlockSpec(pool.shape, lambda t: (0, 0)),      # pool   (resident)
                pl.BlockSpec(cw.shape, lambda t: (0, 0)),        # conv w (resident)
                pl.BlockSpec(cb.shape, lambda t: (0, 0)),        # conv b (resident)
                pl.BlockSpec(fcwt.shape, lambda t: (0, 0)),      # fc w^T (resident)
                pl.BlockSpec(fcbt.shape, lambda t: (0, 0)),      # fc b   (resident)
            ],
            out_specs=pl.BlockSpec((None, MC, imgs_per_tile), lambda t: (t, 0, 0)),
        ),
        compiler_params=pltpu.CompilerParams(
            dimension_semantics=("parallel",),                   # independent tiles
            vmem_limit_bytes=48 * 1024 * 1024),
    )(patches, pool, cw, cb, fcwt, fcbt)

    # Tiny traced epilogue (no host round trip): all-models logits -> routing.
    logits_all = jnp.transpose(out, (0, 2, 1)).reshape(n, N_MODELS, C_PAD)
    logits_all = logits_all[:, :, :N_CLASSES]                    # (N, 11, 10)
    naive = logits_all[:, NAIVE_IDX, :]                          # (N, 10)
    # torch.argmax(naive_output) is a FLAT index (image*10 + class), first max.
    flat = jnp.argmax(naive.reshape(-1)).astype(jnp.int32)
    sel = jnp.where(flat < N_EXPERTS, flat, jnp.int32(UNTARGETED_IDX))
    expert_output = jnp.take(logits_all, sel, axis=1)            # (N, 10)
    return expert_output


if __name__ == "__main__":
    key = jax.random.PRNGKey(0)
    kx, kparams = jax.random.split(key)
    # Small CIFAR-like shapes: batch=2, channels=3, spatial 16x16, NCHW input.
    x = jax.random.normal(kx, (2, 3, 16, 16), jnp.float32)
    params = make_network_params(kparams, c_in=3, c_mid=16)
    out = network_forward(x, params)
    out = jax.block_until_ready(out)
    assert out.shape == (2, N_CLASSES) and out.dtype == jnp.float32
    assert bool(jnp.all(jnp.isfinite(out)))
    print("KERNEL_OK")
</pallas_src>

<mosaic_0001>
module attributes {stable_mosaic.version = 11 : i64} {
  func.func @_network_kernel(%arg0: i32, %arg1: memref<32x512xbf16, #tpu.memory_space<vmem>>, %arg2: memref<512x2xf32, #tpu.memory_space<vmem>>, %arg3: memref<176x32xbf16, #tpu.memory_space<vmem>>, %arg4: memref<176x1xf32, #tpu.memory_space<vmem>>, %arg5: memref<1408x176xf32, #tpu.memory_space<vmem>>, %arg6: memref<1408x1xf32, #tpu.memory_space<vmem>>, %arg7: memref<1x1408x2xf32, #tpu.memory_space<vmem>>) attributes {dimension_semantics = [#tpu.dimension_semantics<parallel>], iteration_bounds = array<i64: 1>, scalar_prefetch = 0 : i64, scratch_operands = 0 : i64, tpu.core_type = #tpu.core_type<tc>, window_params = [{transform_indices = @transform_0, window_bounds = array<i64: 32, 512>}, {pipeline_mode = #tpu.pipeline_mode<synchronous>, transform_indices = @transform_1, window_bounds = array<i64: 512, 2>}, {pipeline_mode = #tpu.pipeline_mode<synchronous>, transform_indices = @transform_2, window_bounds = array<i64: 176, 32>}, {pipeline_mode = #tpu.pipeline_mode<synchronous>, transform_indices = @transform_3, window_bounds = array<i64: 176, 1>}, {pipeline_mode = #tpu.pipeline_mode<synchronous>, transform_indices = @transform_4, window_bounds = array<i64: 1408, 176>}, {pipeline_mode = #tpu.pipeline_mode<synchronous>, transform_indices = @transform_5, window_bounds = array<i64: 1408, 1>}, {transform_indices = @transform_6, window_bounds = array<i64: 1, 1408, 2>}]} {
    %c0 = arith.constant 0 : index
    %c0_0 = arith.constant 0 : index
    %0 = vector.load %arg3[%c0, %c0_0] : memref<176x32xbf16, #tpu.memory_space<vmem>>, vector<176x32xbf16>
    %c0_1 = arith.constant 0 : index
    %c0_2 = arith.constant 0 : index
    %1 = vector.load %arg1[%c0_1, %c0_2] : memref<32x512xbf16, #tpu.memory_space<vmem>>, vector<32x512xbf16>
    %cst = arith.constant dense<0.000000e+00> : vector<176x512xf32>
    %2 = tpu.matmul %0, %1, %cst {dimension_numbers = #tpu.dot_dimension_numbers<[1], [0], [0], [1], [0, 0, 1, 1], [], []>} : vector<176x32xbf16>, vector<32x512xbf16>, vector<176x512xf32> -> vector<176x512xf32>
    %c0_3 = arith.constant 0 : index
    %c0_4 = arith.constant 0 : index
    %3 = vector.load %arg4[%c0_3, %c0_4] : memref<176x1xf32, #tpu.memory_space<vmem>>, vector<176x1xf32>
    %4 = vector.broadcast %3 : vector<176x1xf32> to vector<176x512xf32>
    %5 = arith.addf %2, %4 : vector<176x512xf32>
    %cst_5 = arith.constant 0.000000e+00 : f32
    %6 = vector.broadcast %cst_5 : f32 to vector<176x512xf32>
    %7 = arith.maximumf %5, %6 : vector<176x512xf32>
    %c0_6 = arith.constant 0 : index
    %c0_7 = arith.constant 0 : index
    %8 = vector.load %arg2[%c0_6, %c0_7] : memref<512x2xf32, #tpu.memory_space<vmem>>, vector<512x2xf32>
    %cst_8 = arith.constant dense<0.000000e+00> : vector<176x2xf32>
    %9 = tpu.matmul %7, %8, %cst_8 {dimension_numbers = #tpu.dot_dimension_numbers<[1], [0], [0], [1], [0, 0, 1, 1], [], []>} : vector<176x512xf32>, vector<512x2xf32>, vector<176x2xf32> -> vector<176x2xf32>
    %c0_9 = arith.constant 0 : index
    %c0_10 = arith.constant 0 : index
    %10 = vector.load %arg5[%c0_9, %c0_10] : memref<1408x176xf32, #tpu.memory_space<vmem>>, vector<1408x176xf32>
    %cst_11 = arith.constant dense<0.000000e+00> : vector<1408x2xf32>
    %11 = tpu.matmul %10, %9, %cst_11 {dimension_numbers = #tpu.dot_dimension_numbers<[1], [0], [0], [1], [0, 0, 1, 1], [], []>} : vector<1408x176xf32>, vector<176x2xf32>, vector<1408x2xf32> -> vector<1408x2xf32>
    %c0_12 = arith.constant 0 : index
    %c0_13 = arith.constant 0 : index
    %12 = vector.load %arg6[%c0_12, %c0_13] : memref<1408x1xf32, #tpu.memory_space<vmem>>, vector<1408x1xf32>
    %13 = vector.broadcast %12 : vector<1408x1xf32> to vector<1408x2xf32>
    %14 = arith.addf %11, %13 : vector<1408x2xf32>
    %c0_14 = arith.constant 0 : index
    %c0_15 = arith.constant 0 : index
    %c0_16 = arith.constant 0 : index
    %15 = vector.load %arg7[%c0_14, %c0_15, %c0_16] : memref<1x1408x2xf32, #tpu.memory_space<vmem>>, vector<1x1408x2xf32>
    %16 = vector.shape_cast %15 : vector<1x1408x2xf32> to vector<1408x2xf32>
    %17 = vector.shape_cast %14 : vector<1408x2xf32> to vector<1x1408x2xf32>
    tpu.vector_store %arg7[%c0_14, %c0_15, %c0_16], %17 {strides = array<i32>} : memref<1x1408x2xf32, #tpu.memory_space<vmem>>, vector<1x1408x2xf32>,
    return
  }
  func.func @transform_0(%arg0: i32) -> (i32, i32) {
    %c0_i32 = arith.constant 0 : i32
    %c0_i32_0 = arith.constant 0 : i32
    return %c0_i32, %arg0 : i32, i32
  }
  func.func @transform_1(%arg0: i32) -> (i32, i32) {
    %c0_i32 = arith.constant 0 : i32
    %c0_i32_0 = arith.constant 0 : i32
    %c0_i32_1 = arith.constant 0 : i32
    return %c0_i32, %c0_i32_0 : i32, i32
  }
  func.func @transform_2(%arg0: i32) -> (i32, i32) {
    %c0_i32 = arith.constant 0 : i32
    %c0_i32_0 = arith.constant 0 : i32
    %c0_i32_1 = arith.constant 0 : i32
    return %c0_i32, %c0_i32_0 : i32, i32
  }
  func.func @transform_3(%arg0: i32) -> (i32, i32) {
    %c0_i32 = arith.constant 0 : i32
    %c0_i32_0 = arith.constant 0 : i32
    %c0_i32_1 = arith.constant 0 : i32
    return %c0_i32, %c0_i32_0 : i32, i32
  }
  func.func @transform_4(%arg0: i32) -> (i32, i32) {
    %c0_i32 = arith.constant 0 : i32
    %c0_i32_0 = arith.constant 0 : i32
    %c0_i32_1 = arith.constant 0 : i32
    return %c0_i32, %c0_i32_0 : i32, i32
  }
  func.func @transform_5(%arg0: i32) -> (i32, i32) {
    %c0_i32 = arith.constant 0 : i32
    %c0_i32_0 = arith.constant 0 : i32
    %c0_i32_1 = arith.constant 0 : i32
    return %c0_i32, %c0_i32_0 : i32, i32
  }
  func.func @transform_6(%arg0: i32) -> (i32, i32, i32) {
    %c0_i32 = arith.constant 0 : i32
    %c0_i32_0 = arith.constant 0 : i32
    %c0_i32_1 = arith.constant 0 : i32
    return %arg0, %c0_i32, %c0_i32_0 : i32, i32, i32
  }
}

</mosaic_0001>

<bundles_post_ra>
// kernel: squeeze.1
= control target key start
LH: loop header
LB: loop body
LE: loop exit
PB: predicated region body
PF: predicated region fallthrough
CT: control target
= control target key end

     0   :  { %vm7_vm0 = vcmask 80896   ;;  %vm13_vm1 = vcmask 162896   ;;  %s39_s0 = inlined_call_operand.vmem [shape: f32[2,1,10], index: 0, kind: input, shape index: {}]   ;;  %s40_s1 = inlined_call_operand.vmem [shape: f32[20], index: 1, kind: output, shape index: {}]  }
   0x1   :  { %v4_v0 = vld [vmem:[%s39_s0] sm:$0x3]  ;;  %s22_s0 = smov 10  }
   0x2   :  { %5 = vst [vmem:[#allocation1] sm:$0x3] %v4_v0 }
   0x9   :  { %v10_v1 = vld [vmem:[#allocation1 + $0x1] sm:$0x1]   ;;  %v6_v2 = vld [vmem:[#allocation1] sm:$0x1]  }
   0xa   :  { %11 = vrot.lane.b32.xlu0 %v10_v1, %s22_s0  ;;  %8 = vst.msk [vmem:[#allocation0] sm:$0x1] %vm7_vm0, %v6_v2  }
  0x7c   :  { %v12_v3 = vpop.permute.xlu0 %11  }
  0x7d   :  { %14 = vst.msk [vmem:[#allocation0] sm:$0x1] %vm13_vm1, %v12_v3  }
  0x84   :  { %v17_v4 = vld [vmem:[#allocation0] sm:$0x1] }
  0x85   :  { %20 = vst [vmem:[%s40_s1] sm:$0x1] %v17_v4 }

// kernel: network_forward.1
= control target key start
LH: loop header
LB: loop body
LE: loop exit
PB: predicated region body
PF: predicated region fallthrough
CT: control target
= control target key end

     0   :  { %v4604_v0 = vmov 0   ;;  %vm281_vm0 = vcmask 261120   ;;  %vm2463_vm1 = vcmask 392192   ;;  %vm4082_vm2 = vcmask 15360   ;;  %s8414_s3 = inlined_call_operand.vmem [shape: f32[176,1], index: 3, kind: input, shape index: {}]   ;;  %s8415_s0 = inlined_call_operand.vmem [shape: bf16[32,512], index: 0, kind: input, shape index: {}]   ;;  %s8416_s2 = inlined_call_operand.vmem [shape: bf16[176,32], index: 2, kind: input, shape index: {}]   ;;  %s8417_s5 = inlined_call_operand.vmem [shape: f32[1408,1], index: 5, kind: input, shape index: {}]   ;;  %s8418_s1 = inlined_call_operand.vmem [shape: f32[512,2], index: 1, kind: input, shape index: {}]   ;;  %s8419_s4 = inlined_call_operand.vmem [shape: f32[1408,176], index: 4, kind: input, shape index: {}]   ;;  %s8420_s6 = inlined_call_operand.vmem [shape: f32[1,1408,2], index: 6, kind: output, shape index: {}]  }
   0x1   :  { %4603 = vset.pattern.permute.xlu2 %v4604_v0  ;;  %4602 = vset.pattern.permute.xlu1 %v4604_v0  ;;  %v58_v1 = vld [vmem:[%s8414_s3 + $0x20] sm:$0xff]  ;;  %v56_v2 = vld [vmem:[%s8414_s3 + $0x10] sm:$0xff]  ;;  %v4333_v9 = vld [vmem:[%s8415_s0 + $0x28] sm:$0xf] }
   0x2   :  { %v54_v3 = vld [vmem:[%s8414_s3] sm:$0xff]  ;;  %4601 = vset.pattern.permute.xlu0 %v4604_v0  ;;  %98 = vperm.xlu2 %4603, %v58_v1   ;;  %v4576_v5 = vld [vmem:[%s8415_s0 + $0x2c] sm:$0xf0]  ;;  %v4327_v8 = vld [vmem:[%s8415_s0 + $0x30] sm:$0xf0] }
   0x3   :  { %v4325_v4 = vld [vmem:[%s8415_s0 + $0x20] sm:$0xf]  ;;  %v4574_v6 = vld [vmem:[%s8415_s0 + $0x24] sm:$0xf]  ;;  %88 = vperm.xlu1 %4602, %v56_v2   ;;  %78 = vperm.xlu0 %4601, %v54_v3   ;;  %v4577_v10 = vld [vmem:[%s8415_s0 + $0x34] sm:$0xf0] }
   0x4   :  { %v4326_v7 = vor.u32 %v4576_v5, %v4325_v4  ;;  %v4330_v11 = vor.u32 %v4574_v6, %v4327_v8  ;;  %v4334_v12 = vor.u32 %v4577_v10, %v4333_v9  ;;  %v4575_v13 = vld [vmem:[%s8415_s0 + $0x2c] sm:$0xf]  ;;  %v4335_v14 = vld [vmem:[%s8415_s0 + $0x38] sm:$0xf0]  ;;  %v4309_v15 = vld [vmem:[%s8415_s0] sm:$0xf] }
   0x5   :  { %v4338_v16 = vor.u32 %v4575_v13, %v4335_v14  ;;  %v4572_v17 = vld [vmem:[%s8415_s0 + $0xc] sm:$0xf0]  ;;  %v4570_v18 = vld [vmem:[%s8415_s0 + $0x4] sm:$0xf]  ;;  %v4311_v19 = vld [vmem:[%s8415_s0 + $0x10] sm:$0xf0] }
   0x6   :  { %321 = vmatpush.bf16.msra.mxu0 %v4326_v7  ;;  %385 = vmatpush.bf16.msra.mxu1 %v4330_v11  ;;  %v4310_v20 = vor.u32 %v4572_v17, %v4309_v15  ;;  %v4314_v21 = vor.u32 %v4570_v18, %v4311_v19  ;;  %v4317_v22 = vld [vmem:[%s8415_s0 + $0x8] sm:$0xf]  ;;  %v4573_v23 = vld [vmem:[%s8415_s0 + $0x14] sm:$0xf0]  ;;  %v4571_v24 = vld [vmem:[%s8415_s0 + $0xc] sm:$0xf] }
   0x7   :  { %449 = vmatpush.bf16.msra.mxu2 %v4334_v12  ;;  %513 = vmatpush.bf16.msra.mxu3 %v4338_v16  ;;  %v4318_v25 = vor.u32 %v4573_v23, %v4317_v22  ;;  %v4319_v26 = vld [vmem:[%s8415_s0 + $0x18] sm:$0xf0]  ;;  %v59_v28 = vld [vmem:[%s8414_s3 + $0x28] sm:$0xff]  ;;  %v4559_v31 = vld [vmem:[%s8416_s2] sm:$0xff] }
   0x8   :  { %v4322_v27 = vor.u32 %v4571_v24, %v4319_v26  ;;  %v57_v29 = vld [vmem:[%s8414_s3 + $0x18] sm:$0xff]  ;;  %v55_v30 = vld [vmem:[%s8414_s3 + $0x8] sm:$0xff]  ;;  %v62_v32 = vld [vmem:[%s8414_s3 + $0x40] sm:$0xff] }
   0x9   :  { %v61_v33 = vld [vmem:[%s8414_s3 + $0x38] sm:$0xff]  ;;  %v60_v34 = vld [vmem:[%s8414_s3 + $0x30] sm:$0xff]  ;;  %v63_v37 = vld [vmem:[%s8414_s3 + $0x48] sm:$0xff] }
   0xa   :  { %322 = vmatpush.bf16.msra.mxu0 %v4310_v20  ;;  %386 = vmatpush.bf16.msra.mxu1 %v4314_v21  ;;  %v65_v35 = vld [vmem:[%s8414_s3 + $0x58] sm:$0xff]  ;;  %v64_v36 = vld [vmem:[%s8414_s3 + $0x50] sm:$0xff]  ;;  %v4560_v38 = vld [vmem:[%s8416_s2 + $0x8] sm:$0xff] }
   0xb   :  { %450 = vmatpush.bf16.msra.mxu2 %v4318_v25  ;;  %514 = vmatpush.bf16.msra.mxu3 %v4322_v27  ;;  %v68_v39 = vld [vmem:[%s8414_s3 + $0x70] sm:$0xff]  ;;  %v67_v40 = vld [vmem:[%s8414_s3 + $0x68] sm:$0xff]  ;;  %v66_v41 = vld [vmem:[%s8414_s3 + $0x60] sm:$0xff] }
   0xc   :  { %103 = vperm.xlu2 %4603, %v59_v28   ;;  %93 = vperm.xlu1 %4602, %v57_v29   ;;  %v71_v42 = vld [vmem:[%s8414_s3 + $0x88] sm:$0xff]  ;;  %v70_v43 = vld [vmem:[%s8414_s3 + $0x80] sm:$0xff]  ;;  %v69_v44 = vld [vmem:[%s8414_s3 + $0x78] sm:$0xff] }
   0xd   :  { %83 = vperm.xlu0 %4601, %v55_v30   ;;  %4339 = vmatmul.msk.bf16.vlgmr.msra.gmra.mxu0 %vm281_vm0, %v4559_v31  ;;  %v4561_v45 = vld [vmem:[%s8416_s2 + $0x10] sm:$0xff]  ;;  %v74_v46 = vld [vmem:[%s8414_s3 + $0xa0] sm:$0xff]  ;;  %v73_v47 = vld [vmem:[%s8414_s3 + $0x98] sm:$0xff] }
   0xe   :  { %4350 = vmatmul.msk.bf16.vlgmr.msra.gmra.mxu1 %vm281_vm0, %v4559_v31  ;;  %4361 = vmatmul.msk.bf16.vlgmr.msra.gmra.mxu2 %vm281_vm0, %v4559_v31  ;;  %v72_v48 = vld [vmem:[%s8414_s3 + $0x90] sm:$0xff]  ;;  %v1408_v49 = vld [vmem:[%s8417_s5 + $0x8] sm:$0xff]  ;;  %v1407_v50 = vld [vmem:[%s8417_s5] sm:$0xff] }
   0xf   :  { %4372 = vmatmul.msk.bf16.vlgmr.msra.gmra.mxu3 %vm281_vm0, %v4559_v31  ;;  %v75_v51 = vld [vmem:[%s8414_s3 + $0xa8] sm:$0xff]  ;;  %v4562_v52 = vld [vmem:[%s8416_s2 + $0x18] sm:$0xff]  ;;  %v1411_v53 = vld [vmem:[%s8417_s5 + $0x20] sm:$0xff] }
  0x10   :  { %v1410_v54 = vld [vmem:[%s8417_s5 + $0x18] sm:$0xff]  ;;  %v1409_v55 = vld [vmem:[%s8417_s5 + $0x10] sm:$0xff]  ;;  %v1412_v58 = vld [vmem:[%s8417_s5 + $0x28] sm:$0xff] }
  0x11   :  { %v1414_v56 = vld [vmem:[%s8417_s5 + $0x38] sm:$0xff]  ;;  %v1413_v57 = vld [vmem:[%s8417_s5 + $0x30] sm:$0xff]  ;;  %v4563_v59 = vld [vmem:[%s8416_s2 + $0x20] sm:$0xff] }
  0x12   :  { %v1417_v60 = vld [vmem:[%s8417_s5 + $0x50] sm:$0xff]  ;;  %v1416_v61 = vld [vmem:[%s8417_s5 + $0x48] sm:$0xff]  ;;  %v1415_v62 = vld [vmem:[%s8417_s5 + $0x40] sm:$0xff] }
  0x13   :  { %v1420_v63 = vld [vmem:[%s8417_s5 + $0x68] sm:$0xff]  ;;  %v1419_v0 = vld [vmem:[%s8417_s5 + $0x60] sm:$0xff]  ;;  %v1418_v1 = vld [vmem:[%s8417_s5 + $0x58] sm:$0xff] }
  0x14   :  { %118 = vperm.xlu2 %4603, %v62_v32   ;;  %113 = vperm.xlu1 %4602, %v61_v33   ;;  %v4564_v2 = vld [vmem:[%s8416_s2 + $0x28] sm:$0xff]  ;;  %v1423_v3 = vld [vmem:[%s8417_s5 + $0x80] sm:$0xff]  ;;  %v1422_v4 = vld [vmem:[%s8417_s5 + $0x78] sm:$0xff] }
  0x15   :  { %108 = vperm.xlu0 %4601, %v60_v34   ;;  %v1421_v5 = vld [vmem:[%s8417_s5 + $0x70] sm:$0xff]  ;;  %v1426_v6 = vld [vmem:[%s8417_s5 + $0x98] sm:$0xff]  ;;  %v1424_v8 = vld [vmem:[%s8417_s5 + $0x88] sm:$0xff] }
  0x16   :  { %v1425_v7 = vld [vmem:[%s8417_s5 + $0x90] sm:$0xff]  ;;  %v1428_v11 = vld [vmem:[%s8417_s5 + $0xa8] sm:$0xff]  ;;  %v1427_v12 = vld [vmem:[%s8417_s5 + $0xa0] sm:$0xff] }
  0x17   :  { %v4565_v9 = vld [vmem:[%s8416_s2 + $0x30] sm:$0xff]  ;;  %v1432_v13 = vld [vmem:[%s8417_s5 + $0xc8] sm:$0xff]  ;;  %v1431_v14 = vld [vmem:[%s8417_s5 + $0xc0] sm:$0xff] }
  0x18   :  { %v1429_v10 = vld [vmem:[%s8417_s5 + $0xb0] sm:$0xff]  ;;  %v1430_v15 = vld [vmem:[%s8417_s5 + $0xb8] sm:$0xff]  ;;  %v1435_v20 = vld [vmem:[%s8417_s5 + $0xe0] sm:$0xff] }
  0x19   :  { %v4566_v16 = vld [vmem:[%s8416_s2 + $0x38] sm:$0xff]  ;;  %v673_v22 = vld [vmem:[%s8418_s1 + $0x70] sm:$0xff]  ;;  %v672_v28 = vld [vmem:[%s8418_s1 + $0x68] sm:$0xff] }
  0x1a   :  { %v674_v17 = vld [vmem:[%s8418_s1 + $0x78] sm:$0xff]  ;;  %v689_v23 = vld [vmem:[%s8418_s1 + $0xf0] sm:$0xff]  ;;  %v688_v29 = vld [vmem:[%s8418_s1 + $0xe8] sm:$0xff] }
  0x1b   :  { %v690_v18 = vld [vmem:[%s8418_s1 + $0xf8] sm:$0xff]  ;;  %723 = vmatpush.msrb.mxu0 %v674_v17  ;;  %v705_v24 = vld [vmem:[%s8418_s1 + $0x170] sm:$0xff]  ;;  %v704_v30 = vld [vmem:[%s8418_s1 + $0x168] sm:$0xff] }
  0x1c   :  { %133 = vperm.xlu2 %4603, %v65_v35   ;;  %128 = vperm.xlu1 %4602, %v64_v36   ;;  %v706_v19 = vld [vmem:[%s8418_s1 + $0x178] sm:$0xff]  ;;  %v1433_v26 = vld [vmem:[%s8417_s5 + $0xd0] sm:$0xff]  ;;  %v720_v31 = vld [vmem:[%s8418_s1 + $0x1e8] sm:$0xff] }
  0x1d   :  { %123 = vperm.xlu0 %4601, %v63_v37   ;;  %4340 = vmatmul.msk.bf16.gmra.mxu0 %vm281_vm0, %v4560_v38  ;;  %v722_v21 = vld [vmem:[%s8418_s1 + $0x1f8] sm:$0xff]  ;;  %v721_v27 = vld [vmem:[%s8418_s1 + $0x1f0] sm:$0xff]  ;;  %v671_v32 = vld [vmem:[%s8418_s1 + $0x60] sm:$0xff] }
  0x1e   :  { %4351 = vmatmul.msk.bf16.gmra.mxu1 %vm281_vm0, %v4560_v38  ;;  %4362 = vmatmul.msk.bf16.gmra.mxu2 %vm281_vm0, %v4560_v38  ;;  %v1434_v25 = vld [vmem:[%s8417_s5 + $0xd8] sm:$0xff]  ;;  %v687_v33 = vld [vmem:[%s8418_s1 + $0xe0] sm:$0xff] }
  0x1f   :  { %4373 = vmatmul.msk.bf16.gmra.mxu3 %vm281_vm0, %v4560_v38  ;;  %806 = vmatpush.msrb.mxu1 %v690_v18  ;;  %v703_v34 = vld [vmem:[%s8418_s1 + $0x160] sm:$0xff]  ;;  %v670_v36 = vld [vmem:[%s8418_s1 + $0x58] sm:$0xff]  ;;  %v4568_v18 = vld [vmem:[%s8416_s2 + $0x48] sm:$0xff] }
  0x20   :  { %889 = vmatpush.msrb.mxu2 %v706_v19  ;;  %972 = vmatpush.msrb.mxu3 %v722_v21  ;;  %v719_v35 = vld [vmem:[%s8418_s1 + $0x1e0] sm:$0xff]  ;;  %v686_v37 = vld [vmem:[%s8418_s1 + $0xd8] sm:$0xff] }
  0x21   :  { %724 = vmatpush.msrb.mxu0 %v673_v22  ;;  %807 = vmatpush.msrb.mxu1 %v689_v23  ;;  %v702_v38 = vld [vmem:[%s8418_s1 + $0x158] sm:$0xff]  ;;  %v663_v21 = vld [vmem:[%s8418_s1 + $0x20] sm:$0xff] }
  0x22   :  { %890 = vmatpush.msrb.mxu2 %v705_v24  ;;  %973 = vmatpush.msrb.mxu3 %v721_v27  ;;  %v1442_v17 = vld [vmem:[%s8417_s5 + $0x118] sm:$0xff]  ;;  %v679_v22 = vld [vmem:[%s8418_s1 + $0xa0] sm:$0xff] }
  0x23   :  { %725 = vmatpush.msrb.mxu0 %v672_v28  ;;  %808 = vmatpush.msrb.mxu1 %v688_v29  ;;  %v695_v23 = vld [vmem:[%s8418_s1 + $0x120] sm:$0xff]  ;;  %v694_v27 = vld [vmem:[%s8418_s1 + $0x118] sm:$0xff] }
  0x24   :  { %148 = vperm.xlu2 %4603, %v68_v39   ;;  %143 = vperm.xlu1 %4602, %v67_v40   ;;  %v718_v39 = vld [vmem:[%s8418_s1 + $0x1d8] sm:$0xff]  ;;  %v711_v24 = vld [vmem:[%s8418_s1 + $0x1a0] sm:$0xff] }
  0x25   :  { %138 = vperm.xlu0 %4601, %v66_v41   ;;  %891 = vmatpush.msrb.mxu2 %v704_v30  ;;  %v1438_v40 = vld [vmem:[%s8417_s5 + $0xf8] sm:$0xff]  ;;  %v669_v41 = vld [vmem:[%s8418_s1 + $0x50] sm:$0xff]  ;;  %v1447_v29 = vld [vmem:[%s8417_s5 + $0x140] sm:$0xff] }
  0x26   :  { %974 = vmatpush.msrb.mxu3 %v720_v31  ;;  %726 = vmatpush.msrb.mxu0 %v671_v32  ;;  %v710_v28 = vld [vmem:[%s8418_s1 + $0x198] sm:$0xff]  ;;  %v661_v30 = vld [vmem:[%s8418_s1 + $0x10] sm:$0xff] }
  0x27   :  { %809 = vmatpush.msrb.mxu1 %v687_v33  ;;  %892 = vmatpush.msrb.mxu2 %v703_v34  ;;  %v1446_v33 = vld [vmem:[%s8417_s5 + $0x138] sm:$0xff]  ;;  %v1445_v34 = vld [vmem:[%s8417_s5 + $0x130] sm:$0xff] }
  0x28   :  { %975 = vmatpush.msrb.mxu3 %v719_v35  ;;  %727 = vmatpush.msrb.mxu0 %v670_v36 }
  0x29   :  { %810 = vmatpush.msrb.mxu1 %v686_v37  ;;  %893 = vmatpush.msrb.mxu2 %v702_v38  ;;  %v677_v37 = vld [vmem:[%s8418_s1 + $0x90] sm:$0xff] }
  0x2a   :  { %976 = vmatpush.msrb.mxu3 %v718_v39  ;;  %728 = vmatpush.msrb.mxu0 %v669_v41  ;;  %v693_v38 = vld [vmem:[%s8418_s1 + $0x110] sm:$0xff]  ;;  %v676_v41 = vld [vmem:[%s8418_s1 + $0x88] sm:$0xff] }
  0x2b   :  { %v709_v39 = vld [vmem:[%s8418_s1 + $0x190] sm:$0xff] }
  0x2c   :  { %163 = vperm.xlu2 %4603, %v71_v42   ;;  %158 = vperm.xlu1 %4602, %v70_v43   ;;  %v685_v42 = vld [vmem:[%s8418_s1 + $0xd0] sm:$0xff] }
  0x2d   :  { %153 = vperm.xlu0 %4601, %v69_v44   ;;  %4341 = vmatmul.msk.bf16.gmra.mxu0 %vm281_vm0, %v4561_v45  ;;  %v1437_v43 = vld [vmem:[%s8417_s5 + $0xf0] sm:$0xff]  ;;  %v1436_v44 = vld [vmem:[%s8417_s5 + $0xe8] sm:$0xff] }
  0x2e   :  { %4352 = vmatmul.msk.bf16.gmra.mxu1 %vm281_vm0, %v4561_v45  ;;  %4363 = vmatmul.msk.bf16.gmra.mxu2 %vm281_vm0, %v4561_v45 }
  0x2f   :  { %4374 = vmatmul.msk.bf16.gmra.mxu3 %vm281_vm0, %v4561_v45  ;;  %v4567_v45 = vld [vmem:[%s8416_s2 + $0x40] sm:$0xff]  ;;  %811 = vmatpush.msrb.mxu1 %v685_v42  ;;  %v692_v42 = vld [vmem:[%s8418_s1 + $0x108] sm:$0xff] }
  0x34   :  { %178 = vperm.xlu2 %4603, %v74_v46   ;;  %173 = vperm.xlu1 %4602, %v73_v47  }
  0x35   :  { %168 = vperm.xlu0 %4601, %v72_v48   ;;  %v701_v48 = vld [vmem:[%s8418_s1 + $0x150] sm:$0xff] }
  0x36   :  { %894 = vmatpush.msrb.mxu2 %v701_v48  ;;  %v691_v48 = vld [vmem:[%s8418_s1 + $0x100] sm:$0xff] }
  0x3c   :  { %1590 = vperm.xlu2 %4603, %v1408_v49   ;;  %1585 = vperm.xlu1 %4602, %v1407_v50   ;;  %v717_v49 = vld [vmem:[%s8418_s1 + $0x1d0] sm:$0xff]  ;;  %v668_v50 = vld [vmem:[%s8418_s1 + $0x48] sm:$0xff] }
  0x3d   :  { %183 = vperm.xlu0 %4601, %v75_v51   ;;  %4342 = vmatmul.msk.bf16.gmra.mxu0 %vm281_vm0, %v4562_v52  ;;  %v684_v51 = vld [vmem:[%s8418_s1 + $0xc8] sm:$0xff] }
  0x3e   :  { %4353 = vmatmul.msk.bf16.gmra.mxu1 %vm281_vm0, %v4562_v52  ;;  %4364 = vmatmul.msk.bf16.gmra.mxu2 %vm281_vm0, %v4562_v52 }
  0x3f   :  { %4375 = vmatmul.msk.bf16.gmra.mxu3 %vm281_vm0, %v4562_v52  ;;  %v700_v52 = vld [vmem:[%s8418_s1 + $0x148] sm:$0xff]  ;;  %729 = vmatpush.msrb.mxu0 %v668_v50  ;;  %v1450_v50 = vld [vmem:[%s8417_s5 + $0x158] sm:$0xff] }
  0x40   :  { %977 = vmatpush.msrb.mxu3 %v717_v49  ;;  %812 = vmatpush.msrb.mxu1 %v684_v51  ;;  %v707_v49 = vld [vmem:[%s8418_s1 + $0x180] sm:$0xff] }
  0x41   :  { %895 = vmatpush.msrb.mxu2 %v700_v52 }
  0x44   :  { %1605 = vperm.xlu2 %4603, %v1411_v53   ;;  %1600 = vperm.xlu1 %4602, %v1410_v54   ;;  %v716_v53 = vld [vmem:[%s8418_s1 + $0x1c8] sm:$0xff]  ;;  %v667_v54 = vld [vmem:[%s8418_s1 + $0x40] sm:$0xff] }
  0x45   :  { %1595 = vperm.xlu0 %4601, %v1409_v55   ;;  %v683_v55 = vld [vmem:[%s8418_s1 + $0xc0] sm:$0xff]  ;;  %978 = vmatpush.msrb.mxu3 %v716_v53  ;;  %v1449_v53 = vld [vmem:[%s8417_s5 + $0x150] sm:$0xff] }
  0x46   :  { %730 = vmatpush.msrb.mxu0 %v667_v54  ;;  %813 = vmatpush.msrb.mxu1 %v683_v55  ;;  %v1448_v54 = vld [vmem:[%s8417_s5 + $0x148] sm:$0xff]  ;;  %v4569_v55 = vld [vmem:[%s8416_s2 + $0x50] sm:$0xff] }
  0x4c   :  { %1620 = vperm.xlu2 %4603, %v1414_v56   ;;  %1615 = vperm.xlu1 %4602, %v1413_v57   ;;  %v1441_v56 = vld [vmem:[%s8417_s5 + $0x110] sm:$0xff]  ;;  %v699_v57 = vld [vmem:[%s8418_s1 + $0x140] sm:$0xff] }
  0x4d   :  { %1610 = vperm.xlu0 %4601, %v1412_v58   ;;  %4343 = vmatmul.msk.bf16.gmra.mxu0 %vm281_vm0, %v4563_v59 }
  0x4e   :  { %4354 = vmatmul.msk.bf16.gmra.mxu1 %vm281_vm0, %v4563_v59  ;;  %4365 = vmatmul.msk.bf16.gmra.mxu2 %vm281_vm0, %v4563_v59 }
  0x4f   :  { %4376 = vmatmul.msk.bf16.gmra.mxu3 %vm281_vm0, %v4563_v59  ;;  %896 = vmatpush.msrb.mxu2 %v699_v57 }
  0x54   :  { %1635 = vperm.xlu2 %4603, %v1417_v60   ;;  %1630 = vperm.xlu1 %4602, %v1416_v61   ;;  %v1440_v60 = vld [vmem:[%s8417_s5 + $0x108] sm:$0xff]  ;;  %v1439_v61 = vld [vmem:[%s8417_s5 + $0x100] sm:$0xff] }
  0x55   :  { %1625 = vperm.xlu0 %4601, %v1415_v62  }
  0x5c   :  { %1650 = vperm.xlu2 %4603, %v1420_v63   ;;  %1645 = vperm.xlu1 %4602, %v1419_v0   ;;  %v715_v0 = vld [vmem:[%s8418_s1 + $0x1c0] sm:$0xff] }
  0x5d   :  { %1640 = vperm.xlu0 %4601, %v1418_v1   ;;  %4344 = vmatmul.msk.bf16.gmra.mxu0 %vm281_vm0, %v4564_v2  ;;  %v666_v1 = vld [vmem:[%s8418_s1 + $0x38] sm:$0xff] }
  0x5e   :  { %4355 = vmatmul.msk.bf16.gmra.mxu1 %vm281_vm0, %v4564_v2  ;;  %4366 = vmatmul.msk.bf16.gmra.mxu2 %vm281_vm0, %v4564_v2 }
  0x5f   :  { %4377 = vmatmul.msk.bf16.gmra.mxu3 %vm281_vm0, %v4564_v2  ;;  %v682_v2 = vld [vmem:[%s8418_s1 + $0xb8] sm:$0xff]  ;;  %731 = vmatpush.msrb.mxu0 %v666_v1  ;;  %v1452_v1 = vld [vmem:[%s8417_s5 + $0x168] sm:$0xff] }
  0x60   :  { %979 = vmatpush.msrb.mxu3 %v715_v0  ;;  %814 = vmatpush.msrb.mxu1 %v682_v2  ;;  %v1451_v2 = vld [vmem:[%s8417_s5 + $0x160] sm:$0xff] }
  0x64   :  { %1665 = vperm.xlu2 %4603, %v1423_v3   ;;  %1660 = vperm.xlu1 %4602, %v1422_v4   ;;  %v698_v3 = vld [vmem:[%s8418_s1 + $0x138] sm:$0xff] }
  0x65   :  { %1655 = vperm.xlu0 %4601, %v1421_v5   ;;  %v714_v4 = vld [vmem:[%s8418_s1 + $0x1b8] sm:$0xff]  ;;  %v665_v5 = vld [vmem:[%s8418_s1 + $0x30] sm:$0xff]  ;;  %897 = vmatpush.msrb.mxu2 %v698_v3 }
  0x66   :  { %980 = vmatpush.msrb.mxu3 %v714_v4  ;;  %732 = vmatpush.msrb.mxu0 %v665_v5 }
  0x6c   :  { %1680 = vperm.xlu2 %4603, %v1426_v6   ;;  %1675 = vperm.xlu1 %4602, %v1425_v7   ;;  %v681_v6 = vld [vmem:[%s8418_s1 + $0xb0] sm:$0xff] }
  0x6d   :  { %1670 = vperm.xlu0 %4601, %v1424_v8   ;;  %4345 = vmatmul.msk.bf16.gmra.mxu0 %vm281_vm0, %v4565_v9  ;;  %v697_v7 = vld [vmem:[%s8418_s1 + $0x130] sm:$0xff] }
  0x6e   :  { %4356 = vmatmul.msk.bf16.gmra.mxu1 %vm281_vm0, %v4565_v9  ;;  %4367 = vmatmul.msk.bf16.gmra.mxu2 %vm281_vm0, %v4565_v9  ;;  %v713_v8 = vld [vmem:[%s8418_s1 + $0x1b0] sm:$0xff] }
  0x6f   :  { %4378 = vmatmul.msk.bf16.gmra.mxu3 %vm281_vm0, %v4565_v9  ;;  %v664_v9 = vld [vmem:[%s8418_s1 + $0x28] sm:$0xff]  ;;  %815 = vmatpush.msrb.mxu1 %v681_v6 }
  0x70   :  { %898 = vmatpush.msrb.mxu2 %v697_v7  ;;  %981 = vmatpush.msrb.mxu3 %v713_v8 }
  0x71   :  { %733 = vmatpush.msrb.mxu0 %v664_v9 }
  0x73   :  { %734 = vmatpush.msrb.mxu0 %v663_v21 }
  0x74   :  { %1695 = vperm.xlu2 %4603, %v1429_v10   ;;  %1690 = vperm.xlu1 %4602, %v1428_v11   ;;  %v680_v10 = vld [vmem:[%s8418_s1 + $0xa8] sm:$0xff] }
  0x75   :  { %1685 = vperm.xlu0 %4601, %v1427_v12   ;;  %v696_v11 = vld [vmem:[%s8418_s1 + $0x128] sm:$0xff]  ;;  %816 = vmatpush.msrb.mxu1 %v680_v10  ;;  %v79_v5 = vpop.permute.xlu0 %78 }
  0x76   :  { %v1444_v12 = vld [vmem:[%s8417_s5 + $0x128] sm:$0xff]  ;;  %899 = vmatpush.msrb.mxu2 %v696_v11 }
  0x77   :  { %817 = vmatpush.msrb.mxu1 %v679_v22  ;;  %v1456_v10 = vld [vmem:[%s8417_s5 + $0x188] sm:$0xff] }
  0x78   :  { %900 = vmatpush.msrb.mxu2 %v695_v23 }
  0x7a   :  { %901 = vmatpush.msrb.mxu2 %v694_v27 }
  0x7c   :  { %1710 = vperm.xlu2 %4603, %v1432_v13   ;;  %1705 = vperm.xlu1 %4602, %v1431_v14   ;;  %v712_v13 = vld [vmem:[%s8418_s1 + $0x1a8] sm:$0xff] }
  0x7d   :  { %1700 = vperm.xlu0 %4601, %v1430_v15   ;;  %4346 = vmatmul.msk.bf16.gmra.mxu0 %vm281_vm0, %v4566_v16 }
  0x7e   :  { %4357 = vmatmul.msk.bf16.gmra.mxu1 %vm281_vm0, %v4566_v16  ;;  %4368 = vmatmul.msk.bf16.gmra.mxu2 %vm281_vm0, %v4566_v16 }
  0x7f   :  { %4379 = vmatmul.msk.bf16.gmra.mxu3 %vm281_vm0, %v4566_v16  ;;  %v1443_v16 = vld [vmem:[%s8417_s5 + $0x120] sm:$0xff]  ;;  %902 = vmatpush.msrb.mxu2 %v693_v38  ;;  %v84_v21 = vpop.permute.xlu0 %83 }
  0x80   :  { %982 = vmatpush.msrb.mxu3 %v712_v13  ;;  %v1455_v13 = vld [vmem:[%s8417_s5 + $0x180] sm:$0xff] }
  0x81   :  { %903 = vmatpush.msrb.mxu2 %v692_v42  ;;  %v1462_v42 = vld [vmem:[%s8417_s5 + $0x1b8] sm:$0xff] }
  0x82   :  { %983 = vmatpush.msrb.mxu3 %v711_v24 }
  0x83   :  { %904 = vmatpush.msrb.mxu2 %v691_v48 }
  0x84   :  { %1725 = vperm.xlu2 %4603, %v1435_v20   ;;  %1720 = vperm.xlu1 %4602, %v1434_v25   ;;  %v662_v25 = vld [vmem:[%s8418_s1 + $0x18] sm:$0xff] }
  0x85   :  { %1715 = vperm.xlu0 %4601, %v1433_v26   ;;  %v678_v26 = vld [vmem:[%s8418_s1 + $0x98] sm:$0xff]  ;;  %735 = vmatpush.msrb.mxu0 %v662_v25 }
  0x86   :  { %818 = vmatpush.msrb.mxu1 %v678_v26  ;;  %984 = vmatpush.msrb.mxu3 %v710_v28  ;;  %v1459_v26 = vld [vmem:[%s8417_s5 + $0x1a0] sm:$0xff] }
  0x87   :  { %736 = vmatpush.msrb.mxu0 %v661_v30 }
  0x88   :  { %819 = vmatpush.msrb.mxu1 %v677_v37  ;;  %985 = vmatpush.msrb.mxu3 %v709_v39 }
  0x8a   :  { %v4975_v46 = vpop.f32.mrf.mxu0  ;;  %820 = vmatpush.msrb.mxu1 %v676_v41 }
  0x8b   :  { %v4977_v47 = vpop.f32.mrf.mxu1  ;;  %v325_v6 = vadd.f32 %v4975_v46, %v79_v5  ;;  %v1454_v46 = vld [vmem:[%s8417_s5 + $0x178] sm:$0xff] }
  0x8c   :  { %1740 = vperm.xlu2 %4603, %v1438_v40   ;;  %1735 = vperm.xlu1 %4602, %v1437_v43   ;;  %v660_v40 = vld [vmem:[%s8418_s1 + $0x8] sm:$0xff]  ;;  %v389_v7 = vadd.f32 %v4977_v47, %v79_v5 }
  0x8d   :  { %1730 = vperm.xlu0 %4601, %v1436_v44   ;;  %4347 = vmatmul.msk.bf16.gmra.mxu0 %vm281_vm0, %v4567_v45  ;;  %v708_v43 = vld [vmem:[%s8418_s1 + $0x188] sm:$0xff]  ;;  %v659_v44 = vld [vmem:[%s8418_s1] sm:$0xff] }
  0x8e   :  { %4358 = vmatmul.msk.bf16.gmra.mxu1 %vm281_vm0, %v4567_v45  ;;  %4369 = vmatmul.msk.bf16.gmra.mxu2 %vm281_vm0, %v4567_v45 }
  0x8f   :  { %4380 = vmatmul.msk.bf16.gmra.mxu3 %vm281_vm0, %v4567_v45  ;;  %737 = vmatpush.msrb.mxu0 %v660_v40  ;;  %v675_v45 = vld [vmem:[%s8418_s1 + $0x80] sm:$0xff] }
  0x90   :  { %986 = vmatpush.msrb.mxu3 %v708_v43  ;;  %821 = vmatpush.msrb.mxu1 %v675_v45  ;;  %v1461_v45 = vld [vmem:[%s8417_s5 + $0x1b0] sm:$0xff] }
  0x91   :  { %v5013_v58 = vpop.f32.mrf.mxu2  ;;  %738 = vmatpush.msrb.mxu0 %v659_v44 }
  0x92   :  { %v5015_v59 = vpop.f32.mrf.mxu3  ;;  %v5023_v62 = vpop.f32.mrf.mxu0  ;;  %987 = vmatpush.msrb.mxu3 %v707_v49  ;;  %v453_v8 = vadd.f32 %v5013_v58, %v79_v5 }
  0x93   :  { %v5025_v63 = vpop.f32.mrf.mxu1  ;;  %v517_v9 = vadd.f32 %v5015_v59, %v79_v5  ;;  %v571_v59 = vmax.f32 %v325_v6, 0.0  ;;  %v327_v22 = vadd.f32 %v5023_v62, %v84_v21  ;;  %v1457_v62 = vld [vmem:[%s8417_s5 + $0x190] sm:$0xff] }
  0x94   :  { %1755 = vperm.xlu2 %4603, %v1441_v56   ;;  %1750 = vperm.xlu1 %4602, %v1440_v60   ;;  %v1453_v60 = vld [vmem:[%s8417_s5 + $0x170] sm:$0xff]  ;;  %v391_v23 = vadd.f32 %v5025_v63, %v84_v21 }
  0x95   :  { %1745 = vperm.xlu0 %4601, %v1439_v61  }
  0x96   :  { %v576_v30 = vmax.f32 %v391_v23, 0.0  ;;  %v1467_v23 = vld [vmem:[%s8417_s5 + $0x1e0] sm:$0xff] }
  0x99   :  { %v5069_v14 = vpop.f32.mrf.mxu2 }
  0x9a   :  { %v5071_v15 = vpop.f32.mrf.mxu3  ;;  %v5082_v19 = vpop.f32.mrf.mxu0  ;;  %v455_v24 = vadd.f32 %v5069_v14, %v84_v21 }
  0x9b   :  { %v5084_v20 = vpop.f32.mrf.mxu1  ;;  %v519_v25 = vadd.f32 %v5071_v15, %v84_v21  ;;  %v575_v15 = vmax.f32 %v327_v22, 0.0 }
  0x9c   :  { %1770 = vperm.xlu2 %4603, %v1444_v12   ;;  %1765 = vperm.xlu1 %4602, %v1443_v16   ;;  %v572_v16 = vmax.f32 %v389_v7, 0.0  ;;  %v1464_v7 = vld [vmem:[%s8417_s5 + $0x1c8] sm:$0xff] }
  0x9d   :  { %1760 = vperm.xlu0 %4601, %v1442_v17   ;;  %4348 = vmatmul.msk.bf16.gmra.mxu0 %vm281_vm0, %v4568_v18  ;;  %v573_v17 = vmax.f32 %v453_v8, 0.0  ;;  %v578_v37 = vmax.f32 %v519_v25, 0.0 }
  0x9e   :  { %4359 = vmatmul.msk.bf16.gmra.mxu1 %vm281_vm0, %v4568_v18  ;;  %4370 = vmatmul.msk.bf16.gmra.mxu2 %vm281_vm0, %v4568_v18 }
  0x9f   :  { %4381 = vmatmul.msk.bf16.gmra.mxu3 %vm281_vm0, %v4568_v18  ;;  %v574_v18 = vmax.f32 %v517_v9, 0.0  ;;  %v99_v9 = vpop.permute.xlu2 %98 }
  0xa1   :  { %v5120_v31 = vpop.f32.mrf.mxu2 }
  0xa2   :  { %v5122_v32 = vpop.f32.mrf.mxu3  ;;  %v5130_v35 = vpop.f32.mrf.mxu0 }
  0xa3   :  { %v5132_v36 = vpop.f32.mrf.mxu1 }
  0xa4   :  { %1785 = vperm.xlu2 %4603, %v1447_v29   ;;  %1780 = vperm.xlu1 %4602, %v1446_v33   ;;  %v1458_v29 = vld [vmem:[%s8417_s5 + $0x198] sm:$0xff]  ;;  %v89_v33 = vpop.permute.xlu1 %88 }
  0xa5   :  { %1775 = vperm.xlu0 %4601, %v1445_v34   ;;  %v577_v34 = vmax.f32 %v455_v24, 0.0  ;;  %v330_v38 = vadd.f32 %v5082_v19, %v89_v33  ;;  %v394_v39 = vadd.f32 %v5084_v20, %v89_v33  ;;  %v458_v40 = vadd.f32 %v5120_v31, %v89_v33  ;;  %v1460_v19 = vld [vmem:[%s8417_s5 + $0x1a8] sm:$0xff] }
  0xa6   :  { %v522_v41 = vadd.f32 %v5122_v32, %v89_v33 }
  0xa7   :  { %v579_v32 = vmax.f32 %v330_v38, 0.0  ;;  %v580_v48 = vmax.f32 %v394_v39, 0.0  ;;  %v581_v49 = vmax.f32 %v458_v40, 0.0  ;;  %v1470_v39 = vld [vmem:[%s8417_s5 + $0x1f8] sm:$0xff] }
  0xa9   :  { %v5170_v51 = vpop.f32.mrf.mxu2 }
  0xaa   :  { %v5172_v52 = vpop.f32.mrf.mxu3  ;;  %v5183_v56 = vpop.f32.mrf.mxu0 }
  0xab   :  { %v5185_v57 = vpop.f32.mrf.mxu1 }
  0xac   :  { %1800 = vperm.xlu2 %4603, %v1450_v50   ;;  %1795 = vperm.xlu1 %4602, %v1449_v53   ;;  %v582_v50 = vmax.f32 %v522_v41, 0.0  ;;  %v94_v53 = vpop.permute.xlu1 %93 }
  0xad   :  { %1790 = vperm.xlu0 %4601, %v1448_v54   ;;  %4349 = vmatmul.msk.bf16.gmra.mxu0 %vm281_vm0, %v4569_v55  ;;  %v332_v54 = vadd.f32 %v5130_v35, %v94_v53  ;;  %v1463_v35 = vld [vmem:[%s8417_s5 + $0x1c0] sm:$0xff] }
  0xae   :  { %4360 = vmatmul.msk.bf16.gmra.mxu1 %vm281_vm0, %v4569_v55  ;;  %4371 = vmatmul.msk.bf16.gmra.mxu2 %vm281_vm0, %v4569_v55 }
  0xaf   :  { %4382 = vmatmul.msk.bf16.gmra.mxu3 %vm281_vm0, %v4569_v55  ;;  %v396_v55 = vadd.f32 %v5132_v36, %v94_v53 }
  0xb1   :  { %v5194_v61 = vpop.f32.mrf.mxu2  ;;  %v584_v8 = vmax.f32 %v396_v55, 0.0  ;;  %v1473_v55 = vld [vmem:[%s8417_s5 + $0x210] sm:$0xff] }
  0xb2   :  { %v5196_v0 = vpop.f32.mrf.mxu3  ;;  %v5204_v3 = vpop.f32.mrf.mxu0 }
  0xb3   :  { %v5206_v4 = vpop.f32.mrf.mxu1 }
  0xb4   :  { %1815 = vperm.xlu2 %4603, %v1453_v60   ;;  %1810 = vperm.xlu1 %4602, %v1452_v1   ;;  %v460_v60 = vadd.f32 %v5170_v51, %v94_v53  ;;  %v524_v1 = vadd.f32 %v5172_v52, %v94_v53  ;;  %v583_v52 = vmax.f32 %v332_v54, 0.0 }
  0xb5   :  { %1805 = vperm.xlu0 %4601, %v1451_v2   ;;  %v1465_v2 = vld [vmem:[%s8417_s5 + $0x1d0] sm:$0xff] }
  0xb9   :  { %v5215_v11 = vpop.f32.mrf.mxu2 }
  0xba   :  { %v5217_v12 = vpop.f32.mrf.mxu3  ;;  %v5225_v47 = vpop.f32.mrf.mxu0 }
  0xbb   :  { %v5227_v58 = vpop.f32.mrf.mxu1 }
  0xbc   :  { %1830 = vperm.xlu2 %4603, %v1456_v10   ;;  %1825 = vperm.xlu1 %4602, %v1455_v13   ;;  %v585_v10 = vmax.f32 %v460_v60, 0.0  ;;  %v586_v13 = vmax.f32 %v524_v1, 0.0 }
  0xbd   :  { %1820 = vperm.xlu0 %4601, %v1454_v46   ;;  %739 = vmatmul.f32.vlgmr.msrb.gmra.mxu0 %v571_v59  ;;  %v335_v46 = vadd.f32 %v5183_v56, %v99_v9  ;;  %v399_v59 = vadd.f32 %v5185_v57, %v99_v9  ;;  %v1466_v56 = vld [vmem:[%s8417_s5 + $0x1d8] sm:$0xff] }
  0xbe   :  { %822 = vmatmul.f32.vlgmr.msrb.gmra.mxu1 %v572_v16  ;;  %905 = vmatmul.f32.vlgmr.msrb.gmra.mxu2 %v573_v17  ;;  %v463_v16 = vadd.f32 %v5194_v61, %v99_v9  ;;  %v527_v17 = vadd.f32 %v5196_v0, %v99_v9 }
  0xbf   :  { %988 = vmatmul.f32.vlgmr.msrb.gmra.mxu3 %v574_v18  ;;  %v1468_v18 = vld [vmem:[%s8417_s5 + $0x1e8] sm:$0xff]  ;;  %v587_v0 = vmax.f32 %v335_v46, 0.0  ;;  %v588_v24 = vmax.f32 %v399_v59, 0.0 }
  0xc0   :  { %v589_v25 = vmax.f32 %v463_v16, 0.0  ;;  %v1476_v59 = vld [vmem:[%s8417_s5 + $0x228] sm:$0xff] }
  0xc1   :  { %v5236_v27 = vpop.f32.mrf.mxu2 }
  0xc2   :  { %v5238_v28 = vpop.f32.mrf.mxu3  ;;  %v5246_v63 = vpop.f32.mrf.mxu0 }
  0xc3   :  { %v5248_v14 = vpop.f32.mrf.mxu1 }
  0xc4   :  { %1845 = vperm.xlu2 %4603, %v1459_v26   ;;  %1840 = vperm.xlu1 %4602, %v1458_v29   ;;  %v590_v26 = vmax.f32 %v527_v17, 0.0  ;;  %v104_v29 = vpop.permute.xlu2 %103 }
  0xc5   :  { %1835 = vperm.xlu0 %4601, %v1457_v62   ;;  %742 = vmatmul.f32.gmra.mxu0 %v575_v15  ;;  %v337_v62 = vadd.f32 %v5204_v3, %v104_v29  ;;  %v401_v15 = vadd.f32 %v5206_v4, %v104_v29  ;;  %v529_v33 = vadd.f32 %v5217_v12, %v104_v29  ;;  %v1469_v3 = vld [vmem:[%s8417_s5 + $0x1f0] sm:$0xff] }
  0xc6   :  { %825 = vmatmul.f32.gmra.mxu1 %v576_v30  ;;  %908 = vmatmul.f32.gmra.mxu2 %v577_v34  ;;  %v465_v30 = vadd.f32 %v5215_v11, %v104_v29  ;;  %v1471_v34 = vld [vmem:[%s8417_s5 + $0x200] sm:$0xff] }
  0xc7   :  { %991 = vmatmul.f32.gmra.mxu3 %v578_v37  ;;  %v591_v12 = vmax.f32 %v337_v62, 0.0  ;;  %v592_v40 = vmax.f32 %v401_v15, 0.0  ;;  %v1479_v15 = vld [vmem:[%s8417_s5 + $0x240] sm:$0xff] }
  0xc8   :  { %v593_v41 = vmax.f32 %v465_v30, 0.0 }
  0xc9   :  { %v5257_v43 = vpop.f32.mrf.mxu2 }
  0xca   :  { %v5259_v44 = vpop.f32.mrf.mxu3  ;;  %v5267_v20 = vpop.f32.mrf.mxu0 }
  0xcb   :  { %v5269_v31 = vpop.f32.mrf.mxu1 }
  0xcc   :  { %1860 = vperm.xlu2 %4603, %v1462_v42   ;;  %1855 = vperm.xlu1 %4602, %v1461_v45   ;;  %v594_v42 = vmax.f32 %v529_v33, 0.0  ;;  %v109_v45 = vpop.permute.xlu0 %108 }
  0xcd   :  { %1850 = vperm.xlu0 %4601, %v1460_v19   ;;  %745 = vmatmul.f32.gmra.mxu0 %v579_v32  ;;  %v340_v19 = vadd.f32 %v5225_v47, %v109_v45  ;;  %v404_v32 = vadd.f32 %v5227_v58, %v109_v45  ;;  %v1472_v47 = vld [vmem:[%s8417_s5 + $0x208] sm:$0xff] }
  0xce   :  { %828 = vmatmul.f32.gmra.mxu1 %v580_v48  ;;  %911 = vmatmul.f32.gmra.mxu2 %v581_v49  ;;  %v468_v48 = vadd.f32 %v5236_v27, %v109_v45  ;;  %v532_v49 = vadd.f32 %v5238_v28, %v109_v45 }
  0xcf   :  { %994 = vmatmul.f32.gmra.mxu3 %v582_v50  ;;  %v1474_v50 = vld [vmem:[%s8417_s5 + $0x218] sm:$0xff]  ;;  %v595_v28 = vmax.f32 %v340_v19, 0.0  ;;  %v596_v60 = vmax.f32 %v404_v32, 0.0 }
  0xd0   :  { %v597_v1 = vmax.f32 %v468_v48, 0.0  ;;  %v1482_v32 = vld [vmem:[%s8417_s5 + $0x258] sm:$0xff] }
  0xd1   :  { %v5278_v5 = vpop.f32.mrf.mxu2 }
  0xd2   :  { %v5280_v6 = vpop.f32.mrf.mxu3  ;;  %v5288_v36 = vpop.f32.mrf.mxu0 }
  0xd3   :  { %v5290_v51 = vpop.f32.mrf.mxu1 }
  0xd4   :  { %1875 = vperm.xlu2 %4603, %v1465_v2   ;;  %1870 = vperm.xlu1 %4602, %v1464_v7   ;;  %v598_v2 = vmax.f32 %v532_v49, 0.0  ;;  %v114_v7 = vpop.permute.xlu1 %113 }
  0xd5   :  { %1865 = vperm.xlu0 %4601, %v1463_v35   ;;  %748 = vmatmul.f32.gmra.mxu0 %v583_v52  ;;  %v342_v35 = vadd.f32 %v5246_v63, %v114_v7  ;;  %v406_v52 = vadd.f32 %v5248_v14, %v114_v7  ;;  %v534_v9 = vadd.f32 %v5259_v44, %v114_v7  ;;  %v1475_v63 = vld [vmem:[%s8417_s5 + $0x220] sm:$0xff] }
  0xd6   :  { %831 = vmatmul.f32.gmra.mxu1 %v584_v8  ;;  %914 = vmatmul.f32.gmra.mxu2 %v585_v10  ;;  %v470_v8 = vadd.f32 %v5257_v43, %v114_v7  ;;  %v1477_v10 = vld [vmem:[%s8417_s5 + $0x230] sm:$0xff] }
  0xd7   :  { %997 = vmatmul.f32.gmra.mxu3 %v586_v13  ;;  %v599_v44 = vmax.f32 %v342_v35, 0.0  ;;  %v600_v16 = vmax.f32 %v406_v52, 0.0  ;;  %v1485_v52 = vld [vmem:[%s8417_s5 + $0x270] sm:$0xff] }
  0xd8   :  { %v601_v17 = vmax.f32 %v470_v8, 0.0 }
  0xd9   :  { %v5299_v21 = vpop.f32.mrf.mxu2 }
  0xda   :  { %v5301_v22 = vpop.f32.mrf.mxu3  ;;  %v5309_v57 = vpop.f32.mrf.mxu0 }
  0xdb   :  { %v5311_v61 = vpop.f32.mrf.mxu1 }
  0xdc   :  { %1890 = vperm.xlu2 %4603, %v1468_v18   ;;  %1885 = vperm.xlu1 %4602, %v1467_v23   ;;  %v602_v18 = vmax.f32 %v534_v9, 0.0  ;;  %v119_v23 = vpop.permute.xlu2 %118 }
  0xdd   :  { %1880 = vperm.xlu0 %4601, %v1466_v56   ;;  %751 = vmatmul.f32.gmra.mxu0 %v587_v0  ;;  %v345_v56 = vadd.f32 %v5267_v20, %v119_v23  ;;  %v409_v0 = vadd.f32 %v5269_v31, %v119_v23  ;;  %v1478_v20 = vld [vmem:[%s8417_s5 + $0x238] sm:$0xff] }
  0xde   :  { %834 = vmatmul.f32.gmra.mxu1 %v588_v24  ;;  %917 = vmatmul.f32.gmra.mxu2 %v589_v25  ;;  %v473_v24 = vadd.f32 %v5278_v5, %v119_v23  ;;  %v537_v25 = vadd.f32 %v5280_v6, %v119_v23 }
  0xdf   :  { %1000 = vmatmul.f32.gmra.mxu3 %v590_v26  ;;  %v1480_v26 = vld [vmem:[%s8417_s5 + $0x248] sm:$0xff]  ;;  %v603_v6 = vmax.f32 %v345_v56, 0.0  ;;  %v604_v30 = vmax.f32 %v409_v0, 0.0 }
  0xe0   :  { %v605_v33 = vmax.f32 %v473_v24, 0.0  ;;  %v1488_v0 = vld [vmem:[%s8417_s5 + $0x288] sm:$0xff] }
  0xe1   :  { %v5320_v37 = vpop.f32.mrf.mxu2 }
  0xe2   :  { %v5322_v38 = vpop.f32.mrf.mxu3  ;;  %v5330_v4 = vpop.f32.mrf.mxu0 }
  0xe3   :  { %v5332_v11 = vpop.f32.mrf.mxu1 }
  0xe4   :  { %1905 = vperm.xlu2 %4603, %v1471_v34   ;;  %1900 = vperm.xlu1 %4602, %v1470_v39   ;;  %v606_v34 = vmax.f32 %v537_v25, 0.0  ;;  %v124_v39 = vpop.permute.xlu0 %123 }
  0xe5   :  { %1895 = vperm.xlu0 %4601, %v1469_v3   ;;  %754 = vmatmul.f32.gmra.mxu0 %v591_v12  ;;  %v347_v3 = vadd.f32 %v5288_v36, %v124_v39  ;;  %v411_v12 = vadd.f32 %v5290_v51, %v124_v39  ;;  %v1481_v36 = vld [vmem:[%s8417_s5 + $0x250] sm:$0xff] }
  0xe6   :  { %837 = vmatmul.f32.gmra.mxu1 %v592_v40  ;;  %920 = vmatmul.f32.gmra.mxu2 %v593_v41  ;;  %v475_v40 = vadd.f32 %v5299_v21, %v124_v39  ;;  %v539_v41 = vadd.f32 %v5301_v22, %v124_v39 }
  0xe7   :  { %1003 = vmatmul.f32.gmra.mxu3 %v594_v42  ;;  %v1483_v42 = vld [vmem:[%s8417_s5 + $0x260] sm:$0xff]  ;;  %v607_v22 = vmax.f32 %v347_v3, 0.0  ;;  %v608_v48 = vmax.f32 %v411_v12, 0.0 }
  0xe8   :  { %v609_v49 = vmax.f32 %v475_v40, 0.0  ;;  %v1491_v12 = vld [vmem:[%s8417_s5 + $0x2a0] sm:$0xff] }
  0xe9   :  { %v5341_v53 = vpop.f32.mrf.mxu2 }
  0xea   :  { %v5343_v54 = vpop.f32.mrf.mxu3  ;;  %v5351_v58 = vpop.f32.mrf.mxu0 }
  0xeb   :  { %v5353_v27 = vpop.f32.mrf.mxu1 }
  0xec   :  { %1920 = vperm.xlu2 %4603, %v1474_v50   ;;  %1915 = vperm.xlu1 %4602, %v1473_v55   ;;  %v610_v50 = vmax.f32 %v539_v41, 0.0  ;;  %v129_v55 = vpop.permute.xlu1 %128 }
  0xed   :  { %1910 = vperm.xlu0 %4601, %v1472_v47   ;;  %757 = vmatmul.f32.gmra.mxu0 %v595_v28  ;;  %v350_v47 = vadd.f32 %v5309_v57, %v129_v55  ;;  %v414_v28 = vadd.f32 %v5311_v61, %v129_v55  ;;  %v1484_v57 = vld [vmem:[%s8417_s5 + $0x268] sm:$0xff] }
  0xee   :  { %840 = vmatmul.f32.gmra.mxu1 %v596_v60  ;;  %923 = vmatmul.f32.gmra.mxu2 %v597_v1  ;;  %v478_v60 = vadd.f32 %v5320_v37, %v129_v55  ;;  %v542_v1 = vadd.f32 %v5322_v38, %v129_v55 }
  0xef   :  { %1006 = vmatmul.f32.gmra.mxu3 %v598_v2  ;;  %v1486_v2 = vld [vmem:[%s8417_s5 + $0x278] sm:$0xff]  ;;  %v611_v38 = vmax.f32 %v350_v47, 0.0  ;;  %v612_v8 = vmax.f32 %v414_v28, 0.0 }
  0xf0   :  { %v613_v9 = vmax.f32 %v478_v60, 0.0  ;;  %v1494_v28 = vld [vmem:[%s8417_s5 + $0x2b8] sm:$0xff] }
  0xf1   :  { %v5362_v13 = vpop.f32.mrf.mxu2 }
  0xf2   :  { %v5364_v46 = vpop.f32.mrf.mxu3  ;;  %v5372_v14 = vpop.f32.mrf.mxu0 }
  0xf3   :  { %v5374_v43 = vpop.f32.mrf.mxu1 }
  0xf4   :  { %1935 = vperm.xlu2 %4603, %v1477_v10   ;;  %1930 = vperm.xlu1 %4602, %v1476_v59   ;;  %v614_v10 = vmax.f32 %v542_v1, 0.0  ;;  %v134_v59 = vpop.permute.xlu2 %133 }
  0xf5   :  { %1925 = vperm.xlu0 %4601, %v1475_v63   ;;  %760 = vmatmul.f32.gmra.mxu0 %v599_v44  ;;  %v352_v63 = vadd.f32 %v5330_v4, %v134_v59  ;;  %v416_v44 = vadd.f32 %v5332_v11, %v134_v59  ;;  %v1487_v4 = vld [vmem:[%s8417_s5 + $0x280] sm:$0xff] }
  0xf6   :  { %843 = vmatmul.f32.gmra.mxu1 %v600_v16  ;;  %926 = vmatmul.f32.gmra.mxu2 %v601_v17  ;;  %v480_v16 = vadd.f32 %v5341_v53, %v134_v59  ;;  %v544_v17 = vadd.f32 %v5343_v54, %v134_v59 }
  0xf7   :  { %1009 = vmatmul.f32.gmra.mxu3 %v602_v18  ;;  %v1489_v18 = vld [vmem:[%s8417_s5 + $0x290] sm:$0xff]  ;;  %v615_v54 = vmax.f32 %v352_v63, 0.0  ;;  %v616_v24 = vmax.f32 %v416_v44, 0.0 }
  0xf8   :  { %v617_v25 = vmax.f32 %v480_v16, 0.0  ;;  %v1497_v44 = vld [vmem:[%s8417_s5 + $0x2d0] sm:$0xff] }
  0xf9   :  { %v5383_v29 = vpop.f32.mrf.mxu2 }
  0xfa   :  { %v5385_v62 = vpop.f32.mrf.mxu3  ;;  %v5393_v31 = vpop.f32.mrf.mxu0 }
  0xfb   :  { %v5395_v5 = vpop.f32.mrf.mxu1 }
  0xfc   :  { %1950 = vperm.xlu2 %4603, %v1480_v26   ;;  %1945 = vperm.xlu1 %4602, %v1479_v15   ;;  %v618_v26 = vmax.f32 %v544_v17, 0.0  ;;  %v139_v15 = vpop.permute.xlu0 %138 }
  0xfd   :  { %1940 = vperm.xlu0 %4601, %v1478_v20   ;;  %763 = vmatmul.f32.gmra.mxu0 %v603_v6  ;;  %v355_v20 = vadd.f32 %v5351_v58, %v139_v15  ;;  %v419_v6 = vadd.f32 %v5353_v27, %v139_v15  ;;  %v1490_v58 = vld [vmem:[%s8417_s5 + $0x298] sm:$0xff] }
  0xfe   :  { %846 = vmatmul.f32.gmra.mxu1 %v604_v30  ;;  %929 = vmatmul.f32.gmra.mxu2 %v605_v33  ;;  %v483_v30 = vadd.f32 %v5362_v13, %v139_v15  ;;  %v547_v33 = vadd.f32 %v5364_v46, %v139_v15 }
  0xff   :  { %1012 = vmatmul.f32.gmra.mxu3 %v606_v34  ;;  %v1492_v34 = vld [vmem:[%s8417_s5 + $0x2a8] sm:$0xff]  ;;  %v619_v46 = vmax.f32 %v355_v20, 0.0  ;;  %v620_v40 = vmax.f32 %v419_v6, 0.0 }
 0x100   :  { %v621_v41 = vmax.f32 %v483_v30, 0.0  ;;  %v1500_v6 = vld [vmem:[%s8417_s5 + $0x2e8] sm:$0xff] }
 0x101   :  { %v5404_v45 = vpop.f32.mrf.mxu2 }
 0x102   :  { %v5406_v19 = vpop.f32.mrf.mxu3  ;;  %v5414_v51 = vpop.f32.mrf.mxu0 }
 0x103   :  { %v5416_v21 = vpop.f32.mrf.mxu1 }
 0x104   :  { %1965 = vperm.xlu2 %4603, %v1483_v42   ;;  %1960 = vperm.xlu1 %4602, %v1482_v32   ;;  %v622_v42 = vmax.f32 %v547_v33, 0.0  ;;  %v144_v32 = vpop.permute.xlu1 %143 }
 0x105   :  { %1955 = vperm.xlu0 %4601, %v1481_v36   ;;  %766 = vmatmul.f32.gmra.mxu0 %v607_v22  ;;  %v357_v36 = vadd.f32 %v5372_v14, %v144_v32  ;;  %v421_v22 = vadd.f32 %v5374_v43, %v144_v32  ;;  %v1493_v14 = vld [vmem:[%s8417_s5 + $0x2b0] sm:$0xff] }
 0x106   :  { %849 = vmatmul.f32.gmra.mxu1 %v608_v48  ;;  %932 = vmatmul.f32.gmra.mxu2 %v609_v49  ;;  %v485_v48 = vadd.f32 %v5383_v29, %v144_v32  ;;  %v549_v49 = vadd.f32 %v5385_v62, %v144_v32 }
 0x107   :  { %1015 = vmatmul.f32.gmra.mxu3 %v610_v50  ;;  %v1495_v50 = vld [vmem:[%s8417_s5 + $0x2c0] sm:$0xff]  ;;  %v623_v62 = vmax.f32 %v357_v36, 0.0  ;;  %v624_v60 = vmax.f32 %v421_v22, 0.0 }
 0x108   :  { %v625_v1 = vmax.f32 %v485_v48, 0.0  ;;  %v1503_v22 = vld [vmem:[%s8417_s5 + $0x300] sm:$0xff] }
 0x109   :  { %v5425_v7 = vpop.f32.mrf.mxu2 }
 0x10a   :  { %v5427_v35 = vpop.f32.mrf.mxu3  ;;  %v5435_v61 = vpop.f32.mrf.mxu0 }
 0x10b   :  { %v5437_v37 = vpop.f32.mrf.mxu1 }
 0x10c   :  { %1980 = vperm.xlu2 %4603, %v1486_v2   ;;  %1975 = vperm.xlu1 %4602, %v1485_v52   ;;  %v626_v2 = vmax.f32 %v549_v49, 0.0  ;;  %v149_v52 = vpop.permute.xlu2 %148 }
 0x10d   :  { %1970 = vperm.xlu0 %4601, %v1484_v57   ;;  %769 = vmatmul.f32.gmra.mxu0 %v611_v38  ;;  %v360_v57 = vadd.f32 %v5393_v31, %v149_v52  ;;  %v424_v38 = vadd.f32 %v5395_v5, %v149_v52  ;;  %v1496_v31 = vld [vmem:[%s8417_s5 + $0x2c8] sm:$0xff] }
 0x10e   :  { %852 = vmatmul.f32.gmra.mxu1 %v612_v8  ;;  %935 = vmatmul.f32.gmra.mxu2 %v613_v9  ;;  %v488_v8 = vadd.f32 %v5404_v45, %v149_v52  ;;  %v552_v9 = vadd.f32 %v5406_v19, %v149_v52 }
 0x10f   :  { %1018 = vmatmul.f32.gmra.mxu3 %v614_v10  ;;  %v1498_v10 = vld [vmem:[%s8417_s5 + $0x2d8] sm:$0xff]  ;;  %v627_v19 = vmax.f32 %v360_v57, 0.0  ;;  %v628_v16 = vmax.f32 %v424_v38, 0.0 }
 0x110   :  { %v629_v17 = vmax.f32 %v488_v8, 0.0  ;;  %v1506_v38 = vld [vmem:[%s8417_s5 + $0x318] sm:$0xff] }
 0x111   :  { %v5446_v23 = vpop.f32.mrf.mxu2 }
 0x112   :  { %v5448_v56 = vpop.f32.mrf.mxu3  ;;  %v5456_v11 = vpop.f32.mrf.mxu0 }
 0x113   :  { %v5458_v53 = vpop.f32.mrf.mxu1 }
 0x114   :  { %1995 = vperm.xlu2 %4603, %v1489_v18   ;;  %1990 = vperm.xlu1 %4602, %v1488_v0   ;;  %v630_v18 = vmax.f32 %v552_v9, 0.0  ;;  %v154_v0 = vpop.permute.xlu0 %153  ;;  %v164_v49 = vpop.permute.xlu2 %163 }
 0x115   :  { %1985 = vperm.xlu0 %4601, %v1487_v4   ;;  %772 = vmatmul.f32.gmra.mxu0 %v615_v54  ;;  %v362_v4 = vadd.f32 %v5414_v51, %v154_v0  ;;  %v426_v54 = vadd.f32 %v5416_v21, %v154_v0  ;;  %v1499_v51 = vld [vmem:[%s8417_s5 + $0x2e0] sm:$0xff] }
 0x116   :  { %855 = vmatmul.f32.gmra.mxu1 %v616_v24  ;;  %938 = vmatmul.f32.gmra.mxu2 %v617_v25  ;;  %v490_v24 = vadd.f32 %v5425_v7, %v154_v0  ;;  %v554_v25 = vadd.f32 %v5427_v35, %v154_v0  ;;  %v1510_v0 = vld [vmem:[%s8417_s5 + $0x338] sm:$0xff] }
 0x117   :  { %1021 = vmatmul.f32.gmra.mxu3 %v618_v26  ;;  %v1501_v26 = vld [vmem:[%s8417_s5 + $0x2f0] sm:$0xff]  ;;  %v631_v35 = vmax.f32 %v362_v4, 0.0  ;;  %v632_v30 = vmax.f32 %v426_v54, 0.0 }
 0x118   :  { %v633_v33 = vmax.f32 %v490_v24, 0.0  ;;  %v1509_v24 = vld [vmem:[%s8417_s5 + $0x330] sm:$0xff] }
 0x119   :  { %v5467_v39 = vpop.f32.mrf.mxu2 }
 0x11a   :  { %v5469_v3 = vpop.f32.mrf.mxu3  ;;  %v5477_v27 = vpop.f32.mrf.mxu0 }
 0x11b   :  { %v5479_v13 = vpop.f32.mrf.mxu1 }
 0x11c   :  { %2010 = vperm.xlu2 %4603, %v1492_v34   ;;  %2005 = vperm.xlu1 %4602, %v1491_v12   ;;  %v634_v34 = vmax.f32 %v554_v25, 0.0  ;;  %v159_v12 = vpop.permute.xlu1 %158 }
 0x11d   :  { %2000 = vperm.xlu0 %4601, %v1490_v58   ;;  %775 = vmatmul.f32.gmra.mxu0 %v619_v46  ;;  %v365_v58 = vadd.f32 %v5435_v61, %v159_v12  ;;  %v429_v46 = vadd.f32 %v5437_v37, %v159_v12  ;;  %v1502_v61 = vld [vmem:[%s8417_s5 + $0x2f8] sm:$0xff] }
 0x11e   :  { %858 = vmatmul.f32.gmra.mxu1 %v620_v40  ;;  %941 = vmatmul.f32.gmra.mxu2 %v621_v41  ;;  %v493_v40 = vadd.f32 %v5446_v23, %v159_v12  ;;  %v557_v41 = vadd.f32 %v5448_v56, %v159_v12 }
 0x11f   :  { %1024 = vmatmul.f32.gmra.mxu3 %v622_v42  ;;  %v1504_v42 = vld [vmem:[%s8417_s5 + $0x308] sm:$0xff]  ;;  %v635_v56 = vmax.f32 %v365_v58, 0.0  ;;  %v636_v48 = vmax.f32 %v429_v46, 0.0  ;;  %v1513_v46 = vld [vmem:[%s8417_s5 + $0x350] sm:$0xff] }
 0x121   :  { %v5488_v55 = vpop.f32.mrf.mxu2 }
 0x122   :  { %v5490_v47 = vpop.f32.mrf.mxu3  ;;  %v5498_v43 = vpop.f32.mrf.mxu0 }
 0x123   :  { %v5500_v29 = vpop.f32.mrf.mxu1 }
 0x124   :  { %2025 = vperm.xlu2 %4603, %v1495_v50   ;;  %2020 = vperm.xlu1 %4602, %v1494_v28   ;;  %v637_v50 = vmax.f32 %v493_v40, 0.0  ;;  %v638_v28 = vmax.f32 %v557_v41, 0.0 }
 0x125   :  { %2015 = vperm.xlu0 %4601, %v1493_v14   ;;  %778 = vmatmul.f32.gmra.mxu0 %v623_v62  ;;  %v367_v14 = vadd.f32 %v5456_v11, %v164_v49  ;;  %v431_v62 = vadd.f32 %v5458_v53, %v164_v49  ;;  %v1505_v11 = vld [vmem:[%s8417_s5 + $0x310] sm:$0xff] }
 0x126   :  { %861 = vmatmul.f32.gmra.mxu1 %v624_v60  ;;  %944 = vmatmul.f32.gmra.mxu2 %v625_v1  ;;  %v495_v60 = vadd.f32 %v5467_v39, %v164_v49  ;;  %v559_v1 = vadd.f32 %v5469_v3, %v164_v49 }
 0x127   :  { %1027 = vmatmul.f32.gmra.mxu3 %v626_v2  ;;  %v1507_v2 = vld [vmem:[%s8417_s5 + $0x320] sm:$0xff]  ;;  %v639_v3 = vmax.f32 %v367_v14, 0.0  ;;  %v640_v8 = vmax.f32 %v431_v62, 0.0  ;;  %v1516_v62 = vld [vmem:[%s8417_s5 + $0x368] sm:$0xff] }
 0x128   :  { %v641_v9 = vmax.f32 %v495_v60, 0.0 }
 0x129   :  { %v5509_v59 = vpop.f32.mrf.mxu2 }
 0x12a   :  { %v5511_v63 = vpop.f32.mrf.mxu3  ;;  %v5519_v5 = vpop.f32.mrf.mxu0 }
 0x12b   :  { %v5521_v45 = vpop.f32.mrf.mxu1 }
 0x12c   :  { %2040 = vperm.xlu2 %4603, %v1498_v10   ;;  %2035 = vperm.xlu1 %4602, %v1497_v44   ;;  %v642_v10 = vmax.f32 %v559_v1, 0.0  ;;  %v179_v44 = vpop.permute.xlu2 %178 }
 0x12d   :  { %2030 = vperm.xlu0 %4601, %v1496_v31   ;;  %781 = vmatmul.f32.gmra.mxu0 %v627_v19  ;;  %v169_v31 = vpop.permute.xlu0 %168  ;;  %v439_v49 = vadd.f32 %v5521_v45, %v179_v44  ;;  %v1514_v45 = vld [vmem:[%s8417_s5 + $0x358] sm:$0xff] }
 0x12e   :  { %864 = vmatmul.f32.gmra.mxu1 %v628_v16  ;;  %947 = vmatmul.f32.gmra.mxu2 %v629_v17  ;;  %v370_v19 = vadd.f32 %v5477_v27, %v169_v31  ;;  %v434_v16 = vadd.f32 %v5479_v13, %v169_v31  ;;  %v498_v17 = vadd.f32 %v5488_v55, %v169_v31  ;;  %v1508_v27 = vld [vmem:[%s8417_s5 + $0x328] sm:$0xff] }
 0x12f   :  { %1030 = vmatmul.f32.gmra.mxu3 %v630_v18  ;;  %v562_v18 = vadd.f32 %v5490_v47, %v169_v31 }
 0x130   :  { %v643_v47 = vmax.f32 %v370_v19, 0.0  ;;  %v644_v25 = vmax.f32 %v434_v16, 0.0  ;;  %v1519_v16 = vld [vmem:[%s8417_s5 + $0x380] sm:$0xff] }
 0x131   :  { %v5530_v15 = vpop.f32.mrf.mxu2 }
 0x132   :  { %v5532_v20 = vpop.f32.mrf.mxu3  ;;  %v5540_v21 = vpop.f32.mrf.mxu0 }
 0x133   :  { %v5542_v7 = vpop.f32.mrf.mxu1  ;;  %v567_v14 = vadd.f32 %v5532_v20, %v179_v44 }
 0x134   :  { %2055 = vperm.xlu2 %4603, %v1501_v26   ;;  %2050 = vperm.xlu1 %4602, %v1500_v6   ;;  %v645_v26 = vmax.f32 %v498_v17, 0.0  ;;  %v646_v6 = vmax.f32 %v562_v18, 0.0 }
 0x135   :  { %2045 = vperm.xlu0 %4601, %v1499_v51   ;;  %784 = vmatmul.f32.gmra.mxu0 %v631_v35  ;;  %v174_v51 = vpop.permute.xlu1 %173 }
 0x136   :  { %867 = vmatmul.f32.gmra.mxu1 %v632_v30  ;;  %950 = vmatmul.f32.gmra.mxu2 %v633_v33  ;;  %v372_v35 = vadd.f32 %v5498_v43, %v174_v51  ;;  %v436_v30 = vadd.f32 %v5500_v29, %v174_v51  ;;  %v5609_v33 = vpop.permute.xlu2 %1590  ;;  %v500_v12 = vadd.f32 %v5509_v59, %v174_v51  ;;  %v1512_v43 = vld [vmem:[%s8417_s5 + $0x348] sm:$0xff]  ;;  %v1511_v29 = vld [vmem:[%s8417_s5 + $0x340] sm:$0xff] }
 0x137   :  { %1033 = vmatmul.f32.gmra.mxu3 %v634_v34  ;;  %8429 = vst [vmem:[#allocation10_spill] sm:$0xff] %v5609_v33  ;;  %v184_v34 = vpop.permute.xlu0 %183  ;;  %v564_v58 = vadd.f32 %v5511_v63, %v174_v51  ;;  %v1522_v51 = vld [vmem:[%s8417_s5 + $0x398] sm:$0xff] }
 0x138   :  { %v647_v63 = vmax.f32 %v372_v35, 0.0 }
 0x139   :  { %v5551_v32 = vpop.f32.mrf.mxu2 }
 0x13a   :  { %v5553_v36 = vpop.f32.mrf.mxu3  ;;  %v5561_v37 = vpop.f32.mrf.mxu0  ;;  %v505_v31 = vadd.f32 %v5551_v32, %v184_v34 }
 0x13b   :  { %8421 = vst [vmem:[#allocation2_spill] sm:$0xff] %v5561_v37  ;;  %v5563_v23 = vpop.f32.mrf.mxu1  ;;  %v569_v19 = vadd.f32 %v5553_v36, %v184_v34  ;;  %v1551_v37 = vld [vmem:[%s8417_s5 + $0x480] sm:$0xff] }
 0x13c   :  { %8422 = vst [vmem:[#allocation3_spill] sm:$0xff] %v5563_v23  ;;  %2070 = vperm.xlu2 %4603, %v1504_v42   ;;  %2065 = vperm.xlu1 %4602, %v1503_v22   ;;  %v648_v22 = vmax.f32 %v436_v30, 0.0 }
 0x13d   :  { %2060 = vperm.xlu0 %4601, %v1502_v61   ;;  %787 = vmatmul.f32.gmra.mxu0 %v635_v56  ;;  %v649_v61 = vmax.f32 %v500_v12, 0.0  ;;  %v650_v56 = vmax.f32 %v564_v58, 0.0  ;;  %v1520_v12 = vld [vmem:[%s8417_s5 + $0x388] sm:$0xff] }
 0x13e   :  { %870 = vmatmul.f32.gmra.mxu1 %v636_v48  ;;  %953 = vmatmul.f32.gmra.mxu2 %v637_v50  ;;  %v375_v48 = vadd.f32 %v5519_v5, %v179_v44  ;;  %v5632_v50 = vpop.permute.xlu1 %1585  ;;  %v1515_v5 = vld [vmem:[%s8417_s5 + $0x360] sm:$0xff] }
 0x13f   :  { %1036 = vmatmul.f32.gmra.mxu3 %v638_v28  ;;  %8432 = vst [vmem:[#allocation13_spill] sm:$0xff] %v5632_v50  ;;  %v503_v28 = vadd.f32 %v5530_v15, %v179_v44  ;;  %v441_v44 = vadd.f32 %v5542_v7, %v184_v34  ;;  %v1545_v50 = vld [vmem:[%s8417_s5 + $0x450] sm:$0xff] }
 0x140   :  { %v651_v20 = vmax.f32 %v375_v48, 0.0  ;;  %v1524_v48 = vld [vmem:[%s8417_s5 + $0x3a8] sm:$0xff] }
 0x141   :  { %v5572_v52 = vpop.f32.mrf.mxu2 }
 0x142   :  { %8423 = vst [vmem:[#allocation4_spill] sm:$0xff] %v5572_v52  ;;  %v5574_v57 = vpop.f32.mrf.mxu3  ;;  %v5582_v53 = vpop.f32.mrf.mxu0  ;;  %v1548_v52 = vld [vmem:[%s8417_s5 + $0x468] sm:$0xff] }
 0x143   :  { %8424 = vst [vmem:[#allocation5_spill] sm:$0xff] %v5574_v57  ;;  %v5584_v39 = vpop.f32.mrf.mxu1  ;;  %v1549_v57 = vld [vmem:[%s8417_s5 + $0x470] sm:$0xff] }
 0x144   :  { %8425 = vst [vmem:[#allocation6_spill] sm:$0xff] %v5582_v53  ;;  %2085 = vperm.xlu2 %4603, %v1507_v2   ;;  %2080 = vperm.xlu1 %4602, %v1506_v38   ;;  %v652_v38 = vmax.f32 %v439_v49, 0.0  ;;  %v1523_v49 = vld [vmem:[%s8417_s5 + $0x3a0] sm:$0xff] }
 0x145   :  { %8426 = vst [vmem:[#allocation7_spill] sm:$0xff] %v5584_v39  ;;  %2075 = vperm.xlu0 %4601, %v1505_v11   ;;  %790 = vmatmul.f32.gmra.mxu0 %v639_v3  ;;  %v5653_v11 = vpop.permute.xlu2 %1605  ;;  %v5655_v3 = vpop.permute.xlu0 %1595 }
 0x146   :  { %873 = vmatmul.f32.gmra.mxu1 %v640_v8  ;;  %956 = vmatmul.f32.gmra.mxu2 %v641_v9  ;;  %8434 = vst [vmem:[#allocation15_spill] sm:$0xff] %v5653_v11  ;;  %v653_v8 = vmax.f32 %v503_v28, 0.0  ;;  %v654_v9 = vmax.f32 %v567_v14, 0.0 }
 0x147   :  { %1039 = vmatmul.f32.gmra.mxu3 %v642_v10  ;;  %8435 = vst [vmem:[#allocation16_spill] sm:$0xff] %v5655_v3  ;;  %v377_v10 = vadd.f32 %v5540_v21, %v184_v34  ;;  %v1517_v21 = vld [vmem:[%s8417_s5 + $0x370] sm:$0xff] }
 0x148   :  { %v1521_v34 = vld [vmem:[%s8417_s5 + $0x390] sm:$0xff] }
 0x149   :  { %v5593_v4 = vpop.f32.mrf.mxu2  ;;  %v655_v36 = vmax.f32 %v377_v10, 0.0 }
 0x14a   :  { %8427 = vst [vmem:[#allocation8_spill] sm:$0xff] %v5593_v4  ;;  %v5595_v54 = vpop.f32.mrf.mxu3  ;;  %v5603_v13 = vpop.f32.mrf.mxu0 }
 0x14b   :  { %8428 = vst [vmem:[#allocation9_spill] sm:$0xff] %v5595_v54  ;;  %v5605_v55 = vpop.f32.mrf.mxu1 }
 0x14c   :  { %2100 = vperm.xlu2 %4603, %v1510_v0   ;;  %2095 = vperm.xlu1 %4602, %v1509_v24   ;;  %v1518_v0 = vld [vmem:[%s8417_s5 + $0x378] sm:$0xff]  ;;  %v656_v24 = vmax.f32 %v441_v44, 0.0 }
 0x14d   :  { %2090 = vperm.xlu0 %4601, %v1508_v27   ;;  %793 = vmatmul.f32.gmra.mxu0 %v643_v47  ;;  %v5678_v27 = vpop.permute.xlu1 %1600  ;;  %v657_v47 = vmax.f32 %v505_v31, 0.0 }
 0x14e   :  { %876 = vmatmul.f32.gmra.mxu1 %v644_v25  ;;  %959 = vmatmul.f32.gmra.mxu2 %v645_v26  ;;  %8437 = vst [vmem:[#allocation18_spill] sm:$0xff] %v5678_v27  ;;  %v658_v25 = vmax.f32 %v569_v19, 0.0  ;;  %v5680_v26 = vpop.permute.xlu2 %1620  ;;  %v1531_v19 = vld [vmem:[%s8417_s5 + $0x3e0] sm:$0xff]  ;;  %v1546_v27 = vld [vmem:[%s8417_s5 + $0x458] sm:$0xff] }
 0x14f   :  { %1042 = vmatmul.f32.gmra.mxu3 %v646_v6  ;;  %8438 = vst [vmem:[#allocation19_spill] sm:$0xff] %v5680_v26  ;;  %v5682_v6 = vpop.permute.xlu0 %1610 }
 0x150   :  { %8439 = vst [vmem:[#allocation20_spill] sm:$0xff] %v5682_v6  ;;  %v1542_v6 = vld [vmem:[%s8417_s5 + $0x438] sm:$0xff] }
 0x151   :  { %v5616_v40 = vpop.f32.mrf.mxu2 }
 0x152   :  { %8430 = vst [vmem:[#allocation11_spill] sm:$0xff] %v5616_v40  ;;  %v5618_v41 = vpop.f32.mrf.mxu3  ;;  %v5626_v42 = vpop.f32.mrf.mxu0 }
 0x153   :  { %8431 = vst [vmem:[#allocation12_spill] sm:$0xff] %v5618_v41  ;;  %v5628_v59 = vpop.f32.mrf.mxu1 }
 0x154   :  { %2115 = vperm.xlu2 %4603, %v1513_v46   ;;  %2110 = vperm.xlu1 %4602, %v1512_v43  }
 0x155   :  { %2105 = vperm.xlu0 %4601, %v1511_v29   ;;  %796 = vmatmul.f32.gmra.mxu0 %v647_v63  ;;  %v5701_v43 = vpop.permute.xlu1 %1615 }
 0x156   :  { %879 = vmatmul.f32.gmra.mxu1 %v648_v22  ;;  %962 = vmatmul.f32.gmra.mxu2 %v649_v61  ;;  %8440 = vst [vmem:[#allocation21_spill] sm:$0xff] %v5701_v43  ;;  %v5703_v29 = vpop.permute.xlu2 %1635  ;;  %v1525_v22 = vld [vmem:[%s8417_s5 + $0x3b0] sm:$0xff] }
 0x157   :  { %1045 = vmatmul.f32.gmra.mxu3 %v650_v56  ;;  %8441 = vst [vmem:[#allocation22_spill] sm:$0xff] %v5703_v29  ;;  %v5705_v63 = vpop.permute.xlu0 %1625  ;;  %v1539_v29 = vld [vmem:[%s8417_s5 + $0x420] sm:$0xff] }
 0x158   :  { %8442 = vst [vmem:[#allocation23_spill] sm:$0xff] %v5705_v63  ;;  %v1543_v63 = vld [vmem:[%s8417_s5 + $0x440] sm:$0xff] }
 0x159   :  { %v5639_v60 = vpop.f32.mrf.mxu2 }
 0x15a   :  { %v5641_v1 = vpop.f32.mrf.mxu3  ;;  %v5649_v2 = vpop.f32.mrf.mxu0 }
 0x15b   :  { %8433 = vst [vmem:[#allocation14_spill] sm:$0xff] %v5641_v1  ;;  %v5651_v15 = vpop.f32.mrf.mxu1  ;;  %v1552_v1 = vld [vmem:[%s8417_s5 + $0x488] sm:$0xff] }
 0x15c   :  { %2130 = vperm.xlu2 %4603, %v1516_v62   ;;  %2125 = vperm.xlu1 %4602, %v1515_v5   ;;  %v1528_v5 = vld [vmem:[%s8417_s5 + $0x3c8] sm:$0xff] }
 0x15d   :  { %2120 = vperm.xlu0 %4601, %v1514_v45   ;;  %799 = vmatmul.f32.gmra.mxu0 %v651_v20  ;;  %v5724_v62 = vpop.permute.xlu1 %1630 }
 0x15e   :  { %882 = vmatmul.f32.gmra.mxu1 %v652_v38  ;;  %965 = vmatmul.f32.gmra.mxu2 %v653_v8  ;;  %8443 = vst [vmem:[#allocation24_spill] sm:$0xff] %v5724_v62  ;;  %v1527_v38 = vld [vmem:[%s8417_s5 + $0x3c0] sm:$0xff]  ;;  %v1526_v8 = vld [vmem:[%s8417_s5 + $0x3b8] sm:$0xff]  ;;  %v5743_v44 = vpop.permute.xlu2 %1650 }
 0x15f   :  { %1048 = vmatmul.f32.gmra.mxu3 %v654_v9  ;;  %8444 = vst [vmem:[#allocation25_spill] sm:$0xff] %v5743_v44  ;;  %v5745_v31 = vpop.permute.xlu0 %1640 }
 0x160   :  { %8445 = vst [vmem:[#allocation26_spill] sm:$0xff] %v5745_v31 }
 0x161   :  { %v5664_v17 = vpop.f32.mrf.mxu2 }
 0x162   :  { %v5666_v18 = vpop.f32.mrf.mxu3  ;;  %v5674_v7 = vpop.f32.mrf.mxu0 }
 0x163   :  { %8436 = vst [vmem:[#allocation17_spill] sm:$0xff] %v5666_v18  ;;  %v5676_v32 = vpop.f32.mrf.mxu1 }
 0x164   :  { %2145 = vperm.xlu2 %4603, %v1519_v16   ;;  %2140 = vperm.xlu1 %4602, %v1518_v0  }
 0x165   :  { %2135 = vperm.xlu0 %4601, %v1517_v21   ;;  %802 = vmatmul.f32.gmra.mxu0 %v655_v36  ;;  %v1530_v21 = vld [vmem:[%s8417_s5 + $0x3d8] sm:$0xff]  ;;  %v1529_v36 = vld [vmem:[%s8417_s5 + $0x3d0] sm:$0xff] }
 0x166   :  { %885 = vmatmul.f32.gmra.mxu1 %v656_v24  ;;  %968 = vmatmul.f32.gmra.mxu2 %v657_v47 }
 0x167   :  { %1051 = vmatmul.f32.gmra.mxu3 %v658_v25  ;;  %v5764_v25 = vpop.permute.xlu1 %1645 }
 0x168   :  { %8446 = vst [vmem:[#allocation27_spill] sm:$0xff] %v5764_v25 }
 0x169   :  { %v5687_v35 = vpop.f32.mrf.mxu2 }
 0x16a   :  { %v5689_v30 = vpop.f32.mrf.mxu3  ;;  %v5697_v58 = vpop.f32.mrf.mxu0 }
 0x16b   :  { %v5699_v46 = vpop.f32.mrf.mxu1 }
 0x16c   :  { %2160 = vperm.xlu2 %4603, %v1522_v51   ;;  %2155 = vperm.xlu1 %4602, %v1521_v34   ;;  %v5766_v51 = vpop.permute.xlu2 %1665  ;;  %v5768_v34 = vpop.permute.xlu0 %1655 }
 0x16d   :  { %2150 = vperm.xlu0 %4601, %v1520_v12   ;;  %8447 = vst [vmem:[#allocation28_spill] sm:$0xff] %v5766_v51  ;;  %v1534_v12 = vld [vmem:[%s8417_s5 + $0x3f8] sm:$0xff]  ;;  %v1537_v51 = vld [vmem:[%s8417_s5 + $0x410] sm:$0xff] }
 0x16e   :  { %8448 = vst [vmem:[#allocation29_spill] sm:$0xff] %v5768_v34 }
 0x171   :  { %v5710_v61 = vpop.f32.mrf.mxu2 }
 0x172   :  { %v5712_v56 = vpop.f32.mrf.mxu3  ;;  %v5720_v28 = vpop.f32.mrf.mxu0 }
 0x173   :  { %v5722_v14 = vpop.f32.mrf.mxu1 }
 0x174   :  { %2175 = vperm.xlu2 %4603, %v1525_v22   ;;  %2170 = vperm.xlu1 %4602, %v1524_v48  }
 0x175   :  { %2165 = vperm.xlu0 %4601, %v1523_v49   ;;  %v1533_v49 = vld [vmem:[%s8417_s5 + $0x3f0] sm:$0xff] }
 0x179   :  { %v5729_v45 = vpop.f32.mrf.mxu2 }
 0x17a   :  { %v5731_v20 = vpop.f32.mrf.mxu3  ;;  %v5739_v9 = vpop.f32.mrf.mxu0 }
 0x17b   :  { %v5741_v10 = vpop.f32.mrf.mxu1 }
 0x17c   :  { %2190 = vperm.xlu2 %4603, %v1528_v5   ;;  %2185 = vperm.xlu1 %4602, %v1527_v38   ;;  %v1532_v5 = vld [vmem:[%s8417_s5 + $0x3e8] sm:$0xff] }
 0x17d   :  { %2180 = vperm.xlu0 %4601, %v1526_v8  }
 0x181   :  { %v5750_v16 = vpop.f32.mrf.mxu2 }
 0x182   :  { %v5752_v0 = vpop.f32.mrf.mxu3  ;;  %v5760_v24 = vpop.f32.mrf.mxu0 }
 0x183   :  { %v5762_v47 = vpop.f32.mrf.mxu1 }
 0x184   :  { %2205 = vperm.xlu2 %4603, %v1531_v19   ;;  %2200 = vperm.xlu1 %4602, %v1530_v21   ;;  %v5787_v19 = vpop.permute.xlu1 %1660  ;;  %v5789_v21 = vpop.permute.xlu2 %1680 }
 0x185   :  { %2195 = vperm.xlu0 %4601, %v1529_v36   ;;  %8449 = vst [vmem:[#allocation30_spill] sm:$0xff] %v5787_v19  ;;  %v5791_v36 = vpop.permute.xlu0 %1670  ;;  %v1540_v19 = vld [vmem:[%s8417_s5 + $0x428] sm:$0xff] }
 0x186   :  { %8450 = vst [vmem:[#allocation31_spill] sm:$0xff] %v5789_v21 }
 0x187   :  { %8451 = vst [vmem:[#allocation32_spill] sm:$0xff] %v5791_v36 }
 0x189   :  { %v5773_v22 = vpop.f32.mrf.mxu2 }
 0x18a   :  { %v5775_v48 = vpop.f32.mrf.mxu3  ;;  %v5783_v38 = vpop.f32.mrf.mxu0 }
 0x18b   :  { %v5785_v8 = vpop.f32.mrf.mxu1 }
 0x18c   :  { %2220 = vperm.xlu2 %4603, %v1534_v12   ;;  %2215 = vperm.xlu1 %4602, %v1533_v49   ;;  %v1536_v12 = vld [vmem:[%s8417_s5 + $0x408] sm:$0xff]  ;;  %v1535_v49 = vld [vmem:[%s8417_s5 + $0x400] sm:$0xff]  ;;  %v5810_v36 = vpop.permute.xlu1 %1675 }
 0x18d   :  { %2210 = vperm.xlu0 %4601, %v1532_v5   ;;  %8452 = vst [vmem:[#allocation33_spill] sm:$0xff] %v5810_v36  ;;  %v5825_v36 = vpop.permute.xlu2 %1695  ;;  %v5827_v62 = vpop.permute.xlu0 %1685 }
 0x18e   :  { %8453 = vst [vmem:[#allocation34_spill] sm:$0xff] %v5825_v36 }
 0x18f   :  { %8454 = vst [vmem:[#allocation35_spill] sm:$0xff] %v5827_v62 }
 0x191   :  { %v5796_v34 = vpop.f32.mrf.mxu2 }
 0x192   :  { %v5798_v44 = vpop.f32.mrf.mxu3  ;;  %v5806_v5 = vpop.f32.mrf.mxu0 }
 0x193   :  { %v5808_v21 = vpop.f32.mrf.mxu1 }
 0x194   :  { %2235 = vperm.xlu2 %4603, %v1537_v51   ;;  %2230 = vperm.xlu1 %4602, %v1536_v12   ;;  %v1538_v51 = vld [vmem:[%s8417_s5 + $0x418] sm:$0xff]  ;;  %v857_v53 = vadd.f32 %v5808_v21, %v5806_v5 }
 0x195   :  { %2225 = vperm.xlu0 %4601, %v1535_v49   ;;  %v5844_v62 = vpop.permute.xlu0 %1700 }
 0x196   :  { %8457 = vst [vmem:[#allocation38_spill] sm:$0xff] %v5844_v62 }
 0x199   :  { %v5815_v25 = vpop.f32.mrf.mxu2 }
 0x19a   :  { %v5817_v31 = vpop.f32.mrf.mxu3  ;;  %v776_v12 = vpop.f32.mrf.mxu0 }
 0x19b   :  { %v859_v49 = vpop.f32.mrf.mxu1 }
 0x19c   :  { %2250 = vperm.xlu2 %4603, %v1540_v19   ;;  %2245 = vperm.xlu1 %4602, %v1539_v29   ;;  %v1541_v19 = vld [vmem:[%s8417_s5 + $0x430] sm:$0xff]  ;;  %v5840_v29 = vpop.permute.xlu1 %1690 }
 0x19d   :  { %2240 = vperm.xlu0 %4601, %v1538_v51   ;;  %8455 = vst [vmem:[#allocation36_spill] sm:$0xff] %v5840_v29  ;;  %v5842_v51 = vpop.permute.xlu2 %1710  ;;  %v5859_v29 = vpop.permute.xlu0 %1715 }
 0x19e   :  { %8456 = vst [vmem:[#allocation37_spill] sm:$0xff] %v5842_v51 }
 0x19f   :  { %8460 = vst [vmem:[#allocation41_spill] sm:$0xff] %v5859_v29 }
 0x1a1   :  { %v942_v26 = vpop.f32.mrf.mxu2 }
 0x1a2   :  { %v5832_v43 = vpop.f32.mrf.mxu3  ;;  %v779_v36 = vpop.f32.mrf.mxu0 }
 0x1a3   :  { %v862_v11 = vpop.f32.mrf.mxu1 }
 0x1a4   :  { %2265 = vperm.xlu2 %4603, %v1543_v63   ;;  %2260 = vperm.xlu1 %4602, %v1542_v6   ;;  %v1544_v63 = vld [vmem:[%s8417_s5 + $0x448] sm:$0xff]  ;;  %v5855_v51 = vpop.permute.xlu1 %1705 }
 0x1a5   :  { %2255 = vperm.xlu0 %4601, %v1541_v19   ;;  %8458 = vst [vmem:[#allocation39_spill] sm:$0xff] %v5855_v51  ;;  %v5857_v62 = vpop.permute.xlu2 %1725 }
 0x1a6   :  { %8459 = vst [vmem:[#allocation40_spill] sm:$0xff] %v5857_v62 }
 0x1a9   :  { %v945_v3 = vpop.f32.mrf.mxu2 }
 0x1aa   :  { %v1028_v33 = vpop.f32.mrf.mxu3  ;;  %v782_v6 = vpop.f32.mrf.mxu0 }
 0x1ab   :  { %v865_v19 = vpop.f32.mrf.mxu1 }
 0x1ac   :  { %2280 = vperm.xlu2 %4603, %v1546_v27   ;;  %2275 = vperm.xlu1 %4602, %v1545_v50   ;;  %v1547_v50 = vld [vmem:[%s8417_s5 + $0x460] sm:$0xff]  ;;  %v5870_v62 = vpop.permute.xlu1 %1720  ;;  %v866_v29 = vadd.f32 %v865_v19, %v782_v6 }
 0x1ad   :  { %2270 = vperm.xlu0 %4601, %v1544_v63   ;;  %8461 = vst [vmem:[#allocation42_spill] sm:$0xff] %v5870_v62  ;;  %v5885_v19 = vpop.permute.xlu2 %1740 }
 0x1b1   :  { %v948_v54 = vpop.f32.mrf.mxu2 }
 0x1b2   :  { %v1031_v41 = vpop.f32.mrf.mxu3  ;;  %v785_v27 = vpop.f32.mrf.mxu0 }
 0x1b3   :  { %v868_v63 = vpop.f32.mrf.mxu1 }
 0x1b4   :  { %2295 = vperm.xlu2 %4603, %v1549_v57   ;;  %2290 = vperm.xlu1 %4602, %v1548_v52   ;;  %v869_v51 = vadd.f32 %v868_v63, %v785_v27  ;;  %v1550_v57 = vld [vmem:[%s8417_s5 + $0x478] sm:$0xff]  ;;  %v863_v52 = vadd.f32 %v862_v11, %v779_v36  ;;  %v5887_v27 = vpop.permute.xlu0 %1730  ;;  %v860_v63 = vadd.f32 %v859_v49, %v776_v12  ;;  %v1556_v12 = vld [vmem:[%s8417_s5 + $0x4a8] sm:$0xff] }
 0x1b5   :  { %2285 = vperm.xlu0 %4601, %v1547_v50   ;;  %v949_v50 = vadd.f32 %v948_v54, %v866_v29  ;;  %v833_v49 = vadd.f32 %v5628_v59, %v5626_v42  ;;  %v1561_v42 = vld [vmem:[%s8417_s5 + $0x4d0] sm:$0xff] }
 0x1b6   :  { %v946_v40 = vadd.f32 %v945_v3, %v863_v52  ;;  %v943_v11 = vadd.f32 %v942_v26, %v860_v63  ;;  %v1553_v26 = vld [vmem:[%s8417_s5 + $0x490] sm:$0xff]  ;;  %v8463_v52 = vld [vmem:[#allocation7_spill] sm:$0xff] }
 0x1b7   :  { %v1032_v54 = vadd.f32 %v1031_v41, %v949_v50  ;;  %v851_v41 = vadd.f32 %v5762_v47, %v5760_v24  ;;  %v5915_v24 = vpop.permute.xlu1 %1735  ;;  %v8464_v63 = vld [vmem:[#allocation11_spill] sm:$0xff] }
 0x1b8   :  { %v1029_v36 = vadd.f32 %v1028_v33, %v946_v40  ;;  %v1554_v40 = vld [vmem:[%s8417_s5 + $0x498] sm:$0xff] }
 0x1b9   :  { %v951_v4 = vpop.f32.mrf.mxu2  ;;  %v934_v47 = vadd.f32 %v5773_v22, %v851_v41  ;;  %v1558_v22 = vld [vmem:[%s8417_s5 + $0x4b8] sm:$0xff]  ;;  %v8468_v41 = vld [vmem:[#allocation8_spill] sm:$0xff] }
 0x1ba   :  { %v1034_v23 = vpop.f32.mrf.mxu3  ;;  %v952_v18 = vadd.f32 %v951_v4, %v869_v51  ;;  %v5881_v62 = vpop.f32.mrf.mxu0  ;;  %v854_v4 = vadd.f32 %v5785_v8, %v5783_v38  ;;  %v845_v8 = vadd.f32 %v5722_v14, %v5720_v28 }
 0x1bb   :  { %v5883_v6 = vpop.f32.mrf.mxu1 }
 0x1bc   :  { %2310 = vperm.xlu2 %4603, %v1552_v1   ;;  %v1035_v39 = vadd.f32 %v1034_v23, %v952_v18  ;;  %2305 = vperm.xlu1 %4602, %v1551_v37   ;;  %v940_v1 = vadd.f32 %v5815_v25, %v857_v53  ;;  %v1555_v37 = vld [vmem:[%s8417_s5 + $0x4a0] sm:$0xff]  ;;  %v1026_v18 = vadd.f32 %v5832_v43, %v943_v11  ;;  %v5923_v38 = vpop.permute.xlu0 %1745 }
 0x1bd   :  { %2300 = vperm.xlu0 %4601, %v1550_v57   ;;  %v848_v43 = vadd.f32 %v5741_v10, %v5739_v9  ;;  %v842_v9 = vadd.f32 %v5699_v46, %v5697_v58  ;;  %v928_v10 = vadd.f32 %v5729_v45, %v845_v8 }
 0x1be   :  { %2992 = vmatpush.msra.mxu0 %v1035_v39  ;;  %4578 = vmatpush.msra.mxu2 %v1035_v39  ;;  %v937_v39 = vadd.f32 %v5796_v34, %v854_v4  ;;  %v1023_v25 = vadd.f32 %v5817_v31, %v940_v1  ;;  %v5921_v34 = vpop.permute.xlu2 %1755  ;;  %v1017_v31 = vadd.f32 %v5775_v48, %v934_v47  ;;  %v1557_v48 = vld [vmem:[%s8417_s5 + $0x4b0] sm:$0xff]  ;;  %v1559_v4 = vld [vmem:[%s8417_s5 + $0x4c0] sm:$0xff] }
 0x1bf   :  { %v931_v21 = vadd.f32 %v5750_v16, %v848_v43  ;;  %v925_v16 = vadd.f32 %v5710_v61, %v842_v9  ;;  %v1011_v61 = vadd.f32 %v5731_v20, %v928_v10  ;;  %v916_v20 = vadd.f32 %v5639_v60, %v833_v49  ;;  %v8466_v1 = vld [vmem:[#allocation2_spill] sm:$0xff]  ;;  %v8471_v47 = vld [vmem:[#allocation12_spill] sm:$0xff]  ;;  %v1564_v9 = vld [vmem:[%s8417_s5 + $0x4e8] sm:$0xff] }
 0x1c0   :  { %2993 = vmatpush.msra.mxu0 %v1032_v54  ;;  %4579 = vmatpush.msra.mxu2 %v1032_v54  ;;  %v1020_v5 = vadd.f32 %v5798_v44, %v937_v39  ;;  %v839_v44 = vadd.f32 %v5676_v32, %v5674_v7  ;;  %v836_v7 = vadd.f32 %v5651_v15, %v5649_v2  ;;  %v1560_v54 = vld [vmem:[%s8417_s5 + $0x4c8] sm:$0xff] }
 0x1c1   :  { %v5897_v23 = vpop.f32.mrf.mxu2  ;;  %v1014_v58 = vadd.f32 %v5752_v0, %v931_v21  ;;  %v5958_v0 = vpop.permute.xlu1 %1750  ;;  %v1008_v51 = vadd.f32 %v5712_v56, %v925_v16  ;;  %v8462_v56 = vld [vmem:[#allocation6_spill] sm:$0xff]  ;;  %v8472_v21 = vld [vmem:[#allocation9_spill] sm:$0xff] }
 0x1c2   :  { %v5899_v3 = vpop.f32.mrf.mxu3  ;;  %2994 = vmatpush.msra.mxu0 %v1029_v36  ;;  %4580 = vmatpush.msra.mxu2 %v1029_v36  ;;  %v5905_v53 = vpop.f32.mrf.mxu0  ;;  %v922_v32 = vadd.f32 %v5687_v35, %v839_v44  ;;  %v919_v29 = vadd.f32 %v5664_v17, %v836_v7  ;;  %v830_v35 = vadd.f32 %v5605_v55, %v5603_v13  ;;  %v8465_v13 = vld [vmem:[#allocation17_spill] sm:$0xff]  ;;  %v8467_v36 = vld [vmem:[#allocation3_spill] sm:$0xff] }
 0x1c3   :  { %v5907_v33 = vpop.f32.mrf.mxu1  ;;  %v827_v50 = vadd.f32 %v8463_v52, %v8462_v56  ;;  %v8473_v44 = vld [vmem:[#allocation5_spill] sm:$0xff]  ;;  %v1057_v56 = vld [vmem:[%s8419_s4 + $0x10] sm:$0xff] }
 0x1c4   :  { %2325 = vperm.xlu2 %4603, %v1555_v37   ;;  %2995 = vmatpush.msra.mxu0 %v1026_v18  ;;  %v5966_v15 = vpop.permute.xlu0 %1760  ;;  %v1005_v57 = vadd.f32 %v5689_v30, %v922_v32  ;;  %v913_v11 = vadd.f32 %v8464_v63, %v830_v35  ;;  %v1002_v55 = vadd.f32 %v8465_v13, %v919_v29  ;;  %v1055_v32 = vld [vmem:[%s8419_s4] sm:$0xff]  ;;  %v1233_v52 = vld [vmem:[%s8419_s4 + $0x590] sm:$0xff] }
 0x1c5   :  { %4581 = vmatpush.msra.mxu2 %v1026_v18  ;;  %2320 = vperm.xlu1 %4602, %v1554_v40   ;;  %v824_v37 = vadd.f32 %v8467_v36, %v8466_v1  ;;  %v910_v39 = vadd.f32 %v8468_v41, %v827_v50  ;;  %v8469_v18 = vld [vmem:[#allocation14_spill] sm:$0xff]  ;;  %v1568_v41 = vld [vmem:[%s8417_s5 + $0x508] sm:$0xff] }
 0x1c6   :  { %2315 = vperm.xlu0 %4601, %v1553_v26   ;;  %2996 = vmatpush.msra.mxu0 %v1023_v25  ;;  %v5964_v2 = vpop.permute.xlu2 %1770  ;;  %v999_v40 = vadd.f32 %v8469_v18, %v916_v20  ;;  %v8470_v26 = vld [vmem:[#allocation4_spill] sm:$0xff]  ;;  %v1567_v29 = vld [vmem:[%s8417_s5 + $0x500] sm:$0xff] }
 0x1c7   :  { %4582 = vmatpush.msra.mxu2 %v1023_v25  ;;  %v907_v43 = vadd.f32 %v8470_v26, %v824_v37  ;;  %v996_v25 = vadd.f32 %v8471_v47, %v913_v11  ;;  %v1569_v37 = vld [vmem:[%s8417_s5 + $0x510] sm:$0xff]  ;;  %v1059_v26 = vld [vmem:[%s8419_s4 + $0x20] sm:$0xff] }
 0x1c8   :  { %2997 = vmatpush.msra.mxu0 %v1020_v5 }
 0x1c9   :  { %4583 = vmatpush.msra.mxu2 %v1020_v5  ;;  %v5936_v28 = vpop.f32.mrf.mxu2  ;;  %v5999_v8 = vpop.permute.xlu1 %1765  ;;  %v993_v5 = vadd.f32 %v8472_v21, %v910_v39  ;;  %v990_v16 = vadd.f32 %v8473_v44, %v907_v43  ;;  %v1235_v43 = vld [vmem:[%s8419_s4 + $0x5a0] sm:$0xff] }
 0x1ca   :  { %v5938_v14 = vpop.f32.mrf.mxu3  ;;  %2998 = vmatpush.msra.mxu0 %v1017_v31  ;;  %v5944_v46 = vpop.f32.mrf.mxu0 }
 0x1cb   :  { %4584 = vmatpush.msra.mxu2 %v1017_v31  ;;  %v5946_v45 = vpop.f32.mrf.mxu1 }
 0x1cc   :  { %2340 = vperm.xlu2 %4603, %v1558_v22   ;;  %2999 = vmatpush.msra.mxu0 %v1014_v58  ;;  %v6007_v22 = vpop.permute.xlu0 %1775  ;;  %v878_v21 = vadd.f32 %v5946_v45, %v5944_v46  ;;  %v1573_v46 = vld [vmem:[%s8417_s5 + $0x530] sm:$0xff]  ;;  %v872_v45 = vadd.f32 %v5883_v6, %v5881_v62 }
 0x1cd   :  { %4585 = vmatpush.msra.mxu2 %v1014_v58  ;;  %2335 = vperm.xlu1 %4602, %v1557_v48   ;;  %v1563_v58 = vld [vmem:[%s8417_s5 + $0x4e0] sm:$0xff]  ;;  %v1562_v48 = vld [vmem:[%s8417_s5 + $0x4d8] sm:$0xff]  ;;  %v1061_v62 = vld [vmem:[%s8419_s4 + $0x30] sm:$0xff] }
 0x1ce   :  { %2330 = vperm.xlu0 %4601, %v1556_v12   ;;  %3000 = vmatpush.msra.mxu0 %v1011_v61  ;;  %v6022_v49 = vpop.permute.xlu2 %1785  ;;  %v1237_v6 = vld [vmem:[%s8419_s4 + $0x5b0] sm:$0xff] }
 0x1cf   :  { %4586 = vmatpush.msra.mxu2 %v1011_v61  ;;  %v1231_v61 = vld [vmem:[%s8419_s4 + $0x580] sm:$0xff] }
 0x1d0   :  { %3001 = vmatpush.msra.mxu0 %v1008_v51 }
 0x1d1   :  { %4587 = vmatpush.msra.mxu2 %v1008_v51  ;;  %v5975_v59 = vpop.f32.mrf.mxu2  ;;  %v6027_v20 = vpop.permute.xlu1 %1780 }
 0x1d2   :  { %v5977_v17 = vpop.f32.mrf.mxu3  ;;  %3002 = vmatpush.msra.mxu0 %v1005_v57  ;;  %v5983_v60 = vpop.f32.mrf.mxu0 }
 0x1d3   :  { %4588 = vmatpush.msra.mxu2 %v1005_v57  ;;  %v5985_v30 = vpop.f32.mrf.mxu1  ;;  %v1566_v57 = vld [vmem:[%s8417_s5 + $0x4f8] sm:$0xff] }
 0x1d4   :  { %2355 = vperm.xlu2 %4603, %v1561_v42   ;;  %3003 = vmatpush.msra.mxu0 %v1002_v55  ;;  %v1565_v42 = vld [vmem:[%s8417_s5 + $0x4f0] sm:$0xff]  ;;  %v6041_v50 = vpop.permute.xlu0 %1790  ;;  %v881_v39 = vadd.f32 %v5985_v30, %v5983_v60  ;;  %v961_v30 = vadd.f32 %v5975_v59, %v878_v21  ;;  %v1062_v21 = vld [vmem:[%s8419_s4 + $0x38] sm:$0xff] }
 0x1d5   :  { %4589 = vmatpush.msra.mxu2 %v1002_v55  ;;  %2350 = vperm.xlu1 %4602, %v1560_v54   ;;  %v1570_v54 = vld [vmem:[%s8417_s5 + $0x518] sm:$0xff] }
 0x1d6   :  { %2345 = vperm.xlu0 %4601, %v1559_v4   ;;  %3004 = vmatpush.msra.mxu0 %v999_v40  ;;  %v6043_v13 = vpop.permute.xlu2 %1800 }
 0x1d7   :  { %4590 = vmatpush.msra.mxu2 %v999_v40 }
 0x1d8   :  { %3005 = vmatpush.msra.mxu0 %v996_v25 }
 0x1d9   :  { %4591 = vmatpush.msra.mxu2 %v996_v25  ;;  %v963_v10 = vpop.f32.mrf.mxu2  ;;  %v6062_v47 = vpop.permute.xlu1 %1795 }
 0x1da   :  { %v6005_v31 = vpop.f32.mrf.mxu3  ;;  %3006 = vmatpush.msra.mxu0 %v993_v5  ;;  %v800_v12 = vpop.f32.mrf.mxu0 }
 0x1db   :  { %4592 = vmatpush.msra.mxu2 %v993_v5  ;;  %v883_v7 = vpop.f32.mrf.mxu1  ;;  %v964_v5 = vadd.f32 %v963_v10, %v881_v39  ;;  %v1044_v10 = vadd.f32 %v5977_v17, %v961_v30  ;;  %v1581_v39 = vld [vmem:[%s8417_s5 + $0x570] sm:$0xff] }
 0x1dc   :  { %2370 = vperm.xlu2 %4603, %v1564_v9   ;;  %3007 = vmatpush.msra.mxu0 %v990_v16  ;;  %v884_v4 = vadd.f32 %v883_v7, %v800_v12  ;;  %v6066_v60 = vpop.permute.xlu0 %1805  ;;  %v1056_v12 = vld [vmem:[%s8419_s4 + $0x8] sm:$0xff] }
 0x1dd   :  { %4593 = vmatpush.msra.mxu2 %v990_v16  ;;  %2365 = vperm.xlu1 %4602, %v1563_v58   ;;  %v875_v16 = vadd.f32 %v5907_v33, %v5905_v53  ;;  %v1047_v58 = vadd.f32 %v6005_v31, %v964_v5  ;;  %v1572_v53 = vld [vmem:[%s8417_s5 + $0x528] sm:$0xff]  ;;  %v1571_v33 = vld [vmem:[%s8417_s5 + $0x520] sm:$0xff]  ;;  %v955_v31 = vadd.f32 %v5897_v23, %v872_v45  ;;  %v1238_v5 = vld [vmem:[%s8419_s4 + $0x5b8] sm:$0xff] }
 0x1de   :  { %2360 = vperm.xlu0 %4601, %v1562_v48   ;;  %3008 = vmatmul.f32.vlgmr.msra.gmra.mxu0 %v1055_v32  ;;  %v6069_v44 = vpop.permute.xlu2 %1815  ;;  %v1232_v7 = vld [vmem:[%s8419_s4 + $0x588] sm:$0xff] }
 0x1df   :  { %3272 = vmatmul.f32.vlgmr.msra.gmra.mxu2 %v1231_v61  ;;  %v958_v59 = vadd.f32 %v5936_v28, %v875_v16  ;;  %v1038_v48 = vadd.f32 %v5899_v3, %v955_v31  ;;  %v1575_v3 = vld [vmem:[%s8417_s5 + $0x540] sm:$0xff]  ;;  %v1574_v61 = vld [vmem:[%s8417_s5 + $0x538] sm:$0xff]  ;;  %v1245_v16 = vld [vmem:[%s8419_s4 + $0x5f0] sm:$0xff] }
 0x1e0   :  { %v1064_v45 = vld [vmem:[%s8419_s4 + $0x48] sm:$0xff] }
 0x1e1   :  { %v966_v51 = vpop.f32.mrf.mxu2  ;;  %v6094_v28 = vpop.permute.xlu1 %1810  ;;  %v1041_v17 = vadd.f32 %v5938_v14, %v958_v59  ;;  %v1576_v14 = vld [vmem:[%s8417_s5 + $0x548] sm:$0xff] }
 0x1e2   :  { %v1049_v35 = vpop.f32.mrf.mxu3  ;;  %v803_v63 = vpop.f32.mrf.mxu0  ;;  %v967_v18 = vadd.f32 %v966_v51, %v884_v4  ;;  %v1239_v51 = vld [vmem:[%s8419_s4 + $0x5c0] sm:$0xff]  ;;  %v1241_v4 = vld [vmem:[%s8419_s4 + $0x5d0] sm:$0xff]  ;;  %v1240_v59 = vld [vmem:[%s8419_s4 + $0x5c8] sm:$0xff] }
 0x1e3   :  { %v886_v11 = vpop.f32.mrf.mxu1 }
 0x1e4   :  { %2385 = vperm.xlu2 %4603, %v1567_v29   ;;  %v887_v55 = vadd.f32 %v886_v11, %v803_v63  ;;  %v1050_v9 = vadd.f32 %v1049_v35, %v967_v18  ;;  %v6097_v23 = vpop.permute.xlu0 %1820  ;;  %v1063_v29 = vld [vmem:[%s8419_s4 + $0x40] sm:$0xff]  ;;  %v1578_v63 = vld [vmem:[%s8417_s5 + $0x558] sm:$0xff]  ;;  %v1577_v11 = vld [vmem:[%s8417_s5 + $0x550] sm:$0xff] }
 0x1e5   :  { %2380 = vperm.xlu1 %4602, %v1566_v57   ;;  %v1058_v57 = vld [vmem:[%s8419_s4 + $0x18] sm:$0xff]  ;;  %v1580_v18 = vld [vmem:[%s8417_s5 + $0x568] sm:$0xff] }
 0x1e6   :  { %2375 = vperm.xlu0 %4601, %v1565_v42   ;;  %3011 = vmatmul.f32.gmra.mxu0 %v1057_v56  ;;  %v6109_v32 = vpop.permute.xlu2 %1830  ;;  %v1234_v42 = vld [vmem:[%s8419_s4 + $0x598] sm:$0xff]  ;;  %v1579_v56 = vld [vmem:[%s8417_s5 + $0x560] sm:$0xff] }
 0x1e7   :  { %3275 = vmatmul.f32.gmra.mxu2 %v1233_v52 }
 0x1e9   :  { %v969_v1 = vpop.f32.mrf.mxu2  ;;  %v6125_v35 = vpop.permute.xlu1 %1825 }
 0x1ea   :  { %v970_v36 = vadd.f32 %v969_v1, %v887_v55  ;;  %v1052_v40 = vpop.f32.mrf.mxu3  ;;  %v1060_v1 = vld [vmem:[%s8419_s4 + $0x28] sm:$0xff] }
 0x1ec   :  { %2400 = vperm.xlu2 %4603, %v1570_v54   ;;  %v1053_v25 = vadd.f32 %v1052_v40, %v970_v36  ;;  %v6136_v52 = vpop.permute.xlu0 %1835  ;;  %v1065_v54 = vld [vmem:[%s8419_s4 + $0x50] sm:$0xff]  ;;  %v1236_v36 = vld [vmem:[%s8419_s4 + $0x5a8] sm:$0xff] }
 0x1ed   :  { %2395 = vperm.xlu1 %4602, %v1569_v37   ;;  %v1582_v37 = vld [vmem:[%s8417_s5 + $0x578] sm:$0xff] }
 0x1ee   :  { %2390 = vperm.xlu0 %4601, %v1568_v41   ;;  %3014 = vmatmul.f32.gmra.mxu0 %v1059_v26  ;;  %v6146_v55 = vpop.permute.xlu2 %1845  ;;  %v1067_v26 = vld [vmem:[%s8419_s4 + $0x60] sm:$0xff] }
 0x1ef   :  { %3278 = vmatmul.f32.gmra.mxu2 %v1235_v43  ;;  %3547 = vmatpush.msra.mxu1 %v1053_v25  ;;  %v1243_v43 = vld [vmem:[%s8419_s4 + $0x5e0] sm:$0xff] }
 0x1f0   :  { %4594 = vmatpush.msra.mxu3 %v1053_v25 }
 0x1f1   :  { %3548 = vmatpush.msra.mxu1 %v1050_v9  ;;  %v6163_v41 = vpop.permute.xlu1 %1840 }
 0x1f2   :  { %4595 = vmatpush.msra.mxu3 %v1050_v9  ;;  %v1069_v9 = vld [vmem:[%s8419_s4 + $0x70] sm:$0xff] }
 0x1f3   :  { %3549 = vmatpush.msra.mxu1 %v1047_v58 }
 0x1f4   :  { %4596 = vmatpush.msra.mxu3 %v1047_v58  ;;  %2415 = vperm.xlu2 %4603, %v1573_v46   ;;  %v6173_v40 = vpop.permute.xlu0 %1850 }
 0x1f5   :  { %3550 = vmatpush.msra.mxu1 %v1044_v10  ;;  %2410 = vperm.xlu1 %4602, %v1572_v53   ;;  %v1247_v53 = vld [vmem:[%s8419_s4 + $0x600] sm:$0xff] }
 0x1f6   :  { %4597 = vmatpush.msra.mxu3 %v1044_v10  ;;  %2405 = vperm.xlu0 %4601, %v1571_v33   ;;  %v6181_v25 = vpop.permute.xlu2 %1860  ;;  %v1071_v10 = vld [vmem:[%s8419_s4 + $0x80] sm:$0xff] }
 0x1f7   :  { %3017 = vmatmul.f32.gmra.mxu0 %v1061_v62  ;;  %3281 = vmatmul.f32.gmra.mxu2 %v1237_v6  ;;  %v1066_v62 = vld [vmem:[%s8419_s4 + $0x58] sm:$0xff] }
 0x1f8   :  { %3551 = vmatpush.msra.mxu1 %v1041_v17  ;;  %4598 = vmatpush.msra.mxu3 %v1041_v17  ;;  %v1242_v6 = vld [vmem:[%s8419_s4 + $0x5d8] sm:$0xff] }
 0x1f9   :  { %v6191_v30 = vpop.permute.xlu1 %1855 }
 0x1fa   :  { %3552 = vmatpush.msra.mxu1 %v1038_v48  ;;  %4599 = vmatpush.msra.mxu3 %v1038_v48  ;;  %v1073_v48 = vld [vmem:[%s8419_s4 + $0x90] sm:$0xff] }
 0x1fb   :  { %4383 = vmatmul.msk.f32.vlgmr.msra.gmra.mxu1 %vm2463_vm1, %v1056_v12  ;;  %4471 = vmatmul.msk.f32.vlgmr.msra.gmra.mxu3 %vm2463_vm1, %v1232_v7  ;;  %v1249_v12 = vld [vmem:[%s8419_s4 + $0x610] sm:$0xff] }
 0x1fc   :  { %2430 = vperm.xlu2 %4603, %v1576_v14   ;;  %v6199_v58 = vpop.permute.xlu0 %1865  ;;  %v1068_v14 = vld [vmem:[%s8419_s4 + $0x68] sm:$0xff] }
 0x1fd   :  { %2425 = vperm.xlu1 %4602, %v1575_v3   ;;  %v1244_v3 = vld [vmem:[%s8419_s4 + $0x5e8] sm:$0xff] }
 0x1fe   :  { %2420 = vperm.xlu0 %4601, %v1574_v61   ;;  %v6201_v46 = vpop.permute.xlu2 %1875 }
 0x1ff   :  { %3020 = vmatmul.f32.gmra.mxu0 %v1063_v29  ;;  %3284 = vmatmul.f32.gmra.mxu2 %v1239_v51  ;;  %v1075_v51 = vld [vmem:[%s8419_s4 + $0xa0] sm:$0xff] }
 0x201   :  { %v6217_v33 = vpop.permute.xlu1 %1870 }
 0x203   :  { %4384 = vmatmul.msk.f32.gmra.mxu1 %vm2463_vm1, %v1058_v57  ;;  %4472 = vmatmul.msk.f32.gmra.mxu3 %vm2463_vm1, %v1234_v42  ;;  %v1251_v57 = vld [vmem:[%s8419_s4 + $0x620] sm:$0xff]  ;;  %v1070_v42 = vld [vmem:[%s8419_s4 + $0x78] sm:$0xff] }
 0x204   :  { %2445 = vperm.xlu2 %4603, %v1579_v56   ;;  %v6219_v31 = vpop.permute.xlu0 %1880  ;;  %v1246_v56 = vld [vmem:[%s8419_s4 + $0x5f8] sm:$0xff] }
 0x205   :  { %2440 = vperm.xlu1 %4602, %v1578_v63  }
 0x206   :  { %2435 = vperm.xlu0 %4601, %v1577_v11   ;;  %v6227_v17 = vpop.permute.xlu2 %1890 }
 0x207   :  { %3023 = vmatmul.f32.gmra.mxu0 %v1065_v54  ;;  %3287 = vmatmul.f32.gmra.mxu2 %v1241_v4  ;;  %v1077_v54 = vld [vmem:[%s8419_s4 + $0xb0] sm:$0xff] }
 0x208   :  { %v1253_v4 = vld [vmem:[%s8419_s4 + $0x630] sm:$0xff] }
 0x209   :  { %v6237_v7 = vpop.permute.xlu1 %1885 }
 0x20b   :  { %4385 = vmatmul.msk.f32.gmra.mxu1 %vm2463_vm1, %v1060_v1  ;;  %4473 = vmatmul.msk.f32.gmra.mxu3 %vm2463_vm1, %v1236_v36  ;;  %v1072_v36 = vld [vmem:[%s8419_s4 + $0x88] sm:$0xff] }
 0x20c   :  { %2460 = vperm.xlu2 %4603, %v1582_v37   ;;  %v6245_v61 = vpop.permute.xlu0 %1895  ;;  %v1248_v37 = vld [vmem:[%s8419_s4 + $0x608] sm:$0xff] }
 0x20d   :  { %2455 = vperm.xlu1 %4602, %v1581_v39  }
 0x20e   :  { %2450 = vperm.xlu0 %4601, %v1580_v18   ;;  %v6249_v29 = vpop.permute.xlu2 %1905  ;;  %v1079_v18 = vld [vmem:[%s8419_s4 + $0xc0] sm:$0xff] }
 0x20f   :  { %3026 = vmatmul.f32.gmra.mxu0 %v1067_v26  ;;  %3290 = vmatmul.f32.gmra.mxu2 %v1243_v43  ;;  %v1255_v26 = vld [vmem:[%s8419_s4 + $0x640] sm:$0xff] }
 0x211   :  { %v6263_v63 = vpop.permute.xlu1 %1900 }
 0x213   :  { %4386 = vmatmul.msk.f32.gmra.mxu1 %vm2463_vm1, %v1062_v21  ;;  %4474 = vmatmul.msk.f32.gmra.mxu3 %vm2463_vm1, %v1238_v5  ;;  %v1074_v5 = vld [vmem:[%s8419_s4 + $0x98] sm:$0xff] }
 0x214   :  { %v6267_v11 = vpop.permute.xlu0 %1910 }
 0x216   :  { %v6275_v1 = vpop.permute.xlu2 %1920 }
 0x217   :  { %3029 = vmatmul.f32.gmra.mxu0 %v1069_v9  ;;  %3293 = vmatmul.f32.gmra.mxu2 %v1245_v16  ;;  %v1250_v9 = vld [vmem:[%s8419_s4 + $0x618] sm:$0xff]  ;;  %v1081_v16 = vld [vmem:[%s8419_s4 + $0xd0] sm:$0xff] }
 0x219   :  { %v6285_v39 = vpop.permute.xlu1 %1915 }
 0x21b   :  { %4387 = vmatmul.msk.f32.gmra.mxu1 %vm2463_vm1, %v1064_v45  ;;  %4475 = vmatmul.msk.f32.gmra.mxu3 %vm2463_vm1, %v1240_v59  ;;  %v1257_v45 = vld [vmem:[%s8419_s4 + $0x650] sm:$0xff] }
 0x21c   :  { %v6293_v43 = vpop.permute.xlu0 %1925 }
 0x21e   :  { %v6295_v21 = vpop.permute.xlu2 %1935 }
 0x21f   :  { %3032 = vmatmul.f32.gmra.mxu0 %v1071_v10  ;;  %3296 = vmatmul.f32.gmra.mxu2 %v1247_v53  ;;  %v1076_v53 = vld [vmem:[%s8419_s4 + $0xa8] sm:$0xff] }
 0x221   :  { %v6311_v59 = vpop.permute.xlu1 %1930 }
 0x223   :  { %4388 = vmatmul.msk.f32.gmra.mxu1 %vm2463_vm1, %v1066_v62  ;;  %4476 = vmatmul.msk.f32.gmra.mxu3 %vm2463_vm1, %v1242_v6  ;;  %v1252_v62 = vld [vmem:[%s8419_s4 + $0x628] sm:$0xff] }
 0x224   :  { %v6313_v10 = vpop.permute.xlu0 %1940 }
 0x226   :  { %v6321_v6 = vpop.permute.xlu2 %1950 }
 0x227   :  { %3035 = vmatmul.f32.gmra.mxu0 %v1073_v48  ;;  %3299 = vmatmul.f32.gmra.mxu2 %v1249_v12  ;;  %v1083_v48 = vld [vmem:[%s8419_s4 + $0xe0] sm:$0xff] }
 0x228   :  { %v1259_v12 = vld [vmem:[%s8419_s4 + $0x660] sm:$0xff] }
 0x22b   :  { %4389 = vmatmul.msk.f32.gmra.mxu1 %vm2463_vm1, %v1068_v14  ;;  %4477 = vmatmul.msk.f32.gmra.mxu3 %vm2463_vm1, %v1244_v3  ;;  %v6331_v14 = vpop.permute.xlu1 %1945  ;;  %v1078_v3 = vld [vmem:[%s8419_s4 + $0xb8] sm:$0xff] }
 0x22f   :  { %3038 = vmatmul.f32.gmra.mxu0 %v1075_v51  ;;  %3302 = vmatmul.f32.gmra.mxu2 %v1251_v57  ;;  %v1254_v51 = vld [vmem:[%s8419_s4 + $0x638] sm:$0xff]  ;;  %v6339_v57 = vpop.permute.xlu0 %1955 }
 0x230   :  { %8474 = vst [vmem:[#allocation6_spill] sm:$0xff] %v6339_v57  ;;  %v1266_v57 = vld [vmem:[%s8419_s4 + $0x698] sm:$0xff] }
 0x233   :  { %4390 = vmatmul.msk.f32.gmra.mxu1 %vm2463_vm1, %v1070_v42  ;;  %4478 = vmatmul.msk.f32.gmra.mxu3 %vm2463_vm1, %v1246_v56  ;;  %v6343_v42 = vpop.permute.xlu2 %1965  ;;  %v1085_v56 = vld [vmem:[%s8419_s4 + $0xf0] sm:$0xff] }
 0x234   :  { %8475 = vst [vmem:[#allocation7_spill] sm:$0xff] %v6343_v42 }
 0x237   :  { %3041 = vmatmul.f32.gmra.mxu0 %v1077_v54  ;;  %3305 = vmatmul.f32.gmra.mxu2 %v1253_v4  ;;  %v1261_v54 = vld [vmem:[%s8419_s4 + $0x670] sm:$0xff]  ;;  %v1080_v4 = vld [vmem:[%s8419_s4 + $0xc8] sm:$0xff] }
 0x23b   :  { %4391 = vmatmul.msk.f32.gmra.mxu1 %vm2463_vm1, %v1072_v36  ;;  %4479 = vmatmul.msk.f32.gmra.mxu3 %vm2463_vm1, %v1248_v37  ;;  %v1256_v36 = vld [vmem:[%s8419_s4 + $0x648] sm:$0xff]  ;;  %v6357_v37 = vpop.permute.xlu1 %1960 }
 0x23c   :  { %8476 = vst [vmem:[#allocation11_spill] sm:$0xff] %v6357_v37 }
 0x23f   :  { %3044 = vmatmul.f32.gmra.mxu0 %v1079_v18  ;;  %3308 = vmatmul.f32.gmra.mxu2 %v1255_v26  ;;  %v6361_v26 = vpop.permute.xlu0 %1970 }
 0x240   :  { %8477 = vst [vmem:[#allocation17_spill] sm:$0xff] %v6361_v26 }
 0x243   :  { %4392 = vmatmul.msk.f32.gmra.mxu1 %vm2463_vm1, %v1074_v5  ;;  %4480 = vmatmul.msk.f32.gmra.mxu3 %vm2463_vm1, %v1250_v9  ;;  %v1087_v5 = vld [vmem:[%s8419_s4 + $0x100] sm:$0xff] }
 0x244   :  { %v1263_v9 = vld [vmem:[%s8419_s4 + $0x680] sm:$0xff] }
 0x247   :  { %3047 = vmatmul.f32.gmra.mxu0 %v1081_v16  ;;  %3311 = vmatmul.f32.gmra.mxu2 %v1257_v45  ;;  %v6369_v16 = vpop.permute.xlu2 %1980  ;;  %v1082_v45 = vld [vmem:[%s8419_s4 + $0xd8] sm:$0xff] }
 0x248   :  { %8478 = vst [vmem:[#allocation2_spill] sm:$0xff] %v6369_v16 }
 0x24b   :  { %4393 = vmatmul.msk.f32.gmra.mxu1 %vm2463_vm1, %v1076_v53  ;;  %4481 = vmatmul.msk.f32.gmra.mxu3 %vm2463_vm1, %v1252_v62  ;;  %v1258_v53 = vld [vmem:[%s8419_s4 + $0x658] sm:$0xff] }
 0x24f   :  { %3050 = vmatmul.f32.gmra.mxu0 %v1083_v48  ;;  %3314 = vmatmul.f32.gmra.mxu2 %v1259_v12  ;;  %v6379_v12 = vpop.permute.xlu1 %1975 }
 0x250   :  { %8479 = vst [vmem:[#allocation3_spill] sm:$0xff] %v6379_v12 }
 0x253   :  { %4394 = vmatmul.msk.f32.gmra.mxu1 %vm2463_vm1, %v1078_v3  ;;  %4482 = vmatmul.msk.f32.gmra.mxu3 %vm2463_vm1, %v1254_v51  ;;  %v1089_v3 = vld [vmem:[%s8419_s4 + $0x110] sm:$0xff] }
 0x254   :  { %v1265_v51 = vld [vmem:[%s8419_s4 + $0x690] sm:$0xff] }
 0x257   :  { %3053 = vmatmul.f32.gmra.mxu0 %v1085_v56  ;;  %3317 = vmatmul.f32.gmra.mxu2 %v1261_v54  ;;  %v6387_v56 = vpop.permute.xlu0 %1985  ;;  %v6389_v54 = vpop.permute.xlu2 %1995 }
 0x258   :  { %8480 = vst [vmem:[#allocation8_spill] sm:$0xff] %v6387_v56 }
 0x259   :  { %8481 = vst [vmem:[#allocation14_spill] sm:$0xff] %v6389_v54 }
 0x25b   :  { %4395 = vmatmul.msk.f32.gmra.mxu1 %vm2463_vm1, %v1080_v4  ;;  %4483 = vmatmul.msk.f32.gmra.mxu3 %vm2463_vm1, %v1256_v36  ;;  %v3009_v18 = vpop.f32.mrf.mxu0  ;;  %v1084_v4 = vld [vmem:[%s8419_s4 + $0xe8] sm:$0xff] }
 0x25c   :  { %v1260_v36 = vld [vmem:[%s8419_s4 + $0x668] sm:$0xff] }
 0x25f   :  { %3056 = vmatmul.f32.gmra.mxu0 %v1087_v5  ;;  %3320 = vmatmul.f32.gmra.mxu2 %v1263_v9  ;;  %v6417_v56 = vpop.permute.xlu2 %2010 }
 0x260   :  { %8484 = vst [vmem:[#allocation9_spill] sm:$0xff] %v6417_v56 }
 0x262   :  { %v3273_v62 = vpop.f32.mrf.mxu2 }
 0x263   :  { %4396 = vmatmul.msk.f32.gmra.mxu1 %vm2463_vm1, %v1082_v45  ;;  %4484 = vmatmul.msk.f32.gmra.mxu3 %vm2463_vm1, %v1258_v53  ;;  %v3012_v48 = vpop.f32.mrf.mxu0  ;;  %v1091_v45 = vld [vmem:[%s8419_s4 + $0x120] sm:$0xff] }
 0x264   :  { %v1267_v53 = vld [vmem:[%s8419_s4 + $0x6a0] sm:$0xff] }
 0x267   :  { %3059 = vmatmul.f32.gmra.mxu0 %v1089_v3  ;;  %3323 = vmatmul.f32.gmra.mxu2 %v1265_v51  ;;  %v6405_v3 = vpop.permute.xlu1 %1990  ;;  %v6407_v51 = vpop.permute.xlu0 %2000 }
 0x268   :  { %8482 = vst [vmem:[#allocation4_spill] sm:$0xff] %v6405_v3  ;;  %v8485_v3 = vld [vmem:[#allocation13_spill] sm:$0xff] }
 0x269   :  { %8483 = vst [vmem:[#allocation12_spill] sm:$0xff] %v6407_v51  ;;  %v1269_v51 = vld [vmem:[%s8419_s4 + $0x6b0] sm:$0xff]  ;;  %v3010_v16 = vadd.f32 %v3009_v18, %v8485_v3  ;;  %v2026_v18 = vpop.permute.xlu2 %2025 }
 0x26a   :  { %v3276_v5 = vpop.f32.mrf.mxu2 }
 0x26b   :  { %4397 = vmatmul.msk.f32.gmra.mxu1 %vm2463_vm1, %v1084_v4  ;;  %4485 = vmatmul.msk.f32.gmra.mxu3 %vm2463_vm1, %v1260_v36  ;;  %v3015_v9 = vpop.f32.mrf.mxu0  ;;  %v1086_v4 = vld [vmem:[%s8419_s4 + $0xf8] sm:$0xff] }
 0x26c   :  { %v1262_v36 = vld [vmem:[%s8419_s4 + $0x678] sm:$0xff] }
 0x26f   :  { %3062 = vmatmul.f32.gmra.mxu0 %v1091_v45  ;;  %3326 = vmatmul.f32.gmra.mxu2 %v1267_v53  ;;  %v1093_v53 = vld [vmem:[%s8419_s4 + $0x130] sm:$0xff]  ;;  %v6430_v12 = vpop.permute.xlu1 %2005  ;;  %v6438_v42 = vpop.permute.xlu0 %2015 }
 0x270   :  { %8486 = vst [vmem:[#allocation5_spill] sm:$0xff] %v6430_v12 }
 0x271   :  { %8487 = vst [vmem:[#allocation13_spill] sm:$0xff] %v6438_v42  ;;  %v8488_v42 = vld [vmem:[#allocation10_spill] sm:$0xff] }
 0x272   :  { %v6415_v54 = vpop.f32.mrf.mxu2  ;;  %v3013_v12 = vadd.f32 %v3012_v48, %v8488_v42 }
 0x273   :  { %4398 = vmatmul.msk.f32.gmra.mxu1 %vm2463_vm1, %v1086_v4  ;;  %4486 = vmatmul.msk.f32.gmra.mxu3 %vm2463_vm1, %v1262_v36  ;;  %v1088_v4 = vld [vmem:[%s8419_s4 + $0x108] sm:$0xff] }
 0x274   :  { %v6421_v45 = vpop.f32.mrf.mxu0  ;;  %v1264_v36 = vld [vmem:[%s8419_s4 + $0x688] sm:$0xff] }
 0x277   :  { %3065 = vmatmul.f32.gmra.mxu0 %v1093_v53  ;;  %3329 = vmatmul.f32.gmra.mxu2 %v1269_v51  ;;  %v3274_v51 = vadd.f32 %v3273_v62, %v2026_v18  ;;  %v6467_v18 = vpop.permute.xlu1 %2020  ;;  %v2031_v48 = vpop.permute.xlu0 %2030 }
 0x278   :  { %v3554_v56 = vpop.f32.mrf.mxu1  ;;  %8489 = vst [vmem:[#allocation10_spill] sm:$0xff] %v6467_v18 }
 0x279   :  { %v3555_v26 = vadd.f32 %v3554_v56, %v3010_v16  ;;  %v1095_v16 = vld [vmem:[%s8419_s4 + $0x140] sm:$0xff] }
 0x27a   :  { %v6440_v37 = vpop.f32.mrf.mxu2  ;;  %v1271_v56 = vld [vmem:[%s8419_s4 + $0x6c0] sm:$0xff] }
 0x27b   :  { %4083 = vst.msk [vmem:[%s8420_s6] sm:$0xff] %vm4082_vm2, %v3555_v26  ;;  %4399 = vmatmul.msk.f32.gmra.mxu1 %vm2463_vm1, %v1088_v4  ;;  %4487 = vmatmul.msk.f32.gmra.mxu3 %vm2463_vm1, %v1264_v36  ;;  %v1090_v36 = vld [vmem:[%s8419_s4 + $0x118] sm:$0xff] }
 0x27c   :  { %v6448_v3 = vpop.f32.mrf.mxu0 }
 0x27e   :  { %v3818_v53 = vpop.f32.mrf.mxu3 }
 0x27f   :  { %v3819_v26 = vadd.f32 %v3818_v53, %v3274_v51  ;;  %3068 = vmatmul.f32.gmra.mxu0 %v1095_v16  ;;  %3332 = vmatmul.f32.gmra.mxu2 %v1271_v56  ;;  %v1097_v56 = vld [vmem:[%s8419_s4 + $0x150] sm:$0xff]  ;;  %v3277_v51 = vadd.f32 %v3276_v5, %v2031_v48 }
 0x280   :  { %v3557_v4 = vpop.f32.mrf.mxu1 }
 0x281   :  { %4171 = vst.msk [vmem:[%s8420_s6 + $0x2c0] sm:$0xff] %vm4082_vm2, %v3819_v26  ;;  %v3558_v62 = vadd.f32 %v3557_v4, %v3013_v12  ;;  %v1273_v12 = vld [vmem:[%s8419_s4 + $0x6d0] sm:$0xff] }
 0x282   :  { %v6469_v42 = vpop.f32.mrf.mxu2  ;;  %v8490_v26 = vld [vmem:[#allocation16_spill] sm:$0xff] }
 0x283   :  { %4084 = vst.msk [vmem:[%s8420_s6 + $0x8] sm:$0xff] %vm4082_vm2, %v3558_v62  ;;  %4400 = vmatmul.msk.f32.gmra.mxu1 %vm2463_vm1, %v1090_v36  ;;  %4488 = vmatmul.msk.f32.gmra.mxu3 %vm2463_vm1, %v1266_v57  ;;  %v3016_v4 = vadd.f32 %v3015_v9, %v8490_v26  ;;  %v1092_v57 = vld [vmem:[%s8419_s4 + $0x128] sm:$0xff]  ;;  %v2036_v9 = vpop.permute.xlu1 %2035  ;;  %v8491_v26 = vld [vmem:[#allocation18_spill] sm:$0xff] }
 0x284   :  { %v3024_v16 = vpop.f32.mrf.mxu0  ;;  %v1268_v62 = vld [vmem:[%s8419_s4 + $0x6a8] sm:$0xff] }
 0x286   :  { %v3821_v53 = vpop.f32.mrf.mxu3 }
 0x287   :  { %v3822_v18 = vadd.f32 %v3821_v53, %v3277_v51  ;;  %3071 = vmatmul.f32.gmra.mxu0 %v1097_v56  ;;  %3335 = vmatmul.f32.gmra.mxu2 %v1273_v12  ;;  %v1099_v12 = vld [vmem:[%s8419_s4 + $0x160] sm:$0xff]  ;;  %v3280_v51 = vadd.f32 %v6415_v54, %v2036_v9 }
 0x288   :  { %v3560_v36 = vpop.f32.mrf.mxu1 }
 0x289   :  { %4172 = vst.msk [vmem:[%s8420_s6 + $0x2c8] sm:$0xff] %vm4082_vm2, %v3822_v18  ;;  %v3561_v5 = vadd.f32 %v3560_v36, %v3016_v4  ;;  %v1275_v18 = vld [vmem:[%s8419_s4 + $0x6e0] sm:$0xff]  ;;  %v3019_v4 = vadd.f32 %v6421_v45, %v8491_v26  ;;  %v2041_v45 = vpop.permute.xlu2 %2040 }
 0x28a   :  { %v6494_v48 = vpop.f32.mrf.mxu2 }
 0x28b   :  { %4085 = vst.msk [vmem:[%s8420_s6 + $0x10] sm:$0xff] %vm4082_vm2, %v3561_v5  ;;  %4401 = vmatmul.msk.f32.gmra.mxu1 %vm2463_vm1, %v1092_v57  ;;  %4489 = vmatmul.msk.f32.gmra.mxu3 %vm2463_vm1, %v1268_v62  ;;  %v1094_v62 = vld [vmem:[%s8419_s4 + $0x138] sm:$0xff] }
 0x28c   :  { %v3027_v56 = vpop.f32.mrf.mxu0  ;;  %v1270_v5 = vld [vmem:[%s8419_s4 + $0x6b8] sm:$0xff] }
 0x28e   :  { %v3824_v53 = vpop.f32.mrf.mxu3 }
 0x28f   :  { %v3825_v36 = vadd.f32 %v3824_v53, %v3280_v51  ;;  %3074 = vmatmul.f32.gmra.mxu0 %v1099_v12  ;;  %3338 = vmatmul.f32.gmra.mxu2 %v1275_v18  ;;  %v1101_v18 = vld [vmem:[%s8419_s4 + $0x170] sm:$0xff]  ;;  %v3283_v53 = vadd.f32 %v6440_v37, %v2041_v45 }
 0x290   :  { %v3563_v57 = vpop.f32.mrf.mxu1  ;;  %v1277_v51 = vld [vmem:[%s8419_s4 + $0x6f0] sm:$0xff] }
 0x291   :  { %4173 = vst.msk [vmem:[%s8420_s6 + $0x2d0] sm:$0xff] %vm4082_vm2, %v3825_v36  ;;  %v3564_v54 = vadd.f32 %v3563_v57, %v3019_v4  ;;  %v8492_v4 = vld [vmem:[#allocation15_spill] sm:$0xff] }
 0x292   :  { %v6521_v9 = vpop.f32.mrf.mxu2  ;;  %v3022_v36 = vadd.f32 %v6448_v3, %v8492_v4  ;;  %v2046_v3 = vpop.permute.xlu0 %2045 }
 0x293   :  { %4086 = vst.msk [vmem:[%s8420_s6 + $0x18] sm:$0xff] %vm4082_vm2, %v3564_v54  ;;  %4402 = vmatmul.msk.f32.gmra.mxu1 %vm2463_vm1, %v1094_v62  ;;  %4490 = vmatmul.msk.f32.gmra.mxu3 %vm2463_vm1, %v1270_v5  ;;  %v1096_v5 = vld [vmem:[%s8419_s4 + $0x148] sm:$0xff] }
 0x294   :  { %v3030_v12 = vpop.f32.mrf.mxu0  ;;  %v1272_v54 = vld [vmem:[%s8419_s4 + $0x6c8] sm:$0xff] }
 0x296   :  { %v3827_v26 = vpop.f32.mrf.mxu3 }
 0x297   :  { %v3828_v57 = vadd.f32 %v3827_v26, %v3283_v53  ;;  %3077 = vmatmul.f32.gmra.mxu0 %v1101_v18  ;;  %3341 = vmatmul.f32.gmra.mxu2 %v1277_v51  ;;  %v1103_v51 = vld [vmem:[%s8419_s4 + $0x180] sm:$0xff]  ;;  %v3286_v26 = vadd.f32 %v6469_v42, %v2046_v3 }
 0x298   :  { %v3566_v62 = vpop.f32.mrf.mxu1  ;;  %v1279_v53 = vld [vmem:[%s8419_s4 + $0x700] sm:$0xff] }
 0x299   :  { %4174 = vst.msk [vmem:[%s8420_s6 + $0x2d8] sm:$0xff] %vm4082_vm2, %v3828_v57  ;;  %v3567_v37 = vadd.f32 %v3566_v62, %v3022_v36  ;;  %v8493_v36 = vld [vmem:[#allocation20_spill] sm:$0xff] }
 0x29a   :  { %v6548_v45 = vpop.f32.mrf.mxu2  ;;  %v3025_v57 = vadd.f32 %v3024_v16, %v8493_v36  ;;  %v2051_v16 = vpop.permute.xlu1 %2050 }
 0x29b   :  { %4087 = vst.msk [vmem:[%s8420_s6 + $0x20] sm:$0xff] %vm4082_vm2, %v3567_v37  ;;  %4403 = vmatmul.msk.f32.gmra.mxu1 %vm2463_vm1, %v1096_v5  ;;  %4491 = vmatmul.msk.f32.gmra.mxu3 %vm2463_vm1, %v1272_v54  ;;  %v1098_v54 = vld [vmem:[%s8419_s4 + $0x158] sm:$0xff] }
 0x29c   :  { %v3033_v18 = vpop.f32.mrf.mxu0  ;;  %v1274_v37 = vld [vmem:[%s8419_s4 + $0x6d8] sm:$0xff] }
 0x29e   :  { %v3830_v4 = vpop.f32.mrf.mxu3 }
 0x29f   :  { %v3831_v62 = vadd.f32 %v3830_v4, %v3286_v26  ;;  %3080 = vmatmul.f32.gmra.mxu0 %v1103_v51  ;;  %3344 = vmatmul.f32.gmra.mxu2 %v1279_v53  ;;  %v1105_v53 = vld [vmem:[%s8419_s4 + $0x190] sm:$0xff]  ;;  %v3289_v4 = vadd.f32 %v6494_v48, %v2051_v16 }
 0x2a0   :  { %v3569_v5 = vpop.f32.mrf.mxu1  ;;  %v1281_v26 = vld [vmem:[%s8419_s4 + $0x710] sm:$0xff] }
 0x2a1   :  { %4175 = vst.msk [vmem:[%s8420_s6 + $0x2e0] sm:$0xff] %vm4082_vm2, %v3831_v62  ;;  %v3570_v42 = vadd.f32 %v3569_v5, %v3025_v57  ;;  %v8494_v57 = vld [vmem:[#allocation21_spill] sm:$0xff] }
 0x2a2   :  { %v6574_v3 = vpop.f32.mrf.mxu2  ;;  %v3028_v62 = vadd.f32 %v3027_v56, %v8494_v57  ;;  %v2056_v56 = vpop.permute.xlu2 %2055 }
 0x2a3   :  { %4088 = vst.msk [vmem:[%s8420_s6 + $0x28] sm:$0xff] %vm4082_vm2, %v3570_v42  ;;  %4404 = vmatmul.msk.f32.gmra.mxu1 %vm2463_vm1, %v1098_v54  ;;  %4492 = vmatmul.msk.f32.gmra.mxu3 %vm2463_vm1, %v1274_v37  ;;  %v1100_v37 = vld [vmem:[%s8419_s4 + $0x168] sm:$0xff] }
 0x2a4   :  { %v3036_v51 = vpop.f32.mrf.mxu0  ;;  %v1276_v42 = vld [vmem:[%s8419_s4 + $0x6e8] sm:$0xff] }
 0x2a6   :  { %v3833_v36 = vpop.f32.mrf.mxu3 }
 0x2a7   :  { %v3834_v5 = vadd.f32 %v3833_v36, %v3289_v4  ;;  %3083 = vmatmul.f32.gmra.mxu0 %v1105_v53  ;;  %3347 = vmatmul.f32.gmra.mxu2 %v1281_v26  ;;  %v1107_v26 = vld [vmem:[%s8419_s4 + $0x1a0] sm:$0xff]  ;;  %v3292_v36 = vadd.f32 %v6521_v9, %v2056_v56 }
 0x2a8   :  { %v3572_v54 = vpop.f32.mrf.mxu1  ;;  %v1283_v4 = vld [vmem:[%s8419_s4 + $0x720] sm:$0xff] }
 0x2a9   :  { %4176 = vst.msk [vmem:[%s8420_s6 + $0x2e8] sm:$0xff] %vm4082_vm2, %v3834_v5  ;;  %v3573_v48 = vadd.f32 %v3572_v54, %v3028_v62  ;;  %v8495_v62 = vld [vmem:[#allocation19_spill] sm:$0xff] }
 0x2aa   :  { %v6600_v16 = vpop.f32.mrf.mxu2  ;;  %v3031_v5 = vadd.f32 %v3030_v12, %v8495_v62  ;;  %v2061_v12 = vpop.permute.xlu0 %2060 }
 0x2ab   :  { %4089 = vst.msk [vmem:[%s8420_s6 + $0x30] sm:$0xff] %vm4082_vm2, %v3573_v48  ;;  %4405 = vmatmul.msk.f32.gmra.mxu1 %vm2463_vm1, %v1100_v37  ;;  %4493 = vmatmul.msk.f32.gmra.mxu3 %vm2463_vm1, %v1276_v42  ;;  %v1102_v42 = vld [vmem:[%s8419_s4 + $0x178] sm:$0xff] }
 0x2ac   :  { %v3039_v53 = vpop.f32.mrf.mxu0  ;;  %v1278_v48 = vld [vmem:[%s8419_s4 + $0x6f8] sm:$0xff] }
 0x2ae   :  { %v3836_v57 = vpop.f32.mrf.mxu3 }
 0x2af   :  { %v3837_v54 = vadd.f32 %v3836_v57, %v3292_v36  ;;  %3086 = vmatmul.f32.gmra.mxu0 %v1107_v26  ;;  %3350 = vmatmul.f32.gmra.mxu2 %v1283_v4  ;;  %v1109_v4 = vld [vmem:[%s8419_s4 + $0x1b0] sm:$0xff]  ;;  %v3295_v57 = vadd.f32 %v6548_v45, %v2061_v12 }
 0x2b0   :  { %v3575_v37 = vpop.f32.mrf.mxu1  ;;  %v1285_v36 = vld [vmem:[%s8419_s4 + $0x730] sm:$0xff] }
 0x2b1   :  { %4177 = vst.msk [vmem:[%s8420_s6 + $0x2f0] sm:$0xff] %vm4082_vm2, %v3837_v54  ;;  %v3576_v9 = vadd.f32 %v3575_v37, %v3031_v5  ;;  %v8496_v5 = vld [vmem:[#allocation23_spill] sm:$0xff] }
 0x2b2   :  { %v6626_v56 = vpop.f32.mrf.mxu2  ;;  %v3034_v54 = vadd.f32 %v3033_v18, %v8496_v5  ;;  %v2066_v18 = vpop.permute.xlu1 %2065 }
 0x2b3   :  { %4090 = vst.msk [vmem:[%s8420_s6 + $0x38] sm:$0xff] %vm4082_vm2, %v3576_v9  ;;  %4406 = vmatmul.msk.f32.gmra.mxu1 %vm2463_vm1, %v1102_v42  ;;  %4494 = vmatmul.msk.f32.gmra.mxu3 %vm2463_vm1, %v1278_v48  ;;  %v1104_v48 = vld [vmem:[%s8419_s4 + $0x188] sm:$0xff] }
 0x2b4   :  { %v3042_v26 = vpop.f32.mrf.mxu0  ;;  %v1280_v9 = vld [vmem:[%s8419_s4 + $0x708] sm:$0xff] }
 0x2b6   :  { %v3839_v62 = vpop.f32.mrf.mxu3 }
 0x2b7   :  { %v3840_v37 = vadd.f32 %v3839_v62, %v3295_v57  ;;  %3089 = vmatmul.f32.gmra.mxu0 %v1109_v4  ;;  %3353 = vmatmul.f32.gmra.mxu2 %v1285_v36  ;;  %v1111_v36 = vld [vmem:[%s8419_s4 + $0x1c0] sm:$0xff]  ;;  %v3298_v62 = vadd.f32 %v6574_v3, %v2066_v18 }
 0x2b8   :  { %v3578_v42 = vpop.f32.mrf.mxu1  ;;  %v1287_v57 = vld [vmem:[%s8419_s4 + $0x740] sm:$0xff] }
 0x2b9   :  { %4178 = vst.msk [vmem:[%s8420_s6 + $0x2f8] sm:$0xff] %vm4082_vm2, %v3840_v37  ;;  %v3579_v45 = vadd.f32 %v3578_v42, %v3034_v54  ;;  %v8497_v54 = vld [vmem:[#allocation24_spill] sm:$0xff] }
 0x2ba   :  { %v6652_v12 = vpop.f32.mrf.mxu2  ;;  %v3037_v37 = vadd.f32 %v3036_v51, %v8497_v54  ;;  %v2071_v51 = vpop.permute.xlu2 %2070 }
 0x2bb   :  { %4091 = vst.msk [vmem:[%s8420_s6 + $0x40] sm:$0xff] %vm4082_vm2, %v3579_v45  ;;  %4407 = vmatmul.msk.f32.gmra.mxu1 %vm2463_vm1, %v1104_v48  ;;  %4495 = vmatmul.msk.f32.gmra.mxu3 %vm2463_vm1, %v1280_v9  ;;  %v1106_v9 = vld [vmem:[%s8419_s4 + $0x198] sm:$0xff] }
 0x2bc   :  { %v3045_v4 = vpop.f32.mrf.mxu0  ;;  %v1282_v45 = vld [vmem:[%s8419_s4 + $0x718] sm:$0xff] }
 0x2be   :  { %v3842_v5 = vpop.f32.mrf.mxu3 }
 0x2bf   :  { %v3843_v42 = vadd.f32 %v3842_v5, %v3298_v62  ;;  %3092 = vmatmul.f32.gmra.mxu0 %v1111_v36  ;;  %3356 = vmatmul.f32.gmra.mxu2 %v1287_v57  ;;  %v1113_v57 = vld [vmem:[%s8419_s4 + $0x1d0] sm:$0xff]  ;;  %v3301_v5 = vadd.f32 %v6600_v16, %v2071_v51 }
 0x2c0   :  { %v3581_v48 = vpop.f32.mrf.mxu1  ;;  %v1289_v62 = vld [vmem:[%s8419_s4 + $0x750] sm:$0xff] }
 0x2c1   :  { %4179 = vst.msk [vmem:[%s8420_s6 + $0x300] sm:$0xff] %vm4082_vm2, %v3843_v42  ;;  %v3582_v3 = vadd.f32 %v3581_v48, %v3037_v37  ;;  %v8498_v37 = vld [vmem:[#allocation22_spill] sm:$0xff] }
 0x2c2   :  { %v6678_v18 = vpop.f32.mrf.mxu2  ;;  %v3040_v42 = vadd.f32 %v3039_v53, %v8498_v37  ;;  %v2076_v53 = vpop.permute.xlu0 %2075 }
 0x2c3   :  { %4092 = vst.msk [vmem:[%s8420_s6 + $0x48] sm:$0xff] %vm4082_vm2, %v3582_v3  ;;  %4408 = vmatmul.msk.f32.gmra.mxu1 %vm2463_vm1, %v1106_v9  ;;  %4496 = vmatmul.msk.f32.gmra.mxu3 %vm2463_vm1, %v1282_v45  ;;  %v1108_v45 = vld [vmem:[%s8419_s4 + $0x1a8] sm:$0xff] }
 0x2c4   :  { %v3048_v36 = vpop.f32.mrf.mxu0  ;;  %v1284_v3 = vld [vmem:[%s8419_s4 + $0x728] sm:$0xff] }
 0x2c6   :  { %v3845_v54 = vpop.f32.mrf.mxu3 }
 0x2c7   :  { %v3846_v48 = vadd.f32 %v3845_v54, %v3301_v5  ;;  %3095 = vmatmul.f32.gmra.mxu0 %v1113_v57  ;;  %3359 = vmatmul.f32.gmra.mxu2 %v1289_v62  ;;  %v1115_v62 = vld [vmem:[%s8419_s4 + $0x1e0] sm:$0xff]  ;;  %v3304_v54 = vadd.f32 %v6626_v56, %v2076_v53 }
 0x2c8   :  { %v3584_v9 = vpop.f32.mrf.mxu1  ;;  %v1291_v5 = vld [vmem:[%s8419_s4 + $0x760] sm:$0xff] }
 0x2c9   :  { %4180 = vst.msk [vmem:[%s8420_s6 + $0x308] sm:$0xff] %vm4082_vm2, %v3846_v48  ;;  %v3585_v16 = vadd.f32 %v3584_v9, %v3040_v42  ;;  %v8499_v42 = vld [vmem:[#allocation26_spill] sm:$0xff] }
 0x2ca   :  { %v6704_v51 = vpop.f32.mrf.mxu2  ;;  %v3043_v48 = vadd.f32 %v3042_v26, %v8499_v42  ;;  %v2081_v26 = vpop.permute.xlu1 %2080 }
 0x2cb   :  { %4093 = vst.msk [vmem:[%s8420_s6 + $0x50] sm:$0xff] %vm4082_vm2, %v3585_v16  ;;  %4409 = vmatmul.msk.f32.gmra.mxu1 %vm2463_vm1, %v1108_v45  ;;  %4497 = vmatmul.msk.f32.gmra.mxu3 %vm2463_vm1, %v1284_v3  ;;  %v1110_v3 = vld [vmem:[%s8419_s4 + $0x1b8] sm:$0xff] }
 0x2cc   :  { %v3051_v57 = vpop.f32.mrf.mxu0  ;;  %v1286_v16 = vld [vmem:[%s8419_s4 + $0x738] sm:$0xff] }
 0x2ce   :  { %v3848_v37 = vpop.f32.mrf.mxu3 }
 0x2cf   :  { %v3849_v9 = vadd.f32 %v3848_v37, %v3304_v54  ;;  %3098 = vmatmul.f32.gmra.mxu0 %v1115_v62  ;;  %3362 = vmatmul.f32.gmra.mxu2 %v1291_v5  ;;  %v1117_v5 = vld [vmem:[%s8419_s4 + $0x1f0] sm:$0xff]  ;;  %v3307_v37 = vadd.f32 %v6652_v12, %v2081_v26 }
 0x2d0   :  { %v3587_v45 = vpop.f32.mrf.mxu1  ;;  %v1293_v54 = vld [vmem:[%s8419_s4 + $0x770] sm:$0xff] }
 0x2d1   :  { %4181 = vst.msk [vmem:[%s8420_s6 + $0x310] sm:$0xff] %vm4082_vm2, %v3849_v9  ;;  %v3588_v56 = vadd.f32 %v3587_v45, %v3043_v48  ;;  %v8500_v48 = vld [vmem:[#allocation27_spill] sm:$0xff] }
 0x2d2   :  { %v6730_v53 = vpop.f32.mrf.mxu2  ;;  %v3046_v9 = vadd.f32 %v3045_v4, %v8500_v48  ;;  %v2086_v4 = vpop.permute.xlu2 %2085 }
 0x2d3   :  { %4094 = vst.msk [vmem:[%s8420_s6 + $0x58] sm:$0xff] %vm4082_vm2, %v3588_v56  ;;  %4410 = vmatmul.msk.f32.gmra.mxu1 %vm2463_vm1, %v1110_v3  ;;  %4498 = vmatmul.msk.f32.gmra.mxu3 %vm2463_vm1, %v1286_v16  ;;  %v1112_v16 = vld [vmem:[%s8419_s4 + $0x1c8] sm:$0xff] }
 0x2d4   :  { %v3054_v62 = vpop.f32.mrf.mxu0  ;;  %v1288_v56 = vld [vmem:[%s8419_s4 + $0x748] sm:$0xff] }
 0x2d6   :  { %v3851_v42 = vpop.f32.mrf.mxu3 }
 0x2d7   :  { %v3852_v45 = vadd.f32 %v3851_v42, %v3307_v37  ;;  %3101 = vmatmul.f32.gmra.mxu0 %v1117_v5  ;;  %3365 = vmatmul.f32.gmra.mxu2 %v1293_v54  ;;  %v1119_v54 = vld [vmem:[%s8419_s4 + $0x200] sm:$0xff]  ;;  %v3310_v42 = vadd.f32 %v6678_v18, %v2086_v4 }
 0x2d8   :  { %v3590_v3 = vpop.f32.mrf.mxu1  ;;  %v1295_v37 = vld [vmem:[%s8419_s4 + $0x780] sm:$0xff] }
 0x2d9   :  { %4182 = vst.msk [vmem:[%s8420_s6 + $0x318] sm:$0xff] %vm4082_vm2, %v3852_v45  ;;  %v3591_v12 = vadd.f32 %v3590_v3, %v3046_v9  ;;  %v8501_v9 = vld [vmem:[#allocation25_spill] sm:$0xff] }
 0x2da   :  { %v6756_v26 = vpop.f32.mrf.mxu2  ;;  %v3049_v45 = vadd.f32 %v3048_v36, %v8501_v9  ;;  %v2091_v36 = vpop.permute.xlu0 %2090 }
 0x2db   :  { %4095 = vst.msk [vmem:[%s8420_s6 + $0x60] sm:$0xff] %vm4082_vm2, %v3591_v12  ;;  %4411 = vmatmul.msk.f32.gmra.mxu1 %vm2463_vm1, %v1112_v16  ;;  %4499 = vmatmul.msk.f32.gmra.mxu3 %vm2463_vm1, %v1288_v56  ;;  %v1114_v56 = vld [vmem:[%s8419_s4 + $0x1d8] sm:$0xff] }
 0x2dc   :  { %v3057_v5 = vpop.f32.mrf.mxu0  ;;  %v1290_v12 = vld [vmem:[%s8419_s4 + $0x758] sm:$0xff] }
 0x2de   :  { %v3854_v48 = vpop.f32.mrf.mxu3 }
 0x2df   :  { %v3855_v3 = vadd.f32 %v3854_v48, %v3310_v42  ;;  %3104 = vmatmul.f32.gmra.mxu0 %v1119_v54  ;;  %3368 = vmatmul.f32.gmra.mxu2 %v1295_v37  ;;  %v1121_v37 = vld [vmem:[%s8419_s4 + $0x210] sm:$0xff]  ;;  %v3313_v48 = vadd.f32 %v6704_v51, %v2091_v36 }
 0x2e0   :  { %v3593_v16 = vpop.f32.mrf.mxu1  ;;  %v1297_v42 = vld [vmem:[%s8419_s4 + $0x790] sm:$0xff] }
 0x2e1   :  { %4183 = vst.msk [vmem:[%s8420_s6 + $0x320] sm:$0xff] %vm4082_vm2, %v3855_v3  ;;  %v3594_v18 = vadd.f32 %v3593_v16, %v3049_v45  ;;  %v8502_v45 = vld [vmem:[#allocation29_spill] sm:$0xff] }
 0x2e2   :  { %v6782_v4 = vpop.f32.mrf.mxu2  ;;  %v3052_v3 = vadd.f32 %v3051_v57, %v8502_v45  ;;  %v2096_v57 = vpop.permute.xlu1 %2095 }
 0x2e3   :  { %4096 = vst.msk [vmem:[%s8420_s6 + $0x68] sm:$0xff] %vm4082_vm2, %v3594_v18  ;;  %4412 = vmatmul.msk.f32.gmra.mxu1 %vm2463_vm1, %v1114_v56  ;;  %4500 = vmatmul.msk.f32.gmra.mxu3 %vm2463_vm1, %v1290_v12  ;;  %v1116_v12 = vld [vmem:[%s8419_s4 + $0x1e8] sm:$0xff] }
 0x2e4   :  { %v3060_v54 = vpop.f32.mrf.mxu0  ;;  %v1292_v18 = vld [vmem:[%s8419_s4 + $0x768] sm:$0xff] }
 0x2e6   :  { %v3857_v9 = vpop.f32.mrf.mxu3 }
 0x2e7   :  { %v3858_v16 = vadd.f32 %v3857_v9, %v3313_v48  ;;  %3107 = vmatmul.f32.gmra.mxu0 %v1121_v37  ;;  %3371 = vmatmul.f32.gmra.mxu2 %v1297_v42  ;;  %v1123_v42 = vld [vmem:[%s8419_s4 + $0x220] sm:$0xff]  ;;  %v3316_v9 = vadd.f32 %v6730_v53, %v2096_v57 }
 0x2e8   :  { %v3596_v56 = vpop.f32.mrf.mxu1  ;;  %v1299_v48 = vld [vmem:[%s8419_s4 + $0x7a0] sm:$0xff] }
 0x2e9   :  { %4184 = vst.msk [vmem:[%s8420_s6 + $0x328] sm:$0xff] %vm4082_vm2, %v3858_v16  ;;  %v3597_v51 = vadd.f32 %v3596_v56, %v3052_v3  ;;  %v8503_v3 = vld [vmem:[#allocation30_spill] sm:$0xff] }
 0x2ea   :  { %v6808_v36 = vpop.f32.mrf.mxu2  ;;  %v3055_v16 = vadd.f32 %v3054_v62, %v8503_v3  ;;  %v2101_v62 = vpop.permute.xlu2 %2100 }
 0x2eb   :  { %4097 = vst.msk [vmem:[%s8420_s6 + $0x70] sm:$0xff] %vm4082_vm2, %v3597_v51  ;;  %4413 = vmatmul.msk.f32.gmra.mxu1 %vm2463_vm1, %v1116_v12  ;;  %4501 = vmatmul.msk.f32.gmra.mxu3 %vm2463_vm1, %v1292_v18  ;;  %v1118_v18 = vld [vmem:[%s8419_s4 + $0x1f8] sm:$0xff] }
 0x2ec   :  { %v3063_v37 = vpop.f32.mrf.mxu0  ;;  %v1294_v51 = vld [vmem:[%s8419_s4 + $0x778] sm:$0xff] }
 0x2ee   :  { %v3860_v45 = vpop.f32.mrf.mxu3 }
 0x2ef   :  { %v3861_v56 = vadd.f32 %v3860_v45, %v3316_v9  ;;  %3110 = vmatmul.f32.gmra.mxu0 %v1123_v42  ;;  %3374 = vmatmul.f32.gmra.mxu2 %v1299_v48  ;;  %v1125_v48 = vld [vmem:[%s8419_s4 + $0x230] sm:$0xff]  ;;  %v3319_v45 = vadd.f32 %v6756_v26, %v2101_v62 }
 0x2f0   :  { %v3599_v12 = vpop.f32.mrf.mxu1  ;;  %v1301_v9 = vld [vmem:[%s8419_s4 + $0x7b0] sm:$0xff] }
 0x2f1   :  { %4185 = vst.msk [vmem:[%s8420_s6 + $0x330] sm:$0xff] %vm4082_vm2, %v3861_v56  ;;  %v3600_v53 = vadd.f32 %v3599_v12, %v3055_v16  ;;  %v8504_v16 = vld [vmem:[#allocation28_spill] sm:$0xff] }
 0x2f2   :  { %v6834_v57 = vpop.f32.mrf.mxu2  ;;  %v3058_v56 = vadd.f32 %v3057_v5, %v8504_v16  ;;  %v2106_v5 = vpop.permute.xlu0 %2105 }
 0x2f3   :  { %4098 = vst.msk [vmem:[%s8420_s6 + $0x78] sm:$0xff] %vm4082_vm2, %v3600_v53  ;;  %4414 = vmatmul.msk.f32.gmra.mxu1 %vm2463_vm1, %v1118_v18  ;;  %4502 = vmatmul.msk.f32.gmra.mxu3 %vm2463_vm1, %v1294_v51  ;;  %v1120_v51 = vld [vmem:[%s8419_s4 + $0x208] sm:$0xff] }
 0x2f4   :  { %v3066_v42 = vpop.f32.mrf.mxu0  ;;  %v1296_v53 = vld [vmem:[%s8419_s4 + $0x788] sm:$0xff] }
 0x2f6   :  { %v3863_v3 = vpop.f32.mrf.mxu3 }
 0x2f7   :  { %v3864_v12 = vadd.f32 %v3863_v3, %v3319_v45  ;;  %3113 = vmatmul.f32.gmra.mxu0 %v1125_v48  ;;  %3377 = vmatmul.f32.gmra.mxu2 %v1301_v9  ;;  %v1127_v9 = vld [vmem:[%s8419_s4 + $0x240] sm:$0xff]  ;;  %v3322_v3 = vadd.f32 %v6782_v4, %v2106_v5 }
 0x2f8   :  { %v3602_v18 = vpop.f32.mrf.mxu1  ;;  %v1303_v45 = vld [vmem:[%s8419_s4 + $0x7c0] sm:$0xff] }
 0x2f9   :  { %4186 = vst.msk [vmem:[%s8420_s6 + $0x338] sm:$0xff] %vm4082_vm2, %v3864_v12  ;;  %v3603_v26 = vadd.f32 %v3602_v18, %v3058_v56  ;;  %v8505_v56 = vld [vmem:[#allocation32_spill] sm:$0xff] }
 0x2fa   :  { %v6860_v62 = vpop.f32.mrf.mxu2  ;;  %v3061_v12 = vadd.f32 %v3060_v54, %v8505_v56  ;;  %v2111_v54 = vpop.permute.xlu1 %2110 }
 0x2fb   :  { %4099 = vst.msk [vmem:[%s8420_s6 + $0x80] sm:$0xff] %vm4082_vm2, %v3603_v26  ;;  %4415 = vmatmul.msk.f32.gmra.mxu1 %vm2463_vm1, %v1120_v51  ;;  %4503 = vmatmul.msk.f32.gmra.mxu3 %vm2463_vm1, %v1296_v53  ;;  %v1122_v53 = vld [vmem:[%s8419_s4 + $0x218] sm:$0xff] }
 0x2fc   :  { %v3069_v48 = vpop.f32.mrf.mxu0  ;;  %v1298_v26 = vld [vmem:[%s8419_s4 + $0x798] sm:$0xff] }
 0x2fe   :  { %v3866_v16 = vpop.f32.mrf.mxu3 }
 0x2ff   :  { %v3867_v18 = vadd.f32 %v3866_v16, %v3322_v3  ;;  %3116 = vmatmul.f32.gmra.mxu0 %v1127_v9  ;;  %3380 = vmatmul.f32.gmra.mxu2 %v1303_v45  ;;  %v1129_v45 = vld [vmem:[%s8419_s4 + $0x250] sm:$0xff]  ;;  %v3325_v16 = vadd.f32 %v6808_v36, %v2111_v54 }
 0x300   :  { %v3605_v51 = vpop.f32.mrf.mxu1  ;;  %v1305_v3 = vld [vmem:[%s8419_s4 + $0x7d0] sm:$0xff] }
 0x301   :  { %4187 = vst.msk [vmem:[%s8420_s6 + $0x340] sm:$0xff] %vm4082_vm2, %v3867_v18  ;;  %v3606_v4 = vadd.f32 %v3605_v51, %v3061_v12  ;;  %v8506_v12 = vld [vmem:[#allocation33_spill] sm:$0xff] }
 0x302   :  { %v6886_v5 = vpop.f32.mrf.mxu2  ;;  %v3064_v18 = vadd.f32 %v3063_v37, %v8506_v12  ;;  %v2116_v37 = vpop.permute.xlu2 %2115 }
 0x303   :  { %4100 = vst.msk [vmem:[%s8420_s6 + $0x88] sm:$0xff] %vm4082_vm2, %v3606_v4  ;;  %4416 = vmatmul.msk.f32.gmra.mxu1 %vm2463_vm1, %v1122_v53  ;;  %4504 = vmatmul.msk.f32.gmra.mxu3 %vm2463_vm1, %v1298_v26  ;;  %v1124_v26 = vld [vmem:[%s8419_s4 + $0x228] sm:$0xff] }
 0x304   :  { %v3072_v9 = vpop.f32.mrf.mxu0  ;;  %v1300_v4 = vld [vmem:[%s8419_s4 + $0x7a8] sm:$0xff] }
 0x306   :  { %v3869_v56 = vpop.f32.mrf.mxu3 }
 0x307   :  { %v3870_v51 = vadd.f32 %v3869_v56, %v3325_v16  ;;  %3119 = vmatmul.f32.gmra.mxu0 %v1129_v45  ;;  %3383 = vmatmul.f32.gmra.mxu2 %v1305_v3  ;;  %v1131_v3 = vld [vmem:[%s8419_s4 + $0x260] sm:$0xff]  ;;  %v3328_v56 = vadd.f32 %v6834_v57, %v2116_v37 }
 0x308   :  { %v3608_v53 = vpop.f32.mrf.mxu1  ;;  %v1307_v16 = vld [vmem:[%s8419_s4 + $0x7e0] sm:$0xff] }
 0x309   :  { %4188 = vst.msk [vmem:[%s8420_s6 + $0x348] sm:$0xff] %vm4082_vm2, %v3870_v51  ;;  %v3609_v36 = vadd.f32 %v3608_v53, %v3064_v18  ;;  %v8507_v18 = vld [vmem:[#allocation31_spill] sm:$0xff] }
 0x30a   :  { %v6912_v54 = vpop.f32.mrf.mxu2  ;;  %v3067_v51 = vadd.f32 %v3066_v42, %v8507_v18  ;;  %v2121_v42 = vpop.permute.xlu0 %2120 }
 0x30b   :  { %4101 = vst.msk [vmem:[%s8420_s6 + $0x90] sm:$0xff] %vm4082_vm2, %v3609_v36  ;;  %4417 = vmatmul.msk.f32.gmra.mxu1 %vm2463_vm1, %v1124_v26  ;;  %4505 = vmatmul.msk.f32.gmra.mxu3 %vm2463_vm1, %v1300_v4  ;;  %v1126_v4 = vld [vmem:[%s8419_s4 + $0x238] sm:$0xff] }
 0x30c   :  { %v3075_v45 = vpop.f32.mrf.mxu0  ;;  %v1302_v36 = vld [vmem:[%s8419_s4 + $0x7b8] sm:$0xff] }
 0x30e   :  { %v3872_v12 = vpop.f32.mrf.mxu3 }
 0x30f   :  { %v3873_v53 = vadd.f32 %v3872_v12, %v3328_v56  ;;  %3122 = vmatmul.f32.gmra.mxu0 %v1131_v3  ;;  %3386 = vmatmul.f32.gmra.mxu2 %v1307_v16  ;;  %v1133_v16 = vld [vmem:[%s8419_s4 + $0x270] sm:$0xff]  ;;  %v3331_v12 = vadd.f32 %v6860_v62, %v2121_v42 }
 0x310   :  { %v3611_v26 = vpop.f32.mrf.mxu1  ;;  %v1309_v56 = vld [vmem:[%s8419_s4 + $0x7f0] sm:$0xff] }
 0x311   :  { %4189 = vst.msk [vmem:[%s8420_s6 + $0x350] sm:$0xff] %vm4082_vm2, %v3873_v53  ;;  %v3612_v57 = vadd.f32 %v3611_v26, %v3067_v51  ;;  %v8508_v51 = vld [vmem:[#allocation35_spill] sm:$0xff] }
 0x312   :  { %v6938_v37 = vpop.f32.mrf.mxu2  ;;  %v3070_v53 = vadd.f32 %v3069_v48, %v8508_v51  ;;  %v2126_v48 = vpop.permute.xlu1 %2125 }
 0x313   :  { %4102 = vst.msk [vmem:[%s8420_s6 + $0x98] sm:$0xff] %vm4082_vm2, %v3612_v57  ;;  %4418 = vmatmul.msk.f32.gmra.mxu1 %vm2463_vm1, %v1126_v4  ;;  %4506 = vmatmul.msk.f32.gmra.mxu3 %vm2463_vm1, %v1302_v36  ;;  %v1128_v36 = vld [vmem:[%s8419_s4 + $0x248] sm:$0xff] }
 0x314   :  { %v3078_v3 = vpop.f32.mrf.mxu0  ;;  %v1304_v57 = vld [vmem:[%s8419_s4 + $0x7c8] sm:$0xff] }
 0x316   :  { %v3875_v18 = vpop.f32.mrf.mxu3 }
 0x317   :  { %v3876_v26 = vadd.f32 %v3875_v18, %v3331_v12  ;;  %3125 = vmatmul.f32.gmra.mxu0 %v1133_v16  ;;  %3389 = vmatmul.f32.gmra.mxu2 %v1309_v56  ;;  %v1135_v56 = vld [vmem:[%s8419_s4 + $0x280] sm:$0xff]  ;;  %v3334_v18 = vadd.f32 %v6886_v5, %v2126_v48 }
 0x318   :  { %v3614_v4 = vpop.f32.mrf.mxu1  ;;  %v1311_v12 = vld [vmem:[%s8419_s4 + $0x800] sm:$0xff] }
 0x319   :  { %4190 = vst.msk [vmem:[%s8420_s6 + $0x358] sm:$0xff] %vm4082_vm2, %v3876_v26  ;;  %v3615_v62 = vadd.f32 %v3614_v4, %v3070_v53  ;;  %v8509_v53 = vld [vmem:[#allocation36_spill] sm:$0xff] }
 0x31a   :  { %v6964_v42 = vpop.f32.mrf.mxu2  ;;  %v3073_v26 = vadd.f32 %v3072_v9, %v8509_v53  ;;  %v2131_v9 = vpop.permute.xlu2 %2130 }
 0x31b   :  { %4103 = vst.msk [vmem:[%s8420_s6 + $0xa0] sm:$0xff] %vm4082_vm2, %v3615_v62  ;;  %4419 = vmatmul.msk.f32.gmra.mxu1 %vm2463_vm1, %v1128_v36  ;;  %4507 = vmatmul.msk.f32.gmra.mxu3 %vm2463_vm1, %v1304_v57  ;;  %v1130_v57 = vld [vmem:[%s8419_s4 + $0x258] sm:$0xff] }
 0x31c   :  { %v3081_v16 = vpop.f32.mrf.mxu0  ;;  %v1306_v62 = vld [vmem:[%s8419_s4 + $0x7d8] sm:$0xff] }
 0x31e   :  { %v3878_v51 = vpop.f32.mrf.mxu3 }
 0x31f   :  { %v3879_v4 = vadd.f32 %v3878_v51, %v3334_v18  ;;  %3128 = vmatmul.f32.gmra.mxu0 %v1135_v56  ;;  %3392 = vmatmul.f32.gmra.mxu2 %v1311_v12  ;;  %v1137_v12 = vld [vmem:[%s8419_s4 + $0x290] sm:$0xff]  ;;  %v3337_v51 = vadd.f32 %v6912_v54, %v2131_v9 }
 0x320   :  { %v3617_v36 = vpop.f32.mrf.mxu1  ;;  %v1313_v18 = vld [vmem:[%s8419_s4 + $0x810] sm:$0xff] }
 0x321   :  { %4191 = vst.msk [vmem:[%s8420_s6 + $0x360] sm:$0xff] %vm4082_vm2, %v3879_v4  ;;  %v3618_v5 = vadd.f32 %v3617_v36, %v3073_v26  ;;  %v8510_v26 = vld [vmem:[#allocation34_spill] sm:$0xff] }
 0x322   :  { %v6990_v48 = vpop.f32.mrf.mxu2  ;;  %v3076_v4 = vadd.f32 %v3075_v45, %v8510_v26  ;;  %v2136_v45 = vpop.permute.xlu0 %2135 }
 0x323   :  { %4104 = vst.msk [vmem:[%s8420_s6 + $0xa8] sm:$0xff] %vm4082_vm2, %v3618_v5  ;;  %4420 = vmatmul.msk.f32.gmra.mxu1 %vm2463_vm1, %v1130_v57  ;;  %4508 = vmatmul.msk.f32.gmra.mxu3 %vm2463_vm1, %v1306_v62  ;;  %v1132_v62 = vld [vmem:[%s8419_s4 + $0x268] sm:$0xff] }
 0x324   :  { %v3084_v56 = vpop.f32.mrf.mxu0  ;;  %v1308_v5 = vld [vmem:[%s8419_s4 + $0x7e8] sm:$0xff] }
 0x326   :  { %v3881_v53 = vpop.f32.mrf.mxu3 }
 0x327   :  { %v3882_v36 = vadd.f32 %v3881_v53, %v3337_v51  ;;  %3131 = vmatmul.f32.gmra.mxu0 %v1137_v12  ;;  %3395 = vmatmul.f32.gmra.mxu2 %v1313_v18  ;;  %v1139_v18 = vld [vmem:[%s8419_s4 + $0x2a0] sm:$0xff]  ;;  %v3340_v53 = vadd.f32 %v6938_v37, %v2136_v45 }
 0x328   :  { %v3620_v57 = vpop.f32.mrf.mxu1  ;;  %v1315_v51 = vld [vmem:[%s8419_s4 + $0x820] sm:$0xff] }
 0x329   :  { %4192 = vst.msk [vmem:[%s8420_s6 + $0x368] sm:$0xff] %vm4082_vm2, %v3882_v36  ;;  %v3621_v54 = vadd.f32 %v3620_v57, %v3076_v4  ;;  %v8511_v4 = vld [vmem:[#allocation38_spill] sm:$0xff] }
 0x32a   :  { %v7016_v9 = vpop.f32.mrf.mxu2  ;;  %v3079_v36 = vadd.f32 %v3078_v3, %v8511_v4  ;;  %v2141_v3 = vpop.permute.xlu1 %2140 }
 0x32b   :  { %4105 = vst.msk [vmem:[%s8420_s6 + $0xb0] sm:$0xff] %vm4082_vm2, %v3621_v54  ;;  %4421 = vmatmul.msk.f32.gmra.mxu1 %vm2463_vm1, %v1132_v62  ;;  %4509 = vmatmul.msk.f32.gmra.mxu3 %vm2463_vm1, %v1308_v5  ;;  %v1134_v5 = vld [vmem:[%s8419_s4 + $0x278] sm:$0xff] }
 0x32c   :  { %v3087_v12 = vpop.f32.mrf.mxu0  ;;  %v1310_v54 = vld [vmem:[%s8419_s4 + $0x7f8] sm:$0xff] }
 0x32e   :  { %v3884_v26 = vpop.f32.mrf.mxu3 }
 0x32f   :  { %v3885_v57 = vadd.f32 %v3884_v26, %v3340_v53  ;;  %3134 = vmatmul.f32.gmra.mxu0 %v1139_v18  ;;  %3398 = vmatmul.f32.gmra.mxu2 %v1315_v51  ;;  %v1141_v51 = vld [vmem:[%s8419_s4 + $0x2b0] sm:$0xff]  ;;  %v3343_v26 = vadd.f32 %v6964_v42, %v2141_v3 }
 0x330   :  { %v3623_v62 = vpop.f32.mrf.mxu1  ;;  %v1317_v53 = vld [vmem:[%s8419_s4 + $0x830] sm:$0xff] }
 0x331   :  { %4193 = vst.msk [vmem:[%s8420_s6 + $0x370] sm:$0xff] %vm4082_vm2, %v3885_v57  ;;  %v3624_v37 = vadd.f32 %v3623_v62, %v3079_v36  ;;  %v8512_v36 = vld [vmem:[#allocation39_spill] sm:$0xff] }
 0x332   :  { %v7042_v45 = vpop.f32.mrf.mxu2  ;;  %v3082_v57 = vadd.f32 %v3081_v16, %v8512_v36  ;;  %v2146_v16 = vpop.permute.xlu2 %2145 }
 0x333   :  { %4106 = vst.msk [vmem:[%s8420_s6 + $0xb8] sm:$0xff] %vm4082_vm2, %v3624_v37  ;;  %4422 = vmatmul.msk.f32.gmra.mxu1 %vm2463_vm1, %v1134_v5  ;;  %4510 = vmatmul.msk.f32.gmra.mxu3 %vm2463_vm1, %v1310_v54  ;;  %v1136_v54 = vld [vmem:[%s8419_s4 + $0x288] sm:$0xff] }
 0x334   :  { %v3090_v18 = vpop.f32.mrf.mxu0  ;;  %v1312_v37 = vld [vmem:[%s8419_s4 + $0x808] sm:$0xff] }
 0x336   :  { %v3887_v4 = vpop.f32.mrf.mxu3 }
 0x337   :  { %v3888_v62 = vadd.f32 %v3887_v4, %v3343_v26  ;;  %3137 = vmatmul.f32.gmra.mxu0 %v1141_v51  ;;  %3401 = vmatmul.f32.gmra.mxu2 %v1317_v53  ;;  %v1143_v53 = vld [vmem:[%s8419_s4 + $0x2c0] sm:$0xff]  ;;  %v3346_v4 = vadd.f32 %v6990_v48, %v2146_v16 }
 0x338   :  { %v3626_v5 = vpop.f32.mrf.mxu1  ;;  %v1319_v26 = vld [vmem:[%s8419_s4 + $0x840] sm:$0xff] }
 0x339   :  { %4194 = vst.msk [vmem:[%s8420_s6 + $0x378] sm:$0xff] %vm4082_vm2, %v3888_v62  ;;  %v3627_v42 = vadd.f32 %v3626_v5, %v3082_v57  ;;  %v8513_v57 = vld [vmem:[#allocation37_spill] sm:$0xff] }
 0x33a   :  { %v7068_v3 = vpop.f32.mrf.mxu2  ;;  %v3085_v62 = vadd.f32 %v3084_v56, %v8513_v57  ;;  %v2151_v56 = vpop.permute.xlu0 %2150 }
 0x33b   :  { %4107 = vst.msk [vmem:[%s8420_s6 + $0xc0] sm:$0xff] %vm4082_vm2, %v3627_v42  ;;  %4423 = vmatmul.msk.f32.gmra.mxu1 %vm2463_vm1, %v1136_v54  ;;  %4511 = vmatmul.msk.f32.gmra.mxu3 %vm2463_vm1, %v1312_v37  ;;  %v1138_v37 = vld [vmem:[%s8419_s4 + $0x298] sm:$0xff] }
 0x33c   :  { %v3093_v51 = vpop.f32.mrf.mxu0  ;;  %v1314_v42 = vld [vmem:[%s8419_s4 + $0x818] sm:$0xff] }
 0x33e   :  { %v3890_v36 = vpop.f32.mrf.mxu3 }
 0x33f   :  { %v3891_v5 = vadd.f32 %v3890_v36, %v3346_v4  ;;  %3140 = vmatmul.f32.gmra.mxu0 %v1143_v53  ;;  %3404 = vmatmul.f32.gmra.mxu2 %v1319_v26  ;;  %v1145_v26 = vld [vmem:[%s8419_s4 + $0x2d0] sm:$0xff]  ;;  %v3349_v36 = vadd.f32 %v7016_v9, %v2151_v56 }
 0x340   :  { %v3629_v54 = vpop.f32.mrf.mxu1  ;;  %v1321_v4 = vld [vmem:[%s8419_s4 + $0x850] sm:$0xff] }
 0x341   :  { %4195 = vst.msk [vmem:[%s8420_s6 + $0x380] sm:$0xff] %vm4082_vm2, %v3891_v5  ;;  %v3630_v48 = vadd.f32 %v3629_v54, %v3085_v62  ;;  %v8514_v62 = vld [vmem:[#allocation41_spill] sm:$0xff] }
 0x342   :  { %v7094_v16 = vpop.f32.mrf.mxu2  ;;  %v3088_v5 = vadd.f32 %v3087_v12, %v8514_v62  ;;  %v2156_v12 = vpop.permute.xlu1 %2155 }
 0x343   :  { %4108 = vst.msk [vmem:[%s8420_s6 + $0xc8] sm:$0xff] %vm4082_vm2, %v3630_v48  ;;  %4424 = vmatmul.msk.f32.gmra.mxu1 %vm2463_vm1, %v1138_v37  ;;  %4512 = vmatmul.msk.f32.gmra.mxu3 %vm2463_vm1, %v1314_v42  ;;  %v1140_v42 = vld [vmem:[%s8419_s4 + $0x2a8] sm:$0xff] }
 0x344   :  { %v3096_v53 = vpop.f32.mrf.mxu0  ;;  %v1316_v48 = vld [vmem:[%s8419_s4 + $0x828] sm:$0xff] }
 0x346   :  { %v3893_v57 = vpop.f32.mrf.mxu3 }
 0x347   :  { %v3894_v54 = vadd.f32 %v3893_v57, %v3349_v36  ;;  %3143 = vmatmul.f32.gmra.mxu0 %v1145_v26  ;;  %3407 = vmatmul.f32.gmra.mxu2 %v1321_v4  ;;  %v1147_v4 = vld [vmem:[%s8419_s4 + $0x2e0] sm:$0xff]  ;;  %v3352_v57 = vadd.f32 %v7042_v45, %v2156_v12 }
 0x348   :  { %v3632_v37 = vpop.f32.mrf.mxu1  ;;  %v1323_v36 = vld [vmem:[%s8419_s4 + $0x860] sm:$0xff] }
 0x349   :  { %4196 = vst.msk [vmem:[%s8420_s6 + $0x388] sm:$0xff] %vm4082_vm2, %v3894_v54  ;;  %v3633_v9 = vadd.f32 %v3632_v37, %v3088_v5  ;;  %v8515_v5 = vld [vmem:[#allocation42_spill] sm:$0xff] }
 0x34a   :  { %v7120_v56 = vpop.f32.mrf.mxu2  ;;  %v3091_v54 = vadd.f32 %v3090_v18, %v8515_v5  ;;  %v2161_v18 = vpop.permute.xlu2 %2160 }
 0x34b   :  { %4109 = vst.msk [vmem:[%s8420_s6 + $0xd0] sm:$0xff] %vm4082_vm2, %v3633_v9  ;;  %4425 = vmatmul.msk.f32.gmra.mxu1 %vm2463_vm1, %v1140_v42  ;;  %4513 = vmatmul.msk.f32.gmra.mxu3 %vm2463_vm1, %v1316_v48  ;;  %v1142_v48 = vld [vmem:[%s8419_s4 + $0x2b8] sm:$0xff] }
 0x34c   :  { %v3099_v26 = vpop.f32.mrf.mxu0  ;;  %v1318_v9 = vld [vmem:[%s8419_s4 + $0x838] sm:$0xff] }
 0x34e   :  { %v3896_v62 = vpop.f32.mrf.mxu3 }
 0x34f   :  { %v3897_v37 = vadd.f32 %v3896_v62, %v3352_v57  ;;  %3146 = vmatmul.f32.gmra.mxu0 %v1147_v4  ;;  %3410 = vmatmul.f32.gmra.mxu2 %v1323_v36  ;;  %v1149_v36 = vld [vmem:[%s8419_s4 + $0x2f0] sm:$0xff]  ;;  %v3355_v62 = vadd.f32 %v7068_v3, %v2161_v18 }
 0x350   :  { %v3635_v42 = vpop.f32.mrf.mxu1  ;;  %v1325_v57 = vld [vmem:[%s8419_s4 + $0x870] sm:$0xff] }
 0x351   :  { %4197 = vst.msk [vmem:[%s8420_s6 + $0x390] sm:$0xff] %vm4082_vm2, %v3897_v37  ;;  %v3636_v45 = vadd.f32 %v3635_v42, %v3091_v54  ;;  %v8516_v54 = vld [vmem:[#allocation40_spill] sm:$0xff] }
 0x352   :  { %v7146_v12 = vpop.f32.mrf.mxu2  ;;  %v3094_v37 = vadd.f32 %v3093_v51, %v8516_v54  ;;  %v2166_v51 = vpop.permute.xlu0 %2165 }
 0x353   :  { %4110 = vst.msk [vmem:[%s8420_s6 + $0xd8] sm:$0xff] %vm4082_vm2, %v3636_v45  ;;  %4426 = vmatmul.msk.f32.gmra.mxu1 %vm2463_vm1, %v1142_v48  ;;  %4514 = vmatmul.msk.f32.gmra.mxu3 %vm2463_vm1, %v1318_v9  ;;  %v1144_v9 = vld [vmem:[%s8419_s4 + $0x2c8] sm:$0xff] }
 0x354   :  { %v3102_v4 = vpop.f32.mrf.mxu0  ;;  %v1320_v45 = vld [vmem:[%s8419_s4 + $0x848] sm:$0xff] }
 0x356   :  { %v3899_v5 = vpop.f32.mrf.mxu3 }
 0x357   :  { %v3900_v42 = vadd.f32 %v3899_v5, %v3355_v62  ;;  %3149 = vmatmul.f32.gmra.mxu0 %v1149_v36  ;;  %3413 = vmatmul.f32.gmra.mxu2 %v1325_v57  ;;  %v1151_v57 = vld [vmem:[%s8419_s4 + $0x300] sm:$0xff]  ;;  %v3358_v5 = vadd.f32 %v7094_v16, %v2166_v51  ;;  %v1153_v51 = vld [vmem:[%s8419_s4 + $0x310] sm:$0xff] }
 0x358   :  { %v3638_v48 = vpop.f32.mrf.mxu1  ;;  %v1327_v62 = vld [vmem:[%s8419_s4 + $0x880] sm:$0xff] }
 0x359   :  { %4198 = vst.msk [vmem:[%s8420_s6 + $0x398] sm:$0xff] %vm4082_vm2, %v3900_v42  ;;  %v3639_v3 = vadd.f32 %v3638_v48, %v3094_v37  ;;  %v3097_v37 = vadd.f32 %v3096_v53, %v5887_v27  ;;  %v2171_v27 = vpop.permute.xlu1 %2170 }
 0x35a   :  { %v7172_v18 = vpop.f32.mrf.mxu2 }
 0x35b   :  { %4111 = vst.msk [vmem:[%s8420_s6 + $0xe0] sm:$0xff] %vm4082_vm2, %v3639_v3  ;;  %4427 = vmatmul.msk.f32.gmra.mxu1 %vm2463_vm1, %v1144_v9  ;;  %4515 = vmatmul.msk.f32.gmra.mxu3 %vm2463_vm1, %v1320_v45  ;;  %v1146_v9 = vld [vmem:[%s8419_s4 + $0x2d8] sm:$0xff] }
 0x35c   :  { %v3105_v36 = vpop.f32.mrf.mxu0  ;;  %v1322_v45 = vld [vmem:[%s8419_s4 + $0x858] sm:$0xff] }
 0x35e   :  { %v3902_v54 = vpop.f32.mrf.mxu3 }
 0x35f   :  { %v3903_v42 = vadd.f32 %v3902_v54, %v3358_v5  ;;  %3152 = vmatmul.f32.gmra.mxu0 %v1151_v57  ;;  %3416 = vmatmul.f32.gmra.mxu2 %v1327_v62  ;;  %v1329_v57 = vld [vmem:[%s8419_s4 + $0x890] sm:$0xff]  ;;  %v3361_v62 = vadd.f32 %v7120_v56, %v2171_v27  ;;  %v3100_v54 = vadd.f32 %v3099_v26, %v5915_v24  ;;  %v2176_v24 = vpop.permute.xlu2 %2175  ;;  %v1331_v27 = vld [vmem:[%s8419_s4 + $0x8a0] sm:$0xff] }
 0x360   :  { %v3641_v48 = vpop.f32.mrf.mxu1 }
 0x361   :  { %4199 = vst.msk [vmem:[%s8420_s6 + $0x3a0] sm:$0xff] %vm4082_vm2, %v3903_v42  ;;  %v3642_v16 = vadd.f32 %v3641_v48, %v3097_v37  ;;  %v1148_v48 = vld [vmem:[%s8419_s4 + $0x2e8] sm:$0xff] }
 0x362   :  { %v7198_v3 = vpop.f32.mrf.mxu2 }
 0x363   :  { %4112 = vst.msk [vmem:[%s8420_s6 + $0xe8] sm:$0xff] %vm4082_vm2, %v3642_v16  ;;  %4428 = vmatmul.msk.f32.gmra.mxu1 %vm2463_vm1, %v1146_v9  ;;  %4516 = vmatmul.msk.f32.gmra.mxu3 %vm2463_vm1, %v1322_v45  ;;  %v1324_v9 = vld [vmem:[%s8419_s4 + $0x868] sm:$0xff]  ;;  %v1155_v16 = vld [vmem:[%s8419_s4 + $0x320] sm:$0xff] }
 0x364   :  { %v3108_v53 = vpop.f32.mrf.mxu0 }
 0x366   :  { %v3905_v5 = vpop.f32.mrf.mxu3 }
 0x367   :  { %v3906_v37 = vadd.f32 %v3905_v5, %v3361_v62  ;;  %3155 = vmatmul.f32.gmra.mxu0 %v1153_v51  ;;  %3419 = vmatmul.f32.gmra.mxu2 %v1329_v57  ;;  %v3364_v51 = vadd.f32 %v7146_v12, %v2176_v24  ;;  %v3103_v62 = vadd.f32 %v3102_v4, %v5885_v19  ;;  %v2181_v19 = vpop.permute.xlu0 %2180 }
 0x368   :  { %v3644_v42 = vpop.f32.mrf.mxu1  ;;  %v3367_v24 = vadd.f32 %v7172_v18, %v2181_v19 }
 0x369   :  { %4200 = vst.msk [vmem:[%s8420_s6 + $0x3a8] sm:$0xff] %vm4082_vm2, %v3906_v37  ;;  %v3645_v56 = vadd.f32 %v3644_v42, %v3100_v54  ;;  %v1150_v37 = vld [vmem:[%s8419_s4 + $0x2f8] sm:$0xff] }
 0x36a   :  { %v7224_v45 = vpop.f32.mrf.mxu2  ;;  %v1326_v42 = vld [vmem:[%s8419_s4 + $0x878] sm:$0xff] }
 0x36b   :  { %4113 = vst.msk [vmem:[%s8420_s6 + $0xf0] sm:$0xff] %vm4082_vm2, %v3645_v56  ;;  %4429 = vmatmul.msk.f32.gmra.mxu1 %vm2463_vm1, %v1148_v48  ;;  %4517 = vmatmul.msk.f32.gmra.mxu3 %vm2463_vm1, %v1324_v9  ;;  %v1157_v9 = vld [vmem:[%s8419_s4 + $0x330] sm:$0xff] }
 0x36c   :  { %v3111_v26 = vpop.f32.mrf.mxu0  ;;  %v1333_v56 = vld [vmem:[%s8419_s4 + $0x8b0] sm:$0xff] }
 0x36e   :  { %v3908_v57 = vpop.f32.mrf.mxu3 }
 0x36f   :  { %v3909_v5 = vadd.f32 %v3908_v57, %v3364_v51  ;;  %3158 = vmatmul.f32.gmra.mxu0 %v1155_v16  ;;  %3422 = vmatmul.f32.gmra.mxu2 %v1331_v27  ;;  %v3106_v27 = vadd.f32 %v3105_v36, %v5923_v38  ;;  %v2186_v38 = vpop.permute.xlu1 %2185 }
 0x370   :  { %v3647_v54 = vpop.f32.mrf.mxu1 }
 0x371   :  { %4201 = vst.msk [vmem:[%s8420_s6 + $0x3b0] sm:$0xff] %vm4082_vm2, %v3909_v5  ;;  %v3648_v12 = vadd.f32 %v3647_v54, %v3103_v62  ;;  %v1152_v62 = vld [vmem:[%s8419_s4 + $0x308] sm:$0xff] }
 0x372   :  { %v7250_v48 = vpop.f32.mrf.mxu2  ;;  %v1328_v5 = vld [vmem:[%s8419_s4 + $0x888] sm:$0xff] }
 0x373   :  { %4114 = vst.msk [vmem:[%s8420_s6 + $0xf8] sm:$0xff] %vm4082_vm2, %v3648_v12  ;;  %4430 = vmatmul.msk.f32.gmra.mxu1 %vm2463_vm1, %v1150_v37  ;;  %4518 = vmatmul.msk.f32.gmra.mxu3 %vm2463_vm1, %v1326_v42  ;;  %v1159_v37 = vld [vmem:[%s8419_s4 + $0x340] sm:$0xff]  ;;  %v3370_v12 = vadd.f32 %v7198_v3, %v2186_v38  ;;  %v3112_v38 = vadd.f32 %v3111_v26, %v5921_v34  ;;  %v2196_v34 = vpop.permute.xlu0 %2195 }
 0x374   :  { %v3114_v4 = vpop.f32.mrf.mxu0  ;;  %v1335_v42 = vld [vmem:[%s8419_s4 + $0x8c0] sm:$0xff] }
 0x376   :  { %v3911_v16 = vpop.f32.mrf.mxu3 }
 0x377   :  { %v3912_v51 = vadd.f32 %v3911_v16, %v3367_v24  ;;  %3161 = vmatmul.f32.gmra.mxu0 %v1157_v9  ;;  %3425 = vmatmul.f32.gmra.mxu2 %v1333_v56  ;;  %v3109_v9 = vadd.f32 %v3108_v53, %v5958_v0  ;;  %v1154_v16 = vld [vmem:[%s8419_s4 + $0x318] sm:$0xff]  ;;  %v2191_v0 = vpop.permute.xlu2 %2190 }
 0x378   :  { %v3650_v57 = vpop.f32.mrf.mxu1 }
 0x379   :  { %4202 = vst.msk [vmem:[%s8420_s6 + $0x3b8] sm:$0xff] %vm4082_vm2, %v3912_v51  ;;  %v3651_v18 = vadd.f32 %v3650_v57, %v3106_v27  ;;  %v1330_v27 = vld [vmem:[%s8419_s4 + $0x898] sm:$0xff]  ;;  %v1161_v57 = vld [vmem:[%s8419_s4 + $0x350] sm:$0xff] }
 0x37a   :  { %v7276_v54 = vpop.f32.mrf.mxu2 }
 0x37b   :  { %4115 = vst.msk [vmem:[%s8420_s6 + $0x100] sm:$0xff] %vm4082_vm2, %v3651_v18  ;;  %4431 = vmatmul.msk.f32.gmra.mxu1 %vm2463_vm1, %v1152_v62  ;;  %4519 = vmatmul.msk.f32.gmra.mxu3 %vm2463_vm1, %v1328_v5  ;;  %v1337_v62 = vld [vmem:[%s8419_s4 + $0x8d0] sm:$0xff]  ;;  %v3373_v5 = vadd.f32 %v7224_v45, %v2191_v0 }
 0x37c   :  { %v3117_v36 = vpop.f32.mrf.mxu0 }
 0x37e   :  { %v3914_v19 = vpop.f32.mrf.mxu3 }
 0x37f   :  { %v3915_v56 = vadd.f32 %v3914_v19, %v3370_v12  ;;  %3164 = vmatmul.f32.gmra.mxu0 %v1159_v37  ;;  %3428 = vmatmul.f32.gmra.mxu2 %v1335_v42  ;;  %v1156_v12 = vld [vmem:[%s8419_s4 + $0x328] sm:$0xff] }
 0x380   :  { %v3653_v24 = vpop.f32.mrf.mxu1  ;;  %v1332_v19 = vld [vmem:[%s8419_s4 + $0x8a8] sm:$0xff] }
 0x381   :  { %4203 = vst.msk [vmem:[%s8420_s6 + $0x3c0] sm:$0xff] %vm4082_vm2, %v3915_v56  ;;  %v3654_v3 = vadd.f32 %v3653_v24, %v3109_v9  ;;  %v1163_v56 = vld [vmem:[%s8419_s4 + $0x360] sm:$0xff] }
 0x382   :  { %v7302_v51 = vpop.f32.mrf.mxu2  ;;  %v1339_v24 = vld [vmem:[%s8419_s4 + $0x8e0] sm:$0xff] }
 0x383   :  { %4116 = vst.msk [vmem:[%s8420_s6 + $0x108] sm:$0xff] %vm4082_vm2, %v3654_v3  ;;  %4432 = vmatmul.msk.f32.gmra.mxu1 %vm2463_vm1, %v1154_v16  ;;  %4520 = vmatmul.msk.f32.gmra.mxu3 %vm2463_vm1, %v1330_v27  ;;  %v3376_v16 = vadd.f32 %v7250_v48, %v2196_v34  ;;  %v3115_v3 = vadd.f32 %v3114_v4, %v5966_v15  ;;  %v2201_v15 = vpop.permute.xlu1 %2200 }
 0x384   :  { %v3120_v53 = vpop.f32.mrf.mxu0 }
 0x386   :  { %v3917_v18 = vpop.f32.mrf.mxu3 }
 0x387   :  { %v3918_v37 = vadd.f32 %v3917_v18, %v3373_v5  ;;  %3167 = vmatmul.f32.gmra.mxu0 %v1161_v57  ;;  %3431 = vmatmul.f32.gmra.mxu2 %v1337_v62  ;;  %v1158_v62 = vld [vmem:[%s8419_s4 + $0x338] sm:$0xff] }
 0x388   :  { %v3656_v42 = vpop.f32.mrf.mxu1  ;;  %v1334_v5 = vld [vmem:[%s8419_s4 + $0x8b8] sm:$0xff] }
 0x389   :  { %4204 = vst.msk [vmem:[%s8420_s6 + $0x3c8] sm:$0xff] %vm4082_vm2, %v3918_v37  ;;  %v3657_v45 = vadd.f32 %v3656_v42, %v3112_v38  ;;  %v1165_v38 = vld [vmem:[%s8419_s4 + $0x370] sm:$0xff]  ;;  %v3379_v42 = vadd.f32 %v7276_v54, %v2201_v15  ;;  %v1162_v15 = vld [vmem:[%s8419_s4 + $0x358] sm:$0xff] }
 0x38a   :  { %v7328_v9 = vpop.f32.mrf.mxu2  ;;  %v1341_v37 = vld [vmem:[%s8419_s4 + $0x8f0] sm:$0xff] }
 0x38b   :  { %4117 = vst.msk [vmem:[%s8420_s6 + $0x110] sm:$0xff] %vm4082_vm2, %v3657_v45  ;;  %4433 = vmatmul.msk.f32.gmra.mxu1 %vm2463_vm1, %v1156_v12  ;;  %4521 = vmatmul.msk.f32.gmra.mxu3 %vm2463_vm1, %v1332_v19  ;;  %v3118_v19 = vadd.f32 %v3117_v36, %v5999_v8  ;;  %v2206_v8 = vpop.permute.xlu2 %2205 }
 0x38c   :  { %v3123_v26 = vpop.f32.mrf.mxu0 }
 0x38e   :  { %v3920_v27 = vpop.f32.mrf.mxu3 }
 0x38f   :  { %v3921_v0 = vadd.f32 %v3920_v27, %v3376_v16  ;;  %3170 = vmatmul.f32.gmra.mxu0 %v1163_v56  ;;  %3434 = vmatmul.f32.gmra.mxu2 %v1339_v24  ;;  %v1160_v56 = vld [vmem:[%s8419_s4 + $0x348] sm:$0xff]  ;;  %v1167_v27 = vld [vmem:[%s8419_s4 + $0x380] sm:$0xff] }
 0x390   :  { %v3659_v57 = vpop.f32.mrf.mxu1  ;;  %v1336_v24 = vld [vmem:[%s8419_s4 + $0x8c8] sm:$0xff] }
 0x391   :  { %4205 = vst.msk [vmem:[%s8420_s6 + $0x3d0] sm:$0xff] %vm4082_vm2, %v3921_v0  ;;  %v3660_v48 = vadd.f32 %v3659_v57, %v3115_v3  ;;  %v1343_v3 = vld [vmem:[%s8419_s4 + $0x900] sm:$0xff]  ;;  %v3382_v0 = vadd.f32 %v7302_v51, %v2206_v8  ;;  %v1340_v8 = vld [vmem:[%s8419_s4 + $0x8e8] sm:$0xff] }
 0x392   :  { %v7354_v18 = vpop.f32.mrf.mxu2 }
 0x393   :  { %4118 = vst.msk [vmem:[%s8420_s6 + $0x118] sm:$0xff] %vm4082_vm2, %v3660_v48  ;;  %4434 = vmatmul.msk.f32.gmra.mxu1 %vm2463_vm1, %v1158_v62  ;;  %4522 = vmatmul.msk.f32.gmra.mxu3 %vm2463_vm1, %v1334_v5  ;;  %v3121_v62 = vadd.f32 %v3120_v53, %v5964_v2  ;;  %v2211_v2 = vpop.permute.xlu0 %2210 }
 0x394   :  { %v3126_v4 = vpop.f32.mrf.mxu0 }
 0x396   :  { %v3923_v12 = vpop.f32.mrf.mxu3 }
 0x397   :  { %v3924_v45 = vadd.f32 %v3923_v12, %v3379_v42  ;;  %3173 = vmatmul.f32.gmra.mxu0 %v1165_v38  ;;  %3437 = vmatmul.f32.gmra.mxu2 %v1341_v37  ;;  %v1338_v38 = vld [vmem:[%s8419_s4 + $0x8d8] sm:$0xff]  ;;  %v1169_v42 = vld [vmem:[%s8419_s4 + $0x390] sm:$0xff] }
 0x398   :  { %v3662_v34 = vpop.f32.mrf.mxu1  ;;  %v1345_v12 = vld [vmem:[%s8419_s4 + $0x910] sm:$0xff] }
 0x399   :  { %4206 = vst.msk [vmem:[%s8420_s6 + $0x3d8] sm:$0xff] %vm4082_vm2, %v3924_v45  ;;  %v3663_v54 = vadd.f32 %v3662_v34, %v3118_v19  ;;  %v3385_v19 = vadd.f32 %v7328_v9, %v2211_v2  ;;  %v3124_v34 = vadd.f32 %v3123_v26, %v6007_v22  ;;  %v2216_v22 = vpop.permute.xlu1 %2215 }
 0x39a   :  { %v7380_v16 = vpop.f32.mrf.mxu2 }
 0x39b   :  { %4119 = vst.msk [vmem:[%s8420_s6 + $0x120] sm:$0xff] %vm4082_vm2, %v3663_v54  ;;  %4435 = vmatmul.msk.f32.gmra.mxu1 %vm2463_vm1, %v1160_v56  ;;  %4523 = vmatmul.msk.f32.gmra.mxu3 %vm2463_vm1, %v1336_v24  ;;  %v1164_v54 = vld [vmem:[%s8419_s4 + $0x368] sm:$0xff] }
 0x39c   :  { %v3129_v36 = vpop.f32.mrf.mxu0 }
 0x39e   :  { %v3926_v57 = vpop.f32.mrf.mxu3 }
 0x39f   :  { %v3927_v5 = vadd.f32 %v3926_v57, %v3382_v0  ;;  %3176 = vmatmul.f32.gmra.mxu0 %v1167_v27  ;;  %3440 = vmatmul.f32.gmra.mxu2 %v1343_v3  ;;  %v1171_v3 = vld [vmem:[%s8419_s4 + $0x3a0] sm:$0xff]  ;;  %v3388_v57 = vadd.f32 %v7354_v18, %v2216_v22 }
 0x3a0   :  { %v3665_v48 = vpop.f32.mrf.mxu1  ;;  %v1347_v0 = vld [vmem:[%s8419_s4 + $0x920] sm:$0xff] }
 0x3a1   :  { %4207 = vst.msk [vmem:[%s8420_s6 + $0x3e0] sm:$0xff] %vm4082_vm2, %v3927_v5  ;;  %v3666_v51 = vadd.f32 %v3665_v48, %v3121_v62  ;;  %v3127_v5 = vadd.f32 %v3126_v4, %v6027_v20  ;;  %v2221_v20 = vpop.permute.xlu2 %2220  ;;  %v1175_v22 = vld [vmem:[%s8419_s4 + $0x3c0] sm:$0xff] }
 0x3a2   :  { %v7406_v37 = vpop.f32.mrf.mxu2 }
 0x3a3   :  { %4120 = vst.msk [vmem:[%s8420_s6 + $0x128] sm:$0xff] %vm4082_vm2, %v3666_v51  ;;  %4436 = vmatmul.msk.f32.gmra.mxu1 %vm2463_vm1, %v1162_v15  ;;  %4524 = vmatmul.msk.f32.gmra.mxu3 %vm2463_vm1, %v1338_v38  ;;  %v1166_v38 = vld [vmem:[%s8419_s4 + $0x378] sm:$0xff] }
 0x3a4   :  { %v3132_v53 = vpop.f32.mrf.mxu0  ;;  %v1342_v51 = vld [vmem:[%s8419_s4 + $0x8f8] sm:$0xff] }
 0x3a6   :  { %v3929_v45 = vpop.f32.mrf.mxu3 }
 0x3a7   :  { %v3930_v56 = vadd.f32 %v3929_v45, %v3385_v19  ;;  %3179 = vmatmul.f32.gmra.mxu0 %v1169_v42  ;;  %3443 = vmatmul.f32.gmra.mxu2 %v1345_v12  ;;  %v1173_v42 = vld [vmem:[%s8419_s4 + $0x3b0] sm:$0xff]  ;;  %v3391_v19 = vadd.f32 %v7380_v16, %v2221_v20 }
 0x3a8   :  { %v3668_v24 = vpop.f32.mrf.mxu1  ;;  %v1349_v12 = vld [vmem:[%s8419_s4 + $0x930] sm:$0xff] }
 0x3a9   :  { %4208 = vst.msk [vmem:[%s8420_s6 + $0x3e8] sm:$0xff] %vm4082_vm2, %v3930_v56  ;;  %v3669_v9 = vadd.f32 %v3668_v24, %v3124_v34  ;;  %v3130_v34 = vadd.f32 %v3129_v36, %v6022_v49  ;;  %v2226_v49 = vpop.permute.xlu0 %2225  ;;  %v1353_v20 = vld [vmem:[%s8419_s4 + $0x950] sm:$0xff] }
 0x3aa   :  { %v7432_v27 = vpop.f32.mrf.mxu2 }
 0x3ab   :  { %4121 = vst.msk [vmem:[%s8420_s6 + $0x130] sm:$0xff] %vm4082_vm2, %v3669_v9  ;;  %4437 = vmatmul.msk.f32.gmra.mxu1 %vm2463_vm1, %v1164_v54  ;;  %4525 = vmatmul.msk.f32.gmra.mxu3 %vm2463_vm1, %v1340_v8  ;;  %v1168_v54 = vld [vmem:[%s8419_s4 + $0x388] sm:$0xff] }
 0x3ac   :  { %v3135_v26 = vpop.f32.mrf.mxu0  ;;  %v1344_v8 = vld [vmem:[%s8419_s4 + $0x908] sm:$0xff] }
 0x3ae   :  { %v3932_v62 = vpop.f32.mrf.mxu3 }
 0x3af   :  { %v3933_v48 = vadd.f32 %v3932_v62, %v3388_v57  ;;  %3182 = vmatmul.f32.gmra.mxu0 %v1171_v3  ;;  %3446 = vmatmul.f32.gmra.mxu2 %v1347_v0  ;;  %v1351_v3 = vld [vmem:[%s8419_s4 + $0x940] sm:$0xff]  ;;  %v3394_v0 = vadd.f32 %v7406_v37, %v2226_v49  ;;  %v3133_v62 = vadd.f32 %v3132_v53, %v6041_v50  ;;  %v2231_v50 = vpop.permute.xlu1 %2230 }
 0x3b0   :  { %v3671_v15 = vpop.f32.mrf.mxu1 }
 0x3b1   :  { %4209 = vst.msk [vmem:[%s8420_s6 + $0x3f0] sm:$0xff] %vm4082_vm2, %v3933_v48  ;;  %v3672_v18 = vadd.f32 %v3671_v15, %v3127_v5  ;;  %v1170_v15 = vld [vmem:[%s8419_s4 + $0x398] sm:$0xff] }
 0x3b2   :  { %v7458_v2 = vpop.f32.mrf.mxu2 }
 0x3b3   :  { %4122 = vst.msk [vmem:[%s8420_s6 + $0x138] sm:$0xff] %vm4082_vm2, %v3672_v18  ;;  %4438 = vmatmul.msk.f32.gmra.mxu1 %vm2463_vm1, %v1166_v38  ;;  %4526 = vmatmul.msk.f32.gmra.mxu3 %vm2463_vm1, %v1342_v51  ;;  %v1346_v38 = vld [vmem:[%s8419_s4 + $0x918] sm:$0xff]  ;;  %v1177_v18 = vld [vmem:[%s8419_s4 + $0x3d0] sm:$0xff] }
 0x3b4   :  { %v3138_v4 = vpop.f32.mrf.mxu0 }
 0x3b6   :  { %v3935_v45 = vpop.f32.mrf.mxu3 }
 0x3b7   :  { %v3936_v56 = vadd.f32 %v3935_v45, %v3391_v19  ;;  %3185 = vmatmul.f32.gmra.mxu0 %v1173_v42  ;;  %3449 = vmatmul.f32.gmra.mxu2 %v1349_v12  ;;  %v3397_v42 = vadd.f32 %v7432_v27, %v2231_v50  ;;  %v3136_v19 = vadd.f32 %v3135_v26, %v6062_v47  ;;  %v2236_v47 = vpop.permute.xlu2 %2235 }
 0x3b8   :  { %v3674_v24 = vpop.f32.mrf.mxu1  ;;  %v3400_v49 = vadd.f32 %v7458_v2, %v2236_v47 }
 0x3b9   :  { %4210 = vst.msk [vmem:[%s8420_s6 + $0x3f8] sm:$0xff] %vm4082_vm2, %v3936_v56  ;;  %v3675_v16 = vadd.f32 %v3674_v24, %v3130_v34  ;;  %v1172_v56 = vld [vmem:[%s8419_s4 + $0x3a8] sm:$0xff] }
 0x3ba   :  { %v7484_v9 = vpop.f32.mrf.mxu2  ;;  %v1348_v24 = vld [vmem:[%s8419_s4 + $0x928] sm:$0xff] }
 0x3bb   :  { %4123 = vst.msk [vmem:[%s8420_s6 + $0x140] sm:$0xff] %vm4082_vm2, %v3675_v16  ;;  %4439 = vmatmul.msk.f32.gmra.mxu1 %vm2463_vm1, %v1168_v54  ;;  %4527 = vmatmul.msk.f32.gmra.mxu3 %vm2463_vm1, %v1344_v8  ;;  %v1179_v8 = vld [vmem:[%s8419_s4 + $0x3e0] sm:$0xff] }
 0x3bc   :  { %v3141_v36 = vpop.f32.mrf.mxu0  ;;  %v1355_v16 = vld [vmem:[%s8419_s4 + $0x960] sm:$0xff] }
 0x3be   :  { %v3938_v57 = vpop.f32.mrf.mxu3 }
 0x3bf   :  { %v3939_v5 = vadd.f32 %v3938_v57, %v3394_v0  ;;  %3188 = vmatmul.f32.gmra.mxu0 %v1175_v22  ;;  %3452 = vmatmul.f32.gmra.mxu2 %v1351_v3  ;;  %v3139_v3 = vadd.f32 %v3138_v4, %v6043_v13  ;;  %v2241_v13 = vpop.permute.xlu0 %2240 }
 0x3c0   :  { %v3677_v48 = vpop.f32.mrf.mxu1 }
 0x3c1   :  { %4211 = vst.msk [vmem:[%s8420_s6 + $0x400] sm:$0xff] %vm4082_vm2, %v3939_v5  ;;  %v3678_v37 = vadd.f32 %v3677_v48, %v3133_v62  ;;  %v1174_v62 = vld [vmem:[%s8419_s4 + $0x3b8] sm:$0xff] }
 0x3c2   :  { %v7510_v51 = vpop.f32.mrf.mxu2  ;;  %v1350_v5 = vld [vmem:[%s8419_s4 + $0x938] sm:$0xff] }
 0x3c3   :  { %4124 = vst.msk [vmem:[%s8420_s6 + $0x148] sm:$0xff] %vm4082_vm2, %v3678_v37  ;;  %4440 = vmatmul.msk.f32.gmra.mxu1 %vm2463_vm1, %v1170_v15  ;;  %4528 = vmatmul.msk.f32.gmra.mxu3 %vm2463_vm1, %v1346_v38  ;;  %v1181_v15 = vld [vmem:[%s8419_s4 + $0x3f0] sm:$0xff]  ;;  %v3403_v37 = vadd.f32 %v7484_v9, %v2241_v13 }
 0x3c4   :  { %v3144_v53 = vpop.f32.mrf.mxu0  ;;  %v1357_v38 = vld [vmem:[%s8419_s4 + $0x970] sm:$0xff] }
 0x3c5   :  { %v3145_v47 = vadd.f32 %v3144_v53, %v6094_v28  ;;  %v2251_v28 = vpop.permute.xlu2 %2250 }
 0x3c6   :  { %v3941_v12 = vpop.f32.mrf.mxu3 }
 0x3c7   :  { %v3942_v45 = vadd.f32 %v3941_v12, %v3397_v42  ;;  %3191 = vmatmul.f32.gmra.mxu0 %v1177_v18  ;;  %3455 = vmatmul.f32.gmra.mxu2 %v1353_v20  ;;  %v3142_v18 = vadd.f32 %v3141_v36, %v6066_v60  ;;  %v1176_v12 = vld [vmem:[%s8419_s4 + $0x3c8] sm:$0xff]  ;;  %v2246_v60 = vpop.permute.xlu1 %2245 }
 0x3c8   :  { %v3680_v34 = vpop.f32.mrf.mxu1 }
 0x3c9   :  { %4212 = vst.msk [vmem:[%s8420_s6 + $0x408] sm:$0xff] %vm4082_vm2, %v3942_v45  ;;  %v3681_v27 = vadd.f32 %v3680_v34, %v3136_v19  ;;  %v1352_v19 = vld [vmem:[%s8419_s4 + $0x948] sm:$0xff]  ;;  %v1183_v34 = vld [vmem:[%s8419_s4 + $0x400] sm:$0xff] }
 0x3ca   :  { %v7536_v54 = vpop.f32.mrf.mxu2 }
 0x3cb   :  { %4125 = vst.msk [vmem:[%s8420_s6 + $0x150] sm:$0xff] %vm4082_vm2, %v3681_v27  ;;  %4441 = vmatmul.msk.f32.gmra.mxu1 %vm2463_vm1, %v1172_v56  ;;  %4529 = vmatmul.msk.f32.gmra.mxu3 %vm2463_vm1, %v1348_v24  ;;  %v1359_v56 = vld [vmem:[%s8419_s4 + $0x980] sm:$0xff]  ;;  %v3406_v24 = vadd.f32 %v7510_v51, %v2246_v60 }
 0x3cc   :  { %v3147_v26 = vpop.f32.mrf.mxu0 }
 0x3ce   :  { %v3944_v22 = vpop.f32.mrf.mxu3 }
 0x3cf   :  { %v3945_v0 = vadd.f32 %v3944_v22, %v3400_v49  ;;  %3194 = vmatmul.f32.gmra.mxu0 %v1179_v8  ;;  %3458 = vmatmul.f32.gmra.mxu2 %v1355_v16  ;;  %v1178_v49 = vld [vmem:[%s8419_s4 + $0x3d8] sm:$0xff] }
 0x3d0   :  { %v3683_v57 = vpop.f32.mrf.mxu1  ;;  %v1354_v22 = vld [vmem:[%s8419_s4 + $0x958] sm:$0xff] }
 0x3d1   :  { %4213 = vst.msk [vmem:[%s8420_s6 + $0x410] sm:$0xff] %vm4082_vm2, %v3945_v0  ;;  %v3684_v2 = vadd.f32 %v3683_v57, %v3139_v3  ;;  %v1185_v0 = vld [vmem:[%s8419_s4 + $0x410] sm:$0xff] }
 0x3d2   :  { %v7562_v48 = vpop.f32.mrf.mxu2  ;;  %v1361_v57 = vld [vmem:[%s8419_s4 + $0x990] sm:$0xff] }
 0x3d3   :  { %4126 = vst.msk [vmem:[%s8420_s6 + $0x158] sm:$0xff] %vm4082_vm2, %v3684_v2  ;;  %4442 = vmatmul.msk.f32.gmra.mxu1 %vm2463_vm1, %v1174_v62  ;;  %4530 = vmatmul.msk.f32.gmra.mxu3 %vm2463_vm1, %v1350_v5  ;;  %v3409_v62 = vadd.f32 %v7536_v54, %v2251_v28  ;;  %v3148_v2 = vadd.f32 %v3147_v26, %v6069_v44  ;;  %v2256_v44 = vpop.permute.xlu0 %2255  ;;  %v1184_v28 = vld [vmem:[%s8419_s4 + $0x408] sm:$0xff] }
 0x3d4   :  { %v3150_v4 = vpop.f32.mrf.mxu0 }
 0x3d6   :  { %v3947_v50 = vpop.f32.mrf.mxu3 }
 0x3d7   :  { %v3948_v20 = vadd.f32 %v3947_v50, %v3403_v37  ;;  %3197 = vmatmul.f32.gmra.mxu0 %v1181_v15  ;;  %3461 = vmatmul.f32.gmra.mxu2 %v1357_v38  ;;  %v1180_v38 = vld [vmem:[%s8419_s4 + $0x3e8] sm:$0xff] }
 0x3d8   :  { %v3686_v42 = vpop.f32.mrf.mxu1  ;;  %v1356_v37 = vld [vmem:[%s8419_s4 + $0x968] sm:$0xff] }
 0x3d9   :  { %4214 = vst.msk [vmem:[%s8420_s6 + $0x418] sm:$0xff] %vm4082_vm2, %v3948_v20  ;;  %v3687_v9 = vadd.f32 %v3686_v42, %v3142_v18  ;;  %v1187_v18 = vld [vmem:[%s8419_s4 + $0x420] sm:$0xff]  ;;  %v3412_v42 = vadd.f32 %v7562_v48, %v2256_v44  ;;  %v1362_v44 = vld [vmem:[%s8419_s4 + $0x998] sm:$0xff] }
 0x3da   :  { %v7588_v45 = vpop.f32.mrf.mxu2  ;;  %v1363_v20 = vld [vmem:[%s8419_s4 + $0x9a0] sm:$0xff] }
 0x3db   :  { %4127 = vst.msk [vmem:[%s8420_s6 + $0x160] sm:$0xff] %vm4082_vm2, %v3687_v9  ;;  %4443 = vmatmul.msk.f32.gmra.mxu1 %vm2463_vm1, %v1176_v12  ;;  %4531 = vmatmul.msk.f32.gmra.mxu3 %vm2463_vm1, %v1352_v19  ;;  %v3151_v19 = vadd.f32 %v3150_v4, %v6097_v23  ;;  %v2261_v23 = vpop.permute.xlu1 %2260 }
 0x3dc   :  { %v3153_v36 = vpop.f32.mrf.mxu0 }
 0x3de   :  { %v3950_v27 = vpop.f32.mrf.mxu3 }
 0x3df   :  { %v3951_v8 = vadd.f32 %v3950_v27, %v3406_v24  ;;  %3200 = vmatmul.f32.gmra.mxu0 %v1183_v34  ;;  %3464 = vmatmul.f32.gmra.mxu2 %v1359_v56  ;;  %v1182_v34 = vld [vmem:[%s8419_s4 + $0x3f8] sm:$0xff]  ;;  %v1189_v27 = vld [vmem:[%s8419_s4 + $0x430] sm:$0xff] }
 0x3e0   :  { %v3689_v16 = vpop.f32.mrf.mxu1  ;;  %v1358_v56 = vld [vmem:[%s8419_s4 + $0x978] sm:$0xff] }
 0x3e1   :  { %4215 = vst.msk [vmem:[%s8420_s6 + $0x420] sm:$0xff] %vm4082_vm2, %v3951_v8  ;;  %v3690_v51 = vadd.f32 %v3689_v16, %v3145_v47  ;;  %v1365_v47 = vld [vmem:[%s8419_s4 + $0x9b0] sm:$0xff]  ;;  %v3415_v8 = vadd.f32 %v7588_v45, %v2261_v23 }
 0x3e2   :  { %v7614_v3 = vpop.f32.mrf.mxu2 }
 0x3e3   :  { %4128 = vst.msk [vmem:[%s8420_s6 + $0x168] sm:$0xff] %vm4082_vm2, %v3690_v51  ;;  %4444 = vmatmul.msk.f32.gmra.mxu1 %vm2463_vm1, %v1178_v49  ;;  %4532 = vmatmul.msk.f32.gmra.mxu3 %vm2463_vm1, %v1354_v22  ;;  %v3154_v49 = vadd.f32 %v3153_v36, %v6125_v35  ;;  %v2266_v35 = vpop.permute.xlu2 %2265 }
 0x3e4   :  { %v3156_v53 = vpop.f32.mrf.mxu0 }
 0x3e6   :  { %v3953_v5 = vpop.f32.mrf.mxu3 }
 0x3e7   :  { %v3954_v13 = vadd.f32 %v3953_v5, %v3409_v62  ;;  %3203 = vmatmul.f32.gmra.mxu0 %v1185_v0  ;;  %3467 = vmatmul.f32.gmra.mxu2 %v1361_v57  ;;  %v1360_v0 = vld [vmem:[%s8419_s4 + $0x988] sm:$0xff]  ;;  %v1191_v62 = vld [vmem:[%s8419_s4 + $0x440] sm:$0xff] }
 0x3e8   :  { %v3692_v15 = vpop.f32.mrf.mxu1  ;;  %v1367_v5 = vld [vmem:[%s8419_s4 + $0x9c0] sm:$0xff] }
 0x3e9   :  { %4216 = vst.msk [vmem:[%s8420_s6 + $0x428] sm:$0xff] %vm4082_vm2, %v3954_v13  ;;  %v3693_v54 = vadd.f32 %v3692_v15, %v3148_v2  ;;  %v3418_v2 = vadd.f32 %v7614_v3, %v2266_v35  ;;  %v3157_v15 = vadd.f32 %v3156_v53, %v6109_v32  ;;  %v2271_v32 = vpop.permute.xlu0 %2270  ;;  %v1197_v35 = vld [vmem:[%s8419_s4 + $0x470] sm:$0xff] }
 0x3ea   :  { %v7640_v50 = vpop.f32.mrf.mxu2 }
 0x3eb   :  { %4129 = vst.msk [vmem:[%s8420_s6 + $0x170] sm:$0xff] %vm4082_vm2, %v3693_v54  ;;  %4445 = vmatmul.msk.f32.gmra.mxu1 %vm2463_vm1, %v1180_v38  ;;  %4533 = vmatmul.msk.f32.gmra.mxu3 %vm2463_vm1, %v1356_v37  ;;  %v1186_v54 = vld [vmem:[%s8419_s4 + $0x418] sm:$0xff] }
 0x3ec   :  { %v3159_v26 = vpop.f32.mrf.mxu0 }
 0x3ee   :  { %v3956_v12 = vpop.f32.mrf.mxu3 }
 0x3ef   :  { %v3957_v9 = vadd.f32 %v3956_v12, %v3412_v42  ;;  %3206 = vmatmul.f32.gmra.mxu0 %v1187_v18  ;;  %3470 = vmatmul.f32.gmra.mxu2 %v1363_v20  ;;  %v1193_v20 = vld [vmem:[%s8419_s4 + $0x450] sm:$0xff]  ;;  %v3421_v12 = vadd.f32 %v7640_v50, %v2271_v32  ;;  %v1375_v32 = vld [vmem:[%s8419_s4 + $0xa00] sm:$0xff] }
 0x3f0   :  { %v3695_v60 = vpop.f32.mrf.mxu1  ;;  %v1369_v42 = vld [vmem:[%s8419_s4 + $0x9d0] sm:$0xff] }
 0x3f1   :  { %4217 = vst.msk [vmem:[%s8420_s6 + $0x430] sm:$0xff] %vm4082_vm2, %v3957_v9  ;;  %v3696_v48 = vadd.f32 %v3695_v60, %v3151_v19  ;;  %v3160_v9 = vadd.f32 %v3159_v26, %v6136_v52  ;;  %v2276_v52 = vpop.permute.xlu1 %2275 }
 0x3f2   :  { %v7666_v24 = vpop.f32.mrf.mxu2 }
 0x3f3   :  { %4130 = vst.msk [vmem:[%s8420_s6 + $0x178] sm:$0xff] %vm4082_vm2, %v3696_v48  ;;  %4446 = vmatmul.msk.f32.gmra.mxu1 %vm2463_vm1, %v1182_v34  ;;  %4534 = vmatmul.msk.f32.gmra.mxu3 %vm2463_vm1, %v1358_v56  ;;  %v1188_v56 = vld [vmem:[%s8419_s4 + $0x428] sm:$0xff] }
 0x3f4   :  { %v3162_v4 = vpop.f32.mrf.mxu0  ;;  %v1364_v48 = vld [vmem:[%s8419_s4 + $0x9a8] sm:$0xff] }
 0x3f6   :  { %v3959_v16 = vpop.f32.mrf.mxu3 }
 0x3f7   :  { %v3960_v22 = vadd.f32 %v3959_v16, %v3415_v8  ;;  %3209 = vmatmul.f32.gmra.mxu0 %v1189_v27  ;;  %3473 = vmatmul.f32.gmra.mxu2 %v1365_v47  ;;  %v1195_v27 = vld [vmem:[%s8419_s4 + $0x460] sm:$0xff]  ;;  %v3424_v8 = vadd.f32 %v7666_v24, %v2276_v52 }
 0x3f8   :  { %v3698_v51 = vpop.f32.mrf.mxu1  ;;  %v1371_v47 = vld [vmem:[%s8419_s4 + $0x9e0] sm:$0xff] }
 0x3f9   :  { %4218 = vst.msk [vmem:[%s8420_s6 + $0x438] sm:$0xff] %vm4082_vm2, %v3960_v22  ;;  %v3699_v45 = vadd.f32 %v3698_v51, %v3154_v49  ;;  %v3163_v49 = vadd.f32 %v3162_v4, %v6163_v41  ;;  %v2281_v41 = vpop.permute.xlu2 %2280 }
 0x3fa   :  { %v7692_v57 = vpop.f32.mrf.mxu2 }
 0x3fb   :  { %4131 = vst.msk [vmem:[%s8420_s6 + $0x180] sm:$0xff] %vm4082_vm2, %v3699_v45  ;;  %4447 = vmatmul.msk.f32.gmra.mxu1 %vm2463_vm1, %v1184_v28  ;;  %4535 = vmatmul.msk.f32.gmra.mxu3 %vm2463_vm1, %v1360_v0  ;;  %v1190_v28 = vld [vmem:[%s8419_s4 + $0x438] sm:$0xff] }
 0x3fc   :  { %v3165_v36 = vpop.f32.mrf.mxu0  ;;  %v1366_v0 = vld [vmem:[%s8419_s4 + $0x9b8] sm:$0xff] }
 0x3fe   :  { %v3962_v13 = vpop.f32.mrf.mxu3 }
 0x3ff   :  { %v3963_v38 = vadd.f32 %v3962_v13, %v3418_v2  ;;  %3212 = vmatmul.f32.gmra.mxu0 %v1191_v62  ;;  %3476 = vmatmul.f32.gmra.mxu2 %v1367_v5  ;;  %v1373_v62 = vld [vmem:[%s8419_s4 + $0x9f0] sm:$0xff]  ;;  %v3427_v5 = vadd.f32 %v7692_v57, %v2281_v41  ;;  %v3166_v13 = vadd.f32 %v3165_v36, %v6146_v55  ;;  %v2286_v55 = vpop.permute.xlu0 %2285 }
 0x400   :  { %v3701_v37 = vpop.f32.mrf.mxu1 }
 0x401   :  { %4219 = vst.msk [vmem:[%s8420_s6 + $0x440] sm:$0xff] %vm4082_vm2, %v3963_v38  ;;  %v3702_v3 = vadd.f32 %v3701_v37, %v3157_v15  ;;  %v1192_v37 = vld [vmem:[%s8419_s4 + $0x448] sm:$0xff] }
 0x402   :  { %v7718_v18 = vpop.f32.mrf.mxu2 }
 0x403   :  { %4132 = vst.msk [vmem:[%s8420_s6 + $0x188] sm:$0xff] %vm4082_vm2, %v3702_v3  ;;  %4448 = vmatmul.msk.f32.gmra.mxu1 %vm2463_vm1, %v1186_v54  ;;  %4536 = vmatmul.msk.f32.gmra.mxu3 %vm2463_vm1, %v1362_v44  ;;  %v1368_v54 = vld [vmem:[%s8419_s4 + $0x9c8] sm:$0xff]  ;;  %v1199_v3 = vld [vmem:[%s8419_s4 + $0x480] sm:$0xff] }
 0x404   :  { %v3168_v53 = vpop.f32.mrf.mxu0 }
 0x406   :  { %v3965_v19 = vpop.f32.mrf.mxu3 }
 0x407   :  { %v3966_v60 = vadd.f32 %v3965_v19, %v3421_v12  ;;  %3215 = vmatmul.f32.gmra.mxu0 %v1193_v20  ;;  %3479 = vmatmul.f32.gmra.mxu2 %v1369_v42  ;;  %v3430_v20 = vadd.f32 %v7718_v18, %v2286_v55  ;;  %v3169_v12 = vadd.f32 %v3168_v53, %v6173_v40  ;;  %v2291_v40 = vpop.permute.xlu1 %2290 }
 0x408   :  { %v3704_v34 = vpop.f32.mrf.mxu1 }
 0x409   :  { %4220 = vst.msk [vmem:[%s8420_s6 + $0x448] sm:$0xff] %vm4082_vm2, %v3966_v60  ;;  %v3705_v50 = vadd.f32 %v3704_v34, %v3160_v9  ;;  %v1194_v60 = vld [vmem:[%s8419_s4 + $0x458] sm:$0xff] }
 0x40a   :  { %v7744_v23 = vpop.f32.mrf.mxu2  ;;  %v1370_v34 = vld [vmem:[%s8419_s4 + $0x9d8] sm:$0xff] }
 0x40b   :  { %4133 = vst.msk [vmem:[%s8420_s6 + $0x190] sm:$0xff] %vm4082_vm2, %v3705_v50  ;;  %4449 = vmatmul.msk.f32.gmra.mxu1 %vm2463_vm1, %v1188_v56  ;;  %4537 = vmatmul.msk.f32.gmra.mxu3 %vm2463_vm1, %v1364_v48  ;;  %v1201_v48 = vld [vmem:[%s8419_s4 + $0x490] sm:$0xff]  ;;  %v3433_v52 = vadd.f32 %v7744_v23, %v2291_v40 }
 0x40c   :  { %v3171_v26 = vpop.f32.mrf.mxu0  ;;  %v1377_v50 = vld [vmem:[%s8419_s4 + $0xa10] sm:$0xff] }
 0x40e   :  { %v3968_v16 = vpop.f32.mrf.mxu3 }
 0x40f   :  { %v3969_v22 = vadd.f32 %v3968_v16, %v3424_v8  ;;  %3218 = vmatmul.f32.gmra.mxu0 %v1195_v27  ;;  %3482 = vmatmul.f32.gmra.mxu2 %v1371_v47  ;;  %v3172_v47 = vadd.f32 %v3171_v26, %v6191_v30  ;;  %v2296_v30 = vpop.permute.xlu2 %2295 }
 0x410   :  { %v3707_v51 = vpop.f32.mrf.mxu1 }
 0x411   :  { %4221 = vst.msk [vmem:[%s8420_s6 + $0x450] sm:$0xff] %vm4082_vm2, %v3969_v22  ;;  %v3708_v24 = vadd.f32 %v3707_v51, %v3163_v49  ;;  %v1196_v49 = vld [vmem:[%s8419_s4 + $0x468] sm:$0xff] }
 0x412   :  { %v7770_v45 = vpop.f32.mrf.mxu2  ;;  %v1372_v22 = vld [vmem:[%s8419_s4 + $0x9e8] sm:$0xff] }
 0x413   :  { %4134 = vst.msk [vmem:[%s8420_s6 + $0x198] sm:$0xff] %vm4082_vm2, %v3708_v24  ;;  %4450 = vmatmul.msk.f32.gmra.mxu1 %vm2463_vm1, %v1190_v28  ;;  %4538 = vmatmul.msk.f32.gmra.mxu3 %vm2463_vm1, %v1366_v0  ;;  %v1203_v28 = vld [vmem:[%s8419_s4 + $0x4a0] sm:$0xff]  ;;  %v3436_v24 = vadd.f32 %v7770_v45, %v2296_v30 }
 0x414   :  { %v3174_v4 = vpop.f32.mrf.mxu0  ;;  %v1379_v0 = vld [vmem:[%s8419_s4 + $0xa20] sm:$0xff] }
 0x416   :  { %v3971_v2 = vpop.f32.mrf.mxu3 }
 0x417   :  { %v3972_v15 = vadd.f32 %v3971_v2, %v3427_v5  ;;  %3221 = vmatmul.f32.gmra.mxu0 %v1197_v35  ;;  %3485 = vmatmul.f32.gmra.mxu2 %v1373_v62  ;;  %v3175_v35 = vadd.f32 %v3174_v4, %v6181_v25  ;;  %v1198_v2 = vld [vmem:[%s8419_s4 + $0x478] sm:$0xff]  ;;  %v2301_v25 = vpop.permute.xlu0 %2300 }
 0x418   :  { %v3710_v38 = vpop.f32.mrf.mxu1 }
 0x419   :  { %4222 = vst.msk [vmem:[%s8420_s6 + $0x458] sm:$0xff] %vm4082_vm2, %v3972_v15  ;;  %v3711_v57 = vadd.f32 %v3710_v38, %v3166_v13  ;;  %v1374_v13 = vld [vmem:[%s8419_s4 + $0x9f8] sm:$0xff]  ;;  %v1205_v38 = vld [vmem:[%s8419_s4 + $0x4b0] sm:$0xff] }
 0x41a   :  { %v7796_v44 = vpop.f32.mrf.mxu2 }
 0x41b   :  { %4135 = vst.msk [vmem:[%s8420_s6 + $0x1a0] sm:$0xff] %vm4082_vm2, %v3711_v57  ;;  %4451 = vmatmul.msk.f32.gmra.mxu1 %vm2463_vm1, %v1192_v37  ;;  %4539 = vmatmul.msk.f32.gmra.mxu3 %vm2463_vm1, %v1368_v54  ;;  %v1381_v37 = vld [vmem:[%s8419_s4 + $0xa30] sm:$0xff]  ;;  %v3439_v54 = vadd.f32 %v7796_v44, %v2301_v25  ;;  %v1206_v25 = vld [vmem:[%s8419_s4 + $0x4b8] sm:$0xff] }
 0x41c   :  { %v3177_v36 = vpop.f32.mrf.mxu0 }
 0x41d   :  { %v3178_v55 = vadd.f32 %v3177_v36, %v6199_v58  ;;  %v2306_v58 = vpop.permute.xlu1 %2305 }
 0x41e   :  { %v3974_v42 = vpop.f32.mrf.mxu3 }
 0x41f   :  { %v3975_v19 = vadd.f32 %v3974_v42, %v3430_v20  ;;  %3224 = vmatmul.f32.gmra.mxu0 %v1199_v3  ;;  %3488 = vmatmul.f32.gmra.mxu2 %v1375_v32  ;;  %v1200_v20 = vld [vmem:[%s8419_s4 + $0x488] sm:$0xff] }
 0x420   :  { %v3713_v9 = vpop.f32.mrf.mxu1  ;;  %v1376_v42 = vld [vmem:[%s8419_s4 + $0xa08] sm:$0xff] }
 0x421   :  { %4223 = vst.msk [vmem:[%s8420_s6 + $0x460] sm:$0xff] %vm4082_vm2, %v3975_v19  ;;  %v3714_v18 = vadd.f32 %v3713_v9, %v3169_v12  ;;  %v1207_v19 = vld [vmem:[%s8419_s4 + $0x4c0] sm:$0xff] }
 0x422   :  { %v7822_v56 = vpop.f32.mrf.mxu2  ;;  %v1383_v9 = vld [vmem:[%s8419_s4 + $0xa40] sm:$0xff] }
 0x423   :  { %4136 = vst.msk [vmem:[%s8420_s6 + $0x1a8] sm:$0xff] %vm4082_vm2, %v3714_v18  ;;  %4452 = vmatmul.msk.f32.gmra.mxu1 %vm2463_vm1, %v1194_v60  ;;  %4540 = vmatmul.msk.f32.gmra.mxu3 %vm2463_vm1, %v1370_v34  ;;  %v3442_v60 = vadd.f32 %v7822_v56, %v2306_v58  ;;  %v1384_v58 = vld [vmem:[%s8419_s4 + $0xa48] sm:$0xff] }
 0x424   :  { %v3180_v53 = vpop.f32.mrf.mxu0 }
 0x425   :  { %v3181_v18 = vadd.f32 %v3180_v53, %v6217_v33  ;;  %v2311_v33 = vpop.permute.xlu2 %2310 }
 0x426   :  { %v3977_v27 = vpop.f32.mrf.mxu3 }
 0x427   :  { %v3978_v8 = vadd.f32 %v3977_v27, %v3433_v52  ;;  %3227 = vmatmul.f32.gmra.mxu0 %v1201_v48  ;;  %3491 = vmatmul.f32.gmra.mxu2 %v1377_v50  ;;  %v1202_v50 = vld [vmem:[%s8419_s4 + $0x498] sm:$0xff] }
 0x428   :  { %v3716_v16 = vpop.f32.mrf.mxu1  ;;  %v1378_v52 = vld [vmem:[%s8419_s4 + $0xa18] sm:$0xff] }
 0x429   :  { %4224 = vst.msk [vmem:[%s8420_s6 + $0x468] sm:$0xff] %vm4082_vm2, %v3978_v8  ;;  %v3717_v23 = vadd.f32 %v3716_v16, %v3172_v47  ;;  %v1209_v47 = vld [vmem:[%s8419_s4 + $0x4d0] sm:$0xff] }
 0x42a   :  { %v7848_v51 = vpop.f32.mrf.mxu2  ;;  %v1385_v8 = vld [vmem:[%s8419_s4 + $0xa50] sm:$0xff] }
 0x42b   :  { %4137 = vst.msk [vmem:[%s8420_s6 + $0x1b0] sm:$0xff] %vm4082_vm2, %v3717_v23  ;;  %4453 = vmatmul.msk.f32.gmra.mxu1 %vm2463_vm1, %v1196_v49  ;;  %4541 = vmatmul.msk.f32.gmra.mxu3 %vm2463_vm1, %v1372_v22  ;;  %v3445_v16 = vadd.f32 %v7848_v51, %v2311_v33 }
 0x42c   :  { %v3183_v26 = vpop.f32.mrf.mxu0 }
 0x42d   :  { %v3184_v22 = vadd.f32 %v3183_v26, %v6201_v46  ;;  %v2316_v46 = vpop.permute.xlu0 %2315 }
 0x42e   :  { %v3980_v41 = vpop.f32.mrf.mxu3 }
 0x42f   :  { %v3981_v62 = vadd.f32 %v3980_v41, %v3436_v24  ;;  %3230 = vmatmul.f32.gmra.mxu0 %v1203_v28  ;;  %3494 = vmatmul.f32.gmra.mxu2 %v1379_v0  ;;  %v1204_v28 = vld [vmem:[%s8419_s4 + $0x4a8] sm:$0xff]  ;;  %v1211_v41 = vld [vmem:[%s8419_s4 + $0x4e0] sm:$0xff] }
 0x430   :  { %v3719_v5 = vpop.f32.mrf.mxu1  ;;  %v1380_v0 = vld [vmem:[%s8419_s4 + $0xa28] sm:$0xff] }
 0x431   :  { %4225 = vst.msk [vmem:[%s8420_s6 + $0x470] sm:$0xff] %vm4082_vm2, %v3981_v62  ;;  %v3720_v45 = vadd.f32 %v3719_v5, %v3175_v35  ;;  %v1387_v35 = vld [vmem:[%s8419_s4 + $0xa60] sm:$0xff] }
 0x432   :  { %v7874_v15 = vpop.f32.mrf.mxu2 }
 0x433   :  { %4138 = vst.msk [vmem:[%s8420_s6 + $0x1b8] sm:$0xff] %vm4082_vm2, %v3720_v45  ;;  %4454 = vmatmul.msk.f32.gmra.mxu1 %vm2463_vm1, %v1198_v2  ;;  %4542 = vmatmul.msk.f32.gmra.mxu3 %vm2463_vm1, %v1374_v13  ;;  %v3448_v62 = vadd.f32 %v7874_v15, %v2316_v46 }
 0x434   :  { %v3186_v4 = vpop.f32.mrf.mxu0 }
 0x435   :  { %v3187_v2 = vadd.f32 %v3186_v4, %v6219_v31  ;;  %v2321_v31 = vpop.permute.xlu1 %2320 }
 0x436   :  { %v3983_v57 = vpop.f32.mrf.mxu3 }
 0x437   :  { %v3984_v3 = vadd.f32 %v3983_v57, %v3439_v54  ;;  %3233 = vmatmul.f32.gmra.mxu0 %v1205_v38  ;;  %3497 = vmatmul.f32.gmra.mxu2 %v1381_v37  ;;  %v1382_v38 = vld [vmem:[%s8419_s4 + $0xa38] sm:$0xff]  ;;  %v1213_v54 = vld [vmem:[%s8419_s4 + $0x4f0] sm:$0xff] }
 0x438   :  { %v3722_v32 = vpop.f32.mrf.mxu1  ;;  %v1389_v57 = vld [vmem:[%s8419_s4 + $0xa70] sm:$0xff] }
 0x439   :  { %4226 = vst.msk [vmem:[%s8420_s6 + $0x478] sm:$0xff] %vm4082_vm2, %v3984_v3  ;;  %v3723_v44 = vadd.f32 %v3722_v32, %v3178_v55 }
 0x43a   :  { %v7900_v12 = vpop.f32.mrf.mxu2 }
 0x43b   :  { %4139 = vst.msk [vmem:[%s8420_s6 + $0x1c0] sm:$0xff] %vm4082_vm2, %v3723_v44  ;;  %4455 = vmatmul.msk.f32.gmra.mxu1 %vm2463_vm1, %v1200_v20  ;;  %4543 = vmatmul.msk.f32.gmra.mxu3 %vm2463_vm1, %v1376_v42  ;;  %v3451_v55 = vadd.f32 %v7900_v12, %v2321_v31  ;;  %v1208_v44 = vld [vmem:[%s8419_s4 + $0x4c8] sm:$0xff]  ;;  %v1221_v31 = vld [vmem:[%s8419_s4 + $0x530] sm:$0xff] }
 0x43c   :  { %v3189_v36 = vpop.f32.mrf.mxu0 }
 0x43d   :  { %v3190_v32 = vadd.f32 %v3189_v36, %v6237_v7  ;;  %v2326_v7 = vpop.permute.xlu2 %2325 }
 0x43e   :  { %v3986_v34 = vpop.f32.mrf.mxu3 }
 0x43f   :  { %v3987_v40 = vadd.f32 %v3986_v34, %v3442_v60  ;;  %3236 = vmatmul.f32.gmra.mxu0 %v1207_v19  ;;  %3500 = vmatmul.f32.gmra.mxu2 %v1383_v9  ;;  %v1215_v9 = vld [vmem:[%s8419_s4 + $0x500] sm:$0xff] }
 0x440   :  { %v3725_v48 = vpop.f32.mrf.mxu1  ;;  %v1391_v60 = vld [vmem:[%s8419_s4 + $0xa80] sm:$0xff] }
 0x441   :  { %4227 = vst.msk [vmem:[%s8420_s6 + $0x480] sm:$0xff] %vm4082_vm2, %v3987_v40  ;;  %v3726_v56 = vadd.f32 %v3725_v48, %v3181_v18 }
 0x442   :  { %v7926_v27 = vpop.f32.mrf.mxu2 }
 0x443   :  { %4140 = vst.msk [vmem:[%s8420_s6 + $0x1c8] sm:$0xff] %vm4082_vm2, %v3726_v56  ;;  %4456 = vmatmul.msk.f32.gmra.mxu1 %vm2463_vm1, %v1202_v50  ;;  %4544 = vmatmul.msk.f32.gmra.mxu3 %vm2463_vm1, %v1378_v52  ;;  %v3454_v34 = vadd.f32 %v7926_v27, %v2326_v7  ;;  %v1210_v52 = vld [vmem:[%s8419_s4 + $0x4d8] sm:$0xff]  ;;  %v1399_v7 = vld [vmem:[%s8419_s4 + $0xac0] sm:$0xff] }
 0x444   :  { %v3192_v53 = vpop.f32.mrf.mxu0  ;;  %v1386_v56 = vld [vmem:[%s8419_s4 + $0xa58] sm:$0xff] }
 0x445   :  { %v3193_v40 = vadd.f32 %v3192_v53, %v6227_v17  ;;  %v2331_v17 = vpop.permute.xlu0 %2330 }
 0x446   :  { %v3989_v49 = vpop.f32.mrf.mxu3 }
 0x447   :  { %v3990_v23 = vadd.f32 %v3989_v49, %v3445_v16  ;;  %3239 = vmatmul.f32.gmra.mxu0 %v1209_v47  ;;  %3503 = vmatmul.f32.gmra.mxu2 %v1385_v8  ;;  %v1217_v47 = vld [vmem:[%s8419_s4 + $0x510] sm:$0xff] }
 0x448   :  { %v3728_v30 = vpop.f32.mrf.mxu1  ;;  %v1393_v8 = vld [vmem:[%s8419_s4 + $0xa90] sm:$0xff] }
 0x449   :  { %4228 = vst.msk [vmem:[%s8420_s6 + $0x488] sm:$0xff] %vm4082_vm2, %v3990_v23  ;;  %v3729_v51 = vadd.f32 %v3728_v30, %v3184_v22 }
 0x44a   :  { %v7952_v24 = vpop.f32.mrf.mxu2 }
 0x44b   :  { %4141 = vst.msk [vmem:[%s8420_s6 + $0x1d0] sm:$0xff] %vm4082_vm2, %v3729_v51  ;;  %4457 = vmatmul.msk.f32.gmra.mxu1 %vm2463_vm1, %v1204_v28  ;;  %4545 = vmatmul.msk.f32.gmra.mxu3 %vm2463_vm1, %v1380_v0  ;;  %v3457_v16 = vadd.f32 %v7952_v24, %v2331_v17  ;;  %v1212_v28 = vld [vmem:[%s8419_s4 + $0x4e8] sm:$0xff] }
 0x44c   :  { %v3195_v26 = vpop.f32.mrf.mxu0  ;;  %v1388_v0 = vld [vmem:[%s8419_s4 + $0xa68] sm:$0xff] }
 0x44d   :  { %v3196_v22 = vadd.f32 %v3195_v26, %v6245_v61  ;;  %v2336_v61 = vpop.permute.xlu1 %2335  ;;  %v1219_v26 = vld [vmem:[%s8419_s4 + $0x520] sm:$0xff] }
 0x44e   :  { %v3992_v5 = vpop.f32.mrf.mxu3 }
 0x44f   :  { %v3993_v13 = vadd.f32 %v3992_v5, %v3448_v62  ;;  %3242 = vmatmul.f32.gmra.mxu0 %v1211_v41  ;;  %3506 = vmatmul.f32.gmra.mxu2 %v1387_v35  ;;  %v1395_v41 = vld [vmem:[%s8419_s4 + $0xaa0] sm:$0xff] }
 0x450   :  { %v3731_v45 = vpop.f32.mrf.mxu1 }
 0x451   :  { %4229 = vst.msk [vmem:[%s8420_s6 + $0x490] sm:$0xff] %vm4082_vm2, %v3993_v13  ;;  %v3732_v15 = vadd.f32 %v3731_v45, %v3187_v2  ;;  %v1214_v45 = vld [vmem:[%s8419_s4 + $0x4f8] sm:$0xff] }
 0x452   :  { %v7978_v37 = vpop.f32.mrf.mxu2 }
 0x453   :  { %4142 = vst.msk [vmem:[%s8420_s6 + $0x1d8] sm:$0xff] %vm4082_vm2, %v3732_v15  ;;  %4458 = vmatmul.msk.f32.gmra.mxu1 %vm2463_vm1, %v1206_v25  ;;  %4546 = vmatmul.msk.f32.gmra.mxu3 %vm2463_vm1, %v1382_v38  ;;  %v3460_v35 = vadd.f32 %v7978_v37, %v2336_v61  ;;  %v1390_v25 = vld [vmem:[%s8419_s4 + $0xa78] sm:$0xff] }
 0x454   :  { %v3198_v4 = vpop.f32.mrf.mxu0 }
 0x455   :  { %v3199_v5 = vadd.f32 %v3198_v4, %v6263_v63  ;;  %v2341_v63 = vpop.permute.xlu2 %2340  ;;  %v1397_v4 = vld [vmem:[%s8419_s4 + $0xab0] sm:$0xff] }
 0x456   :  { %v3995_v3 = vpop.f32.mrf.mxu3 }
 0x457   :  { %v3996_v20 = vadd.f32 %v3995_v3, %v3451_v55  ;;  %3245 = vmatmul.f32.gmra.mxu0 %v1213_v54  ;;  %3509 = vmatmul.f32.gmra.mxu2 %v1389_v57 }
 0x458   :  { %v3734_v42 = vpop.f32.mrf.mxu1 }
 0x459   :  { %4230 = vst.msk [vmem:[%s8420_s6 + $0x498] sm:$0xff] %vm4082_vm2, %v3996_v20  ;;  %v3735_v12 = vadd.f32 %v3734_v42, %v3190_v32  ;;  %v1216_v20 = vld [vmem:[%s8419_s4 + $0x508] sm:$0xff] }
 0x45a   :  { %v8004_v19 = vpop.f32.mrf.mxu2  ;;  %v1392_v42 = vld [vmem:[%s8419_s4 + $0xa88] sm:$0xff] }
 0x45b   :  { %4143 = vst.msk [vmem:[%s8420_s6 + $0x1e0] sm:$0xff] %vm4082_vm2, %v3735_v12  ;;  %4459 = vmatmul.msk.f32.gmra.mxu1 %vm2463_vm1, %v1208_v44  ;;  %4547 = vmatmul.msk.f32.gmra.mxu3 %vm2463_vm1, %v1384_v58  ;;  %v3463_v54 = vadd.f32 %v8004_v19, %v2341_v63  ;;  %v1223_v19 = vld [vmem:[%s8419_s4 + $0x540] sm:$0xff] }
 0x45c   :  { %v3201_v36 = vpop.f32.mrf.mxu0 }
 0x45d   :  { %v3202_v55 = vadd.f32 %v3201_v36, %v6249_v29  ;;  %v2346_v29 = vpop.permute.xlu0 %2345 }
 0x45e   :  { %v3998_v18 = vpop.f32.mrf.mxu3 }
 0x45f   :  { %v3999_v48 = vadd.f32 %v3998_v18, %v3454_v34  ;;  %3248 = vmatmul.f32.gmra.mxu0 %v1215_v9  ;;  %3512 = vmatmul.f32.gmra.mxu2 %v1391_v60 }
 0x460   :  { %v3737_v50 = vpop.f32.mrf.mxu1 }
 0x461   :  { %4231 = vst.msk [vmem:[%s8420_s6 + $0x4a0] sm:$0xff] %vm4082_vm2, %v3999_v48  ;;  %v3738_v27 = vadd.f32 %v3737_v50, %v3193_v40  ;;  %v1218_v40 = vld [vmem:[%s8419_s4 + $0x518] sm:$0xff] }
 0x462   :  { %v8030_v33 = vpop.f32.mrf.mxu2  ;;  %v1394_v48 = vld [vmem:[%s8419_s4 + $0xa98] sm:$0xff] }
 0x463   :  { %4144 = vst.msk [vmem:[%s8420_s6 + $0x1e8] sm:$0xff] %vm4082_vm2, %v3738_v27  ;;  %4460 = vmatmul.msk.f32.gmra.mxu1 %vm2463_vm1, %v1210_v52  ;;  %4548 = vmatmul.msk.f32.gmra.mxu3 %vm2463_vm1, %v1386_v56  ;;  %v3466_v36 = vadd.f32 %v8030_v33, %v2346_v29  ;;  %v1225_v27 = vld [vmem:[%s8419_s4 + $0x550] sm:$0xff]  ;;  %v1226_v29 = vld [vmem:[%s8419_s4 + $0x558] sm:$0xff] }
 0x464   :  { %v3204_v53 = vpop.f32.mrf.mxu0  ;;  %v1401_v33 = vld [vmem:[%s8419_s4 + $0xad0] sm:$0xff] }
 0x465   :  { %v3205_v60 = vadd.f32 %v3204_v53, %v6267_v11  ;;  %v2351_v11 = vpop.permute.xlu1 %2350 }
 0x466   :  { %v4001_v49 = vpop.f32.mrf.mxu3 }
 0x467   :  { %v4002_v23 = vadd.f32 %v4001_v49, %v3457_v16  ;;  %3251 = vmatmul.f32.gmra.mxu0 %v1217_v47  ;;  %3515 = vmatmul.f32.gmra.mxu2 %v1393_v8  ;;  %v1220_v49 = vld [vmem:[%s8419_s4 + $0x528] sm:$0xff] }
 0x468   :  { %v3740_v30 = vpop.f32.mrf.mxu1 }
 0x469   :  { %4232 = vst.msk [vmem:[%s8420_s6 + $0x4a8] sm:$0xff] %vm4082_vm2, %v4002_v23  ;;  %v3741_v51 = vadd.f32 %v3740_v30, %v3196_v22  ;;  %v1396_v22 = vld [vmem:[%s8419_s4 + $0xaa8] sm:$0xff] }
 0x46a   :  { %v8056_v24 = vpop.f32.mrf.mxu2 }
 0x46b   :  { %4145 = vst.msk [vmem:[%s8420_s6 + $0x1f0] sm:$0xff] %vm4082_vm2, %v3741_v51  ;;  %4461 = vmatmul.msk.f32.gmra.mxu1 %vm2463_vm1, %v1212_v28  ;;  %4549 = vmatmul.msk.f32.gmra.mxu3 %vm2463_vm1, %v1388_v0  ;;  %v3469_v17 = vadd.f32 %v8056_v24, %v2351_v11  ;;  %v1227_v0 = vld [vmem:[%s8419_s4 + $0x560] sm:$0xff] }
 0x46c   :  { %v3207_v46 = vpop.f32.mrf.mxu0  ;;  %v1403_v51 = vld [vmem:[%s8419_s4 + $0xae0] sm:$0xff] }
 0x46d   :  { %v3208_v47 = vadd.f32 %v3207_v46, %v6285_v39  ;;  %v2356_v39 = vpop.permute.xlu2 %2355 }
 0x46e   :  { %v4004_v62 = vpop.f32.mrf.mxu3 }
 0x46f   :  { %v4005_v2 = vadd.f32 %v4004_v62, %v3460_v35  ;;  %3254 = vmatmul.f32.gmra.mxu0 %v1219_v26  ;;  %3518 = vmatmul.f32.gmra.mxu2 %v1395_v41  ;;  %v1222_v35 = vld [vmem:[%s8419_s4 + $0x538] sm:$0xff] }
 0x470   :  { %v3743_v13 = vpop.f32.mrf.mxu1  ;;  %v1398_v62 = vld [vmem:[%s8419_s4 + $0xab8] sm:$0xff] }
 0x471   :  { %4233 = vst.msk [vmem:[%s8420_s6 + $0x4b0] sm:$0xff] %vm4082_vm2, %v4005_v2  ;;  %v3744_v38 = vadd.f32 %v3743_v13, %v3199_v5 }
 0x472   :  { %v8082_v15 = vpop.f32.mrf.mxu2 }
 0x473   :  { %4146 = vst.msk [vmem:[%s8420_s6 + $0x1f8] sm:$0xff] %vm4082_vm2, %v3744_v38  ;;  %4462 = vmatmul.msk.f32.gmra.mxu1 %vm2463_vm1, %v1214_v45  ;;  %4550 = vmatmul.msk.f32.gmra.mxu3 %vm2463_vm1, %v1390_v25  ;;  %v3472_v24 = vadd.f32 %v8082_v15, %v2356_v39  ;;  %v1229_v45 = vld [vmem:[%s8419_s4 + $0x570] sm:$0xff] }
 0x474   :  { %v3210_v37 = vpop.f32.mrf.mxu0  ;;  %v1405_v25 = vld [vmem:[%s8419_s4 + $0xaf0] sm:$0xff] }
 0x475   :  { %v3211_v46 = vadd.f32 %v3210_v37, %v6275_v1  ;;  %v2361_v1 = vpop.permute.xlu0 %2360 }
 0x476   :  { %v4007_v57 = vpop.f32.mrf.mxu3 }
 0x477   :  { %v4008_v3 = vadd.f32 %v4007_v57, %v3463_v54  ;;  %3257 = vmatmul.f32.gmra.mxu0 %v1221_v31  ;;  %3521 = vmatmul.f32.gmra.mxu2 %v1397_v4  ;;  %v1224_v4 = vld [vmem:[%s8419_s4 + $0x548] sm:$0xff] }
 0x478   :  { %v3746_v32 = vpop.f32.mrf.mxu1  ;;  %v1400_v54 = vld [vmem:[%s8419_s4 + $0xac8] sm:$0xff] }
 0x479   :  { %4234 = vst.msk [vmem:[%s8420_s6 + $0x4b8] sm:$0xff] %vm4082_vm2, %v4008_v3  ;;  %v3747_v44 = vadd.f32 %v3746_v32, %v3202_v55 }
 0x47a   :  { %v8108_v58 = vpop.f32.mrf.mxu2 }
 0x47b   :  { %4147 = vst.msk [vmem:[%s8420_s6 + $0x200] sm:$0xff] %vm4082_vm2, %v3747_v44  ;;  %4463 = vmatmul.msk.f32.gmra.mxu1 %vm2463_vm1, %v1216_v20  ;;  %4551 = vmatmul.msk.f32.gmra.mxu3 %vm2463_vm1, %v1392_v42  ;;  %v3475_v38 = vadd.f32 %v8108_v58, %v2361_v1 }
 0x47c   :  { %v3213_v12 = vpop.f32.mrf.mxu0 }
 0x47d   :  { %v3214_v63 = vadd.f32 %v3213_v12, %v6293_v43  ;;  %v2366_v43 = vpop.permute.xlu1 %2365  ;;  %v1402_v12 = vld [vmem:[%s8419_s4 + $0xad8] sm:$0xff] }
 0x47e   :  { %v4010_v9 = vpop.f32.mrf.mxu3 }
 0x47f   :  { %v4011_v34 = vadd.f32 %v4010_v9, %v3466_v36  ;;  %3260 = vmatmul.f32.gmra.mxu0 %v1223_v19  ;;  %3524 = vmatmul.f32.gmra.mxu2 %v1399_v7 }
 0x480   :  { %v3749_v18 = vpop.f32.mrf.mxu1 }
 0x481   :  { %4235 = vst.msk [vmem:[%s8420_s6 + $0x4c0] sm:$0xff] %vm4082_vm2, %v4011_v34  ;;  %v3750_v50 = vadd.f32 %v3749_v18, %v3205_v60 }
 0x482   :  { %v8134_v52 = vpop.f32.mrf.mxu2 }
 0x483   :  { %4148 = vst.msk [vmem:[%s8420_s6 + $0x208] sm:$0xff] %vm4082_vm2, %v3750_v50  ;;  %4464 = vmatmul.msk.f32.gmra.mxu1 %vm2463_vm1, %v1218_v40  ;;  %4552 = vmatmul.msk.f32.gmra.mxu3 %vm2463_vm1, %v1394_v48  ;;  %v3478_v32 = vadd.f32 %v8134_v52, %v2366_v43  ;;  %v1228_v48 = vld [vmem:[%s8419_s4 + $0x568] sm:$0xff] }
 0x484   :  { %v3216_v56 = vpop.f32.mrf.mxu0  ;;  %v1404_v50 = vld [vmem:[%s8419_s4 + $0xae8] sm:$0xff] }
 0x485   :  { %v3217_v42 = vadd.f32 %v3216_v56, %v6311_v59  ;;  %v2371_v59 = vpop.permute.xlu2 %2370  ;;  %v8518_v43 = vld [vmem:[#allocation11_spill] sm:$0xff] }
 0x486   :  { %v4013_v53 = vpop.f32.mrf.mxu3 }
 0x487   :  { %v4014_v8 = vadd.f32 %v4013_v53, %v3469_v17  ;;  %3263 = vmatmul.f32.gmra.mxu0 %v1225_v27  ;;  %3527 = vmatmul.f32.gmra.mxu2 %v1401_v33 }
 0x488   :  { %v3752_v16 = vpop.f32.mrf.mxu1 }
 0x489   :  { %4236 = vst.msk [vmem:[%s8420_s6 + $0x4c8] sm:$0xff] %vm4082_vm2, %v4014_v8  ;;  %v3753_v23 = vadd.f32 %v3752_v16, %v3208_v47  ;;  %v1230_v8 = vld [vmem:[%s8419_s4 + $0x578] sm:$0xff] }
 0x48a   :  { %v3480_v30 = vpop.f32.mrf.mxu2  ;;  %v1406_v16 = vld [vmem:[%s8419_s4 + $0xaf8] sm:$0xff] }
 0x48b   :  { %4149 = vst.msk [vmem:[%s8420_s6 + $0x210] sm:$0xff] %vm4082_vm2, %v3753_v23  ;;  %4465 = vmatmul.msk.f32.gmra.mxu1 %vm2463_vm1, %v1220_v49  ;;  %4553 = vmatmul.msk.f32.gmra.mxu3 %vm2463_vm1, %v1396_v22  ;;  %v3481_v9 = vadd.f32 %v3480_v30, %v2371_v59 }
 0x48c   :  { %v3219_v28 = vpop.f32.mrf.mxu0 }
 0x48d   :  { %v3220_v34 = vadd.f32 %v3219_v28, %v6295_v21  ;;  %v2376_v21 = vpop.permute.xlu0 %2375 }
 0x48e   :  { %v4016_v61 = vpop.f32.mrf.mxu3 }
 0x48f   :  { %v4017_v26 = vadd.f32 %v4016_v61, %v3472_v24  ;;  %3266 = vmatmul.f32.gmra.mxu0 %v1227_v0  ;;  %3530 = vmatmul.f32.gmra.mxu2 %v1403_v51 }
 0x490   :  { %v3755_v41 = vpop.f32.mrf.mxu1 }
 0x491   :  { %4237 = vst.msk [vmem:[%s8420_s6 + $0x4d0] sm:$0xff] %vm4082_vm2, %v4017_v26  ;;  %v3756_v5 = vadd.f32 %v3755_v41, %v3211_v46  ;;  %v2386_v46 = vpop.permute.xlu2 %2385 }
 0x492   :  { %v3483_v2 = vpop.f32.mrf.mxu2 }
 0x493   :  { %4150 = vst.msk [vmem:[%s8420_s6 + $0x218] sm:$0xff] %vm4082_vm2, %v3756_v5  ;;  %4466 = vmatmul.msk.f32.gmra.mxu1 %vm2463_vm1, %v1222_v35  ;;  %4554 = vmatmul.msk.f32.gmra.mxu3 %vm2463_vm1, %v1398_v62  ;;  %v3484_v27 = vadd.f32 %v3483_v2, %v2376_v21 }
 0x494   :  { %v3222_v13 = vpop.f32.mrf.mxu0 }
 0x495   :  { %v3223_v17 = vadd.f32 %v3222_v13, %v6313_v10  ;;  %v2381_v10 = vpop.permute.xlu1 %2380  ;;  %v2391_v1 = vpop.permute.xlu0 %2390 }
 0x496   :  { %v4019_v15 = vpop.f32.mrf.mxu3 }
 0x497   :  { %v4020_v37 = vadd.f32 %v4019_v15, %v3475_v38  ;;  %3269 = vmatmul.f32.gmra.mxu0 %v1229_v45  ;;  %3533 = vmatmul.f32.gmra.mxu2 %v1405_v25  ;;  %v8517_v38 = vld [vmem:[#allocation6_spill] sm:$0xff] }
 0x498   :  { %v3758_v31 = vpop.f32.mrf.mxu1 }
 0x499   :  { %4238 = vst.msk [vmem:[%s8420_s6 + $0x4d8] sm:$0xff] %vm4082_vm2, %v4020_v37  ;;  %v3759_v57 = vadd.f32 %v3758_v31, %v3214_v63 }
 0x49a   :  { %v3486_v55 = vpop.f32.mrf.mxu2 }
 0x49b   :  { %4151 = vst.msk [vmem:[%s8420_s6 + $0x220] sm:$0xff] %vm4082_vm2, %v3759_v57  ;;  %4467 = vmatmul.msk.f32.gmra.mxu1 %vm2463_vm1, %v1224_v4  ;;  %4555 = vmatmul.msk.f32.gmra.mxu3 %vm2463_vm1, %v1400_v54  ;;  %v3487_v30 = vadd.f32 %v3486_v55, %v2381_v10 }
 0x49c   :  { %v3225_v3 = vpop.f32.mrf.mxu0 }
 0x49d   :  { %v3226_v28 = vadd.f32 %v3225_v3, %v6331_v14  ;;  %v2396_v4 = vpop.permute.xlu1 %2395 }
 0x49e   :  { %v4022_v20 = vpop.f32.mrf.mxu3 }
 0x49f   :  { %v4023_v44 = vadd.f32 %v4022_v20, %v3478_v32 }
 0x4a0   :  { %v3761_v58 = vpop.f32.mrf.mxu1 }
 0x4a1   :  { %4239 = vst.msk [vmem:[%s8420_s6 + $0x4e0] sm:$0xff] %vm4082_vm2, %v4023_v44  ;;  %v3762_v19 = vadd.f32 %v3761_v58, %v3217_v42  ;;  %v2401_v58 = vpop.permute.xlu2 %2400 }
 0x4a2   :  { %v3489_v7 = vpop.f32.mrf.mxu2 }
 0x4a3   :  { %4152 = vst.msk [vmem:[%s8420_s6 + $0x228] sm:$0xff] %vm4082_vm2, %v3762_v19  ;;  %4468 = vmatmul.msk.f32.gmra.mxu1 %vm2463_vm1, %v1226_v29  ;;  %4556 = vmatmul.msk.f32.gmra.mxu3 %vm2463_vm1, %v1402_v12  ;;  %v3490_v26 = vadd.f32 %v3489_v7, %v2386_v46  ;;  %v8519_v19 = vld [vmem:[#allocation7_spill] sm:$0xff] }
 0x4a4   :  { %v3228_v36 = vpop.f32.mrf.mxu0 }
 0x4a5   :  { %v3229_v14 = vadd.f32 %v3228_v36, %v6321_v6 }
 0x4a6   :  { %v4025_v60 = vpop.f32.mrf.mxu3 }
 0x4a7   :  { %v4026_v18 = vadd.f32 %v4025_v60, %v3481_v9 }
 0x4a8   :  { %v3764_v40 = vpop.f32.mrf.mxu1 }
 0x4a9   :  { %4240 = vst.msk [vmem:[%s8420_s6 + $0x4e8] sm:$0xff] %vm4082_vm2, %v4026_v18  ;;  %v3765_v52 = vadd.f32 %v3764_v40, %v3220_v34  ;;  %v2406_v34 = vpop.permute.xlu0 %2405 }
 0x4aa   :  { %v3492_v11 = vpop.f32.mrf.mxu2 }
 0x4ab   :  { %4153 = vst.msk [vmem:[%s8420_s6 + $0x230] sm:$0xff] %vm4082_vm2, %v3765_v52  ;;  %4469 = vmatmul.msk.f32.gmra.mxu1 %vm2463_vm1, %v1228_v48  ;;  %4557 = vmatmul.msk.f32.gmra.mxu3 %vm2463_vm1, %v1404_v50  ;;  %v3493_v45 = vadd.f32 %v3492_v11, %v2391_v1  ;;  %v8520_v50 = vld [vmem:[#allocation17_spill] sm:$0xff] }
 0x4ac   :  { %v3231_v56 = vpop.f32.mrf.mxu0 }
 0x4ad   :  { %v3232_v15 = vadd.f32 %v3231_v56, %v8517_v38 }
 0x4ae   :  { %v4028_v33 = vpop.f32.mrf.mxu3 }
 0x4af   :  { %v4029_v53 = vadd.f32 %v4028_v33, %v3484_v27  ;;  %v2411_v33 = vpop.permute.xlu1 %2410 }
 0x4b0   :  { %v3767_v47 = vpop.f32.mrf.mxu1 }
 0x4b1   :  { %4241 = vst.msk [vmem:[%s8420_s6 + $0x4f0] sm:$0xff] %vm4082_vm2, %v4029_v53  ;;  %v3768_v49 = vadd.f32 %v3767_v47, %v3223_v17 }
 0x4b2   :  { %v3495_v22 = vpop.f32.mrf.mxu2 }
 0x4b3   :  { %4154 = vst.msk [vmem:[%s8420_s6 + $0x238] sm:$0xff] %vm4082_vm2, %v3768_v49  ;;  %4470 = vmatmul.msk.f32.gmra.mxu1 %vm2463_vm1, %v1230_v8  ;;  %4558 = vmatmul.msk.f32.gmra.mxu3 %vm2463_vm1, %v1406_v16  ;;  %v3496_v54 = vadd.f32 %v3495_v22, %v2396_v4  ;;  %v8521_v8 = vld [vmem:[#allocation3_spill] sm:$0xff] }
 0x4b4   :  { %v3234_v23 = vpop.f32.mrf.mxu0 }
 0x4b5   :  { %v3235_v3 = vadd.f32 %v3234_v23, %v8518_v43  ;;  %v2416_v23 = vpop.permute.xlu2 %2415 }
 0x4b6   :  { %v4031_v39 = vpop.f32.mrf.mxu3 }
 0x4b7   :  { %v4032_v0 = vadd.f32 %v4031_v39, %v3487_v30  ;;  %v2426_v38 = vpop.permute.xlu1 %2425 }
 0x4b8   :  { %v3770_v51 = vpop.f32.mrf.mxu1 }
 0x4b9   :  { %4242 = vst.msk [vmem:[%s8420_s6 + $0x4f8] sm:$0xff] %vm4082_vm2, %v4032_v0  ;;  %v3771_v24 = vadd.f32 %v3770_v51, %v3226_v28  ;;  %v8522_v0 = vld [vmem:[#allocation2_spill] sm:$0xff] }
 0x4ba   :  { %v3498_v61 = vpop.f32.mrf.mxu2 }
 0x4bb   :  { %4155 = vst.msk [vmem:[%s8420_s6 + $0x240] sm:$0xff] %vm4082_vm2, %v3771_v24  ;;  %v3499_v29 = vadd.f32 %v3498_v61, %v2401_v58 }
 0x4bc   :  { %v3237_v41 = vpop.f32.mrf.mxu0 }
 0x4bd   :  { %v3238_v7 = vadd.f32 %v3237_v41, %v8519_v19  ;;  %v2421_v41 = vpop.permute.xlu0 %2420 }
 0x4be   :  { %v4034_v35 = vpop.f32.mrf.mxu3 }
 0x4bf   :  { %v4035_v62 = vadd.f32 %v4034_v35, %v3490_v26 }
 0x4c0   :  { %v3773_v5 = vpop.f32.mrf.mxu1 }
 0x4c1   :  { %4243 = vst.msk [vmem:[%s8420_s6 + $0x500] sm:$0xff] %vm4082_vm2, %v4035_v62  ;;  %v3774_v2 = vadd.f32 %v3773_v5, %v3229_v14  ;;  %v8523_v5 = vld [vmem:[#allocation8_spill] sm:$0xff] }
 0x4c2   :  { %v3501_v13 = vpop.f32.mrf.mxu2 }
 0x4c3   :  { %4156 = vst.msk [vmem:[%s8420_s6 + $0x248] sm:$0xff] %vm4082_vm2, %v3774_v2  ;;  %v3502_v40 = vadd.f32 %v3501_v13, %v2406_v34 }
 0x4c4   :  { %v3240_v63 = vpop.f32.mrf.mxu0 }
 0x4c5   :  { %v3241_v52 = vadd.f32 %v3240_v63, %v8520_v50  ;;  %v8524_v63 = vld [vmem:[#allocation4_spill] sm:$0xff]  ;;  %v2436_v19 = vpop.permute.xlu0 %2435 }
 0x4c6   :  { %v4037_v25 = vpop.f32.mrf.mxu3 }
 0x4c7   :  { %v4038_v6 = vadd.f32 %v4037_v25, %v3493_v45 }
 0x4c8   :  { %v3776_v37 = vpop.f32.mrf.mxu1 }
 0x4c9   :  { %4244 = vst.msk [vmem:[%s8420_s6 + $0x508] sm:$0xff] %vm4082_vm2, %v4038_v6  ;;  %v3777_v31 = vadd.f32 %v3776_v37, %v3232_v15 }
 0x4ca   :  { %v3504_v57 = vpop.f32.mrf.mxu2 }
 0x4cb   :  { %4157 = vst.msk [vmem:[%s8420_s6 + $0x250] sm:$0xff] %vm4082_vm2, %v3777_v31  ;;  %v3505_v17 = vadd.f32 %v3504_v57, %v2411_v33 }
 0x4cc   :  { %v3243_v44 = vpop.f32.mrf.mxu0 }
 0x4cd   :  { %v3244_v16 = vadd.f32 %v3243_v44, %v8521_v8 }
 0x4ce   :  { %v4040_v55 = vpop.f32.mrf.mxu3 }
 0x4cf   :  { %v4041_v32 = vadd.f32 %v4040_v55, %v3496_v54  ;;  %v2431_v55 = vpop.permute.xlu2 %2430 }
 0x4d0   :  { %v3779_v20 = vpop.f32.mrf.mxu1 }
 0x4d1   :  { %4245 = vst.msk [vmem:[%s8420_s6 + $0x510] sm:$0xff] %vm4082_vm2, %v4041_v32  ;;  %v3780_v42 = vadd.f32 %v3779_v20, %v3235_v3  ;;  %v8525_v20 = vld [vmem:[#allocation14_spill] sm:$0xff] }
 0x4d2   :  { %v3507_v36 = vpop.f32.mrf.mxu2 }
 0x4d3   :  { %4158 = vst.msk [vmem:[%s8420_s6 + $0x258] sm:$0xff] %vm4082_vm2, %v3780_v42  ;;  %v3508_v39 = vadd.f32 %v3507_v36, %v2416_v23 }
 0x4d4   :  { %v3246_v18 = vpop.f32.mrf.mxu0 }
 0x4d5   :  { %v3247_v51 = vadd.f32 %v3246_v18, %v8522_v0  ;;  %v2451_v0 = vpop.permute.xlu0 %2450 }
 0x4d6   :  { %v4043_v12 = vpop.f32.mrf.mxu3 }
 0x4d7   :  { %v4044_v59 = vadd.f32 %v4043_v12, %v3499_v29 }
 0x4d8   :  { %v3782_v9 = vpop.f32.mrf.mxu1 }
 0x4d9   :  { %4246 = vst.msk [vmem:[%s8420_s6 + $0x518] sm:$0xff] %vm4082_vm2, %v4044_v59  ;;  %v3783_v60 = vadd.f32 %v3782_v9, %v3238_v7  ;;  %v8526_v9 = vld [vmem:[#allocation12_spill] sm:$0xff] }
 0x4da   :  { %v3510_v27 = vpop.f32.mrf.mxu2 }
 0x4db   :  { %4159 = vst.msk [vmem:[%s8420_s6 + $0x260] sm:$0xff] %vm4082_vm2, %v3783_v60  ;;  %v3511_v35 = vadd.f32 %v3510_v27, %v2421_v41 }
 0x4dc   :  { %v3249_v53 = vpop.f32.mrf.mxu0 }
 0x4dd   :  { %v3250_v2 = vadd.f32 %v3249_v53, %v8523_v5 }
 0x4de   :  { %v4046_v48 = vpop.f32.mrf.mxu3 }
 0x4df   :  { %v4047_v11 = vadd.f32 %v4046_v48, %v3502_v40  ;;  %v2441_v48 = vpop.permute.xlu1 %2440 }
 0x4e0   :  { %v3785_v21 = vpop.f32.mrf.mxu1 }
 0x4e1   :  { %4247 = vst.msk [vmem:[%s8420_s6 + $0x520] sm:$0xff] %vm4082_vm2, %v4047_v11  ;;  %v3786_v56 = vadd.f32 %v3785_v21, %v3241_v52  ;;  %v8527_v21 = vld [vmem:[#allocation5_spill] sm:$0xff] }
 0x4e2   :  { %v3513_v30 = vpop.f32.mrf.mxu2 }
 0x4e3   :  { %4160 = vst.msk [vmem:[%s8420_s6 + $0x268] sm:$0xff] %vm4082_vm2, %v3786_v56  ;;  %v3514_v15 = vadd.f32 %v3513_v30, %v2426_v38 }
 0x4e4   :  { %v3252_v61 = vpop.f32.mrf.mxu0 }
 0x4e5   :  { %v3253_v37 = vadd.f32 %v3252_v61, %v8524_v63  ;;  %v8529_v61 = vld [vmem:[#allocation13_spill] sm:$0xff] }
 0x4e6   :  { %v4049_v47 = vpop.f32.mrf.mxu3 }
 0x4e7   :  { %v4050_v49 = vadd.f32 %v4049_v47, %v3505_v17  ;;  %v2446_v47 = vpop.permute.xlu2 %2445 }
 0x4e8   :  { %v3788_v22 = vpop.f32.mrf.mxu1 }
 0x4e9   :  { %4248 = vst.msk [vmem:[%s8420_s6 + $0x528] sm:$0xff] %vm4082_vm2, %v4050_v49  ;;  %v3789_v10 = vadd.f32 %v3788_v22, %v3244_v16  ;;  %v8528_v22 = vld [vmem:[#allocation9_spill] sm:$0xff] }
 0x4ea   :  { %v3516_v14 = vpop.f32.mrf.mxu2 }
 0x4eb   :  { %4161 = vst.msk [vmem:[%s8420_s6 + $0x270] sm:$0xff] %vm4082_vm2, %v3789_v10  ;;  %v3517_v3 = vadd.f32 %v3516_v14, %v2431_v55 }
 0x4ec   :  { %v3255_v25 = vpop.f32.mrf.mxu0 }
 0x4ed   :  { %v3256_v42 = vadd.f32 %v3255_v25, %v8525_v20 }
 0x4ee   :  { %v4052_v28 = vpop.f32.mrf.mxu3 }
 0x4ef   :  { %v4053_v24 = vadd.f32 %v4052_v28, %v3508_v39  ;;  %v2461_v63 = vpop.permute.xlu2 %2460 }
 0x4f0   :  { %v3791_v46 = vpop.f32.mrf.mxu1 }
 0x4f1   :  { %4249 = vst.msk [vmem:[%s8420_s6 + $0x530] sm:$0xff] %vm4082_vm2, %v4053_v24  ;;  %v3792_v26 = vadd.f32 %v3791_v46, %v3247_v51 }
 0x4f2   :  { %v3519_v4 = vpop.f32.mrf.mxu2 }
 0x4f3   :  { %4162 = vst.msk [vmem:[%s8420_s6 + $0x278] sm:$0xff] %vm4082_vm2, %v3792_v26  ;;  %v3520_v7 = vadd.f32 %v3519_v4, %v2436_v19 }
 0x4f4   :  { %v3258_v43 = vpop.f32.mrf.mxu0 }
 0x4f5   :  { %v3259_v60 = vadd.f32 %v3258_v43, %v8526_v9 }
 0x4f6   :  { %v4055_v62 = vpop.f32.mrf.mxu3 }
 0x4f7   :  { %v4056_v1 = vadd.f32 %v4055_v62, %v3511_v35  ;;  %v2456_v62 = vpop.permute.xlu1 %2455 }
 0x4f8   :  { %v3794_v13 = vpop.f32.mrf.mxu1 }
 0x4f9   :  { %4250 = vst.msk [vmem:[%s8420_s6 + $0x538] sm:$0xff] %vm4082_vm2, %v4056_v1  ;;  %v3795_v45 = vadd.f32 %v3794_v13, %v3250_v2  ;;  %v8530_v13 = vld [vmem:[#allocation10_spill] sm:$0xff] }
 0x4fa   :  { %v3522_v12 = vpop.f32.mrf.mxu2 }
 0x4fb   :  { %4163 = vst.msk [vmem:[%s8420_s6 + $0x280] sm:$0xff] %vm4082_vm2, %v3795_v45  ;;  %v3523_v52 = vadd.f32 %v3522_v12, %v2441_v48 }
 0x4fc   :  { %v3261_v59 = vpop.f32.mrf.mxu0 }
 0x4fd   :  { %v3262_v56 = vadd.f32 %v3261_v59, %v8527_v21 }
 0x4fe   :  { %v4058_v6 = vpop.f32.mrf.mxu3 }
 0x4ff   :  { %v4059_v31 = vadd.f32 %v4058_v6, %v3514_v15 }
 0x500   :  { %v3797_v54 = vpop.f32.mrf.mxu1 }
 0x501   :  { %4251 = vst.msk [vmem:[%s8420_s6 + $0x540] sm:$0xff] %vm4082_vm2, %v4059_v31  ;;  %v3798_v57 = vadd.f32 %v3797_v54, %v3253_v37 }
 0x502   :  { %v3525_v50 = vpop.f32.mrf.mxu2 }
 0x503   :  { %4164 = vst.msk [vmem:[%s8420_s6 + $0x288] sm:$0xff] %vm4082_vm2, %v3798_v57  ;;  %v3526_v8 = vadd.f32 %v3525_v50, %v2446_v47 }
 0x504   :  { %v3264_v33 = vpop.f32.mrf.mxu0 }
 0x505   :  { %v3265_v10 = vadd.f32 %v3264_v33, %v8528_v22 }
 0x506   :  { %v4061_v32 = vpop.f32.mrf.mxu3 }
 0x507   :  { %v4062_v44 = vadd.f32 %v4061_v32, %v3517_v3 }
 0x508   :  { %v3800_v58 = vpop.f32.mrf.mxu1 }
 0x509   :  { %4252 = vst.msk [vmem:[%s8420_s6 + $0x548] sm:$0xff] %vm4082_vm2, %v4062_v44  ;;  %v3801_v29 = vadd.f32 %v3800_v58, %v3256_v42 }
 0x50a   :  { %v3528_v16 = vpop.f32.mrf.mxu2 }
 0x50b   :  { %4165 = vst.msk [vmem:[%s8420_s6 + $0x290] sm:$0xff] %vm4082_vm2, %v3801_v29  ;;  %v3529_v51 = vadd.f32 %v3528_v16, %v2451_v0 }
 0x50c   :  { %v3267_v28 = vpop.f32.mrf.mxu0 }
 0x50d   :  { %v3268_v46 = vadd.f32 %v3267_v28, %v8529_v61 }
 0x50e   :  { %v4064_v36 = vpop.f32.mrf.mxu3 }
 0x50f   :  { %v4065_v34 = vadd.f32 %v4064_v36, %v3520_v7 }
 0x510   :  { %v3803_v18 = vpop.f32.mrf.mxu1 }
 0x511   :  { %4253 = vst.msk [vmem:[%s8420_s6 + $0x550] sm:$0xff] %vm4082_vm2, %v4065_v34  ;;  %v3804_v40 = vadd.f32 %v3803_v18, %v3259_v60 }
 0x512   :  { %v3531_v41 = vpop.f32.mrf.mxu2 }
 0x513   :  { %4166 = vst.msk [vmem:[%s8420_s6 + $0x298] sm:$0xff] %vm4082_vm2, %v3804_v40  ;;  %v3532_v2 = vadd.f32 %v3531_v41, %v2456_v62 }
 0x514   :  { %v3270_v5 = vpop.f32.mrf.mxu0 }
 0x515   :  { %v3271_v45 = vadd.f32 %v3270_v5, %v8530_v13 }
 0x516   :  { %v4067_v11 = vpop.f32.mrf.mxu3 }
 0x517   :  { %v4068_v27 = vadd.f32 %v4067_v11, %v3523_v52 }
 0x518   :  { %v3806_v17 = vpop.f32.mrf.mxu1 }
 0x519   :  { %4254 = vst.msk [vmem:[%s8420_s6 + $0x558] sm:$0xff] %vm4082_vm2, %v4068_v27  ;;  %v3807_v53 = vadd.f32 %v3806_v17, %v3262_v56 }
 0x51a   :  { %v3534_v6 = vpop.f32.mrf.mxu2 }
 0x51b   :  { %4167 = vst.msk [vmem:[%s8420_s6 + $0x2a0] sm:$0xff] %vm4082_vm2, %v3807_v53  ;;  %v3535_v37 = vadd.f32 %v3534_v6, %v2461_v63 }
 0x51e   :  { %v4070_v49 = vpop.f32.mrf.mxu3 }
 0x51f   :  { %v4071_v23 = vadd.f32 %v4070_v49, %v3526_v8 }
 0x520   :  { %v3809_v30 = vpop.f32.mrf.mxu1 }
 0x521   :  { %4255 = vst.msk [vmem:[%s8420_s6 + $0x560] sm:$0xff] %vm4082_vm2, %v4071_v23  ;;  %v3810_v39 = vadd.f32 %v3809_v30, %v3265_v10 }
 0x523   :  { %4168 = vst.msk [vmem:[%s8420_s6 + $0x2a8] sm:$0xff] %vm4082_vm2, %v3810_v39 }
 0x526   :  { %v4073_v24 = vpop.f32.mrf.mxu3 }
 0x527   :  { %v4074_v26 = vadd.f32 %v4073_v24, %v3529_v51 }
 0x528   :  { %v3812_v35 = vpop.f32.mrf.mxu1 }
 0x529   :  { %4256 = vst.msk [vmem:[%s8420_s6 + $0x568] sm:$0xff] %vm4082_vm2, %v4074_v26  ;;  %v3813_v14 = vadd.f32 %v3812_v35, %v3268_v46 }
 0x52b   :  { %4169 = vst.msk [vmem:[%s8420_s6 + $0x2b0] sm:$0xff] %vm4082_vm2, %v3813_v14 }
 0x52e   :  { %v4076_v1 = vpop.f32.mrf.mxu3 }
 0x52f   :  { %v4077_v25 = vadd.f32 %v4076_v1, %v3532_v2 }
 0x530   :  { %v3815_v38 = vpop.f32.mrf.mxu1 }
 0x531   :  { %4257 = vst.msk [vmem:[%s8420_s6 + $0x570] sm:$0xff] %vm4082_vm2, %v4077_v25  ;;  %v3816_v15 = vadd.f32 %v3815_v38, %v3271_v45 }
 0x533   :  { %4170 = vst.msk [vmem:[%s8420_s6 + $0x2b8] sm:$0xff] %vm4082_vm2, %v3816_v15 }
 0x536   :  { %v4079_v31 = vpop.f32.mrf.mxu3 }
 0x537   :  { %v4080_v4 = vadd.f32 %v4079_v31, %v3535_v37 }
 0x539   :  { %4258 = vst.msk [vmem:[%s8420_s6 + $0x578] sm:$0xff] %vm4082_vm2, %v4080_v4 }

</bundles_post_ra>
